<compile_context>
chip_gen: v5e
topology: v5e:2x2
jax: 0.10.0
libtpu: 0.0.40
codegen_flags: <defaults>
</compile_context>

<pallas_src>
import functools
import math

import jax
import jax.numpy as jnp
from jax.experimental import pallas as pl
from jax.experimental.pallas import tpu as pltpu


def _mm(a, b, contract=(1, 0)):
    """MXU matmul with f32 accumulation; operands are expected in bf16."""
    return jax.lax.dot_general(
        a, b,
        dimension_numbers=(((contract[0],), (contract[1],)), ((), ())),
        preferred_element_type=jnp.float32)


def _attention_delta(a_bf, qs, groups, wvo_bf):
    """Residual delta of one attention op applied to several (q_rows, kv_rows) groups.

    a_bf   : (R, C) bf16  -- full activation slab; keys/values are raw rows of it
    qs     : (Rq, C) f32  -- q-rows @ Ws (softmax scale already folded into Ws)
    groups : list of ((q_lo, q_hi) into qs, (kv_lo, kv_hi) into a_bf); all offsets are
             static multiples of the sublane tile, so slicing is cheap (no relayout)
    wvo_bf : (C, C) bf16  -- fused Wv @ Wo, shared across all groups (one matmul)
    """
    qs_bf = qs.astype(jnp.bfloat16)
    outs = []
    for (qlo, qhi), (klo, khi) in groups:
        kv = a_bf[klo:khi]
        # scores: contract on the last axis of both operands (no kv.T relayout)
        s = _mm(qs_bf[qlo:qhi], kv, contract=(1, 1))            # (Nq, Nk) f32
        s = s - jnp.max(s, axis=-1, keepdims=True)
        p = jnp.exp(s)
        p = p * pl.reciprocal(jnp.sum(p, axis=-1, keepdims=True), approx=True)
        outs.append(_mm(p.astype(jnp.bfloat16), kv))            # (Nq, C) f32
    o = jnp.concatenate(outs, axis=0) if len(outs) > 1 else outs[0]
    return _mm(o.astype(jnp.bfloat16), wvo_bf)                  # (Rq, C) f32


def _fused_stack_kernel(z_ref, x_ref, wc_ref, ws_ref, z_out_ref, x_out_ref, *,
                        n_cross, n_self):
    """Runs the full cross-then-self attention stack for the whole batch in one step."""
    B, Nz, C = z_ref.shape
    _, Nx, _ = x_ref.shape
    Rz, Rx = B * Nz, B * Nx

    # One activation slab: rows [0, Rz) are z (batch-major), rows [Rz, Rz+Rx) are x.
    # Merging B into the row dim is a tile-aligned reshape (Nz, Nx multiples of 8).
    a = jnp.concatenate(
        [z_ref[...].reshape(Rz, C), x_ref[...].reshape(Rx, C)],
        axis=0).astype(jnp.float32)                              # (Rz+Rx, C) f32

    z_groups_self = [((b * Nz, (b + 1) * Nz), (b * Nz, (b + 1) * Nz))
                     for b in range(B)]
    x_groups_self = [((Rz + b * Nx, Rz + (b + 1) * Nx),
                      (Rz + b * Nx, Rz + (b + 1) * Nx)) for b in range(B)]

    # Cross-attention layers: (z, x) -> (z + Attn(z->x), x + Attn(x->z)),
    # both directions reading the pre-layer activations (matches z, x = layer(z, x)).
    for l in range(n_cross):
        ws_z, wvo_z = wc_ref[4 * l], wc_ref[4 * l + 1]           # z attends to x
        ws_x, wvo_x = wc_ref[4 * l + 2], wc_ref[4 * l + 3]       # x attends to z
        a_bf = a.astype(jnp.bfloat16)

        qs_z = _mm(a_bf[:Rz], ws_z)       # one matmul for all batch items' z queries
        dz = _attention_delta(
            a_bf, qs_z,
            [((b * Nz, (b + 1) * Nz), (Rz + b * Nx, Rz + (b + 1) * Nx))
             for b in range(B)],
            wvo_z)

        qs_x = _mm(a_bf[Rz:], ws_x)       # one matmul for all batch items' x queries
        dx = _attention_delta(
            a_bf, qs_x,
            [((b * Nx, (b + 1) * Nx), (b * Nz, (b + 1) * Nz)) for b in range(B)],
            wvo_x)

        a = a + jnp.concatenate([dz, dx], axis=0)

    # Self-attention layers: the same layer weights applied to z, then to x.
    # TODO(synk): the Swin windowed partition controlled by layer.H / layer.W lives
    # inside the injected self-attention block (not this container); full
    # self-attention over each stream is used here.
    for l in range(n_self):
        ws, wvo = ws_ref[2 * l], ws_ref[2 * l + 1]
        a_bf = a.astype(jnp.bfloat16)
        qs = _mm(a_bf, ws)    # ONE query projection shared over both streams & batch
        a = a + _attention_delta(a_bf, qs, z_groups_self + x_groups_self, wvo)

    # TODO(synk): final stores are C=32 lanes wide (masked vst); negligible (<10 KiB)
    # at this size, revisit with a lane-dense output slab if Nz/Nx/C grow.
    z_out_ref[...] = a[:Rz].reshape(B, Nz, C).astype(z_out_ref.dtype)
    x_out_ref[...] = a[Rz:].reshape(B, Nx, C).astype(x_out_ref.dtype)


def fused_cross_self_forward(z, x, w_cross, w_self, n_cross, n_self):
    """One pallas_call, one grid step, for the entire layer stack.

    z: (B, Nz, C), x: (B, Nx, C)
    w_cross: (max(1, 4*n_cross), C, C) bf16 -- per layer [Ws_z, Wvo_z, Ws_x, Wvo_x]
    w_self : (max(1, 2*n_self),  C, C) bf16 -- per layer [Ws, Wvo]
    """
    B, Nz, C = z.shape
    _, Nx, _ = x.shape

    kernel = functools.partial(_fused_stack_kernel, n_cross=n_cross, n_self=n_self)

    # Single grid step: v5e/v6e have one TensorCore, so a batch grid is a serial loop
    # paying ~0.35 us/step; batch is folded into the row dimension inside the kernel.
    # TODO(synk): on v7x (2 TCs) a grid=(B,) "parallel" split could halve latency once
    # per-item work exceeds the per-core launch/DMA cost; benchmark before flipping.
    return pl.pallas_call(
        kernel,
        out_shape=(
            jax.ShapeDtypeStruct((B, Nz, C), z.dtype),
            jax.ShapeDtypeStruct((B, Nx, C), x.dtype),
        ),
        grid=(1,),
        in_specs=[
            pl.BlockSpec((B, Nz, C), lambda i: (0, 0, 0)),
            pl.BlockSpec((B, Nx, C), lambda i: (0, 0, 0)),
            pl.BlockSpec(w_cross.shape, lambda i: (0, 0, 0)),
            pl.BlockSpec(w_self.shape, lambda i: (0, 0, 0)),
        ],
        out_specs=[
            pl.BlockSpec((B, Nz, C), lambda i: (0, 0, 0)),
            pl.BlockSpec((B, Nx, C), lambda i: (0, 0, 0)),
        ],
        compiler_params=pltpu.CompilerParams(dimension_semantics=("arbitrary",)),
    )(z, x, w_cross, w_self)


def make_fused_attn_params(key, dim, scale=0.05):
    """Fused single-head attention weights.

    Ws  = (Wq @ Wk^T) / sqrt(dim): scores = (q_in @ Ws) @ kv_in^T (softmax scale folded)
    Wvo = Wv @ Wo               : out    = softmax(scores) @ kv_in @ Wvo
    The folding is exact in f32; only the single bf16 cast (done in the wrapper) differs
    from running four separate bf16 projections.
    """
    ks = jax.random.split(key, 4)
    wq, wk, wv, wo = (scale * jax.random.normal(k, (dim, dim), jnp.float32) for k in ks)
    ws = (wq @ wk.T) / math.sqrt(dim)
    wvo = wv @ wo
    return ws, wvo


class CrossAttentionLayer:
    """(z, x) -> (z', x'): symmetric residual cross attention (weight holder)."""

    def __init__(self, key, dim):
        kz, kx = jax.random.split(key)
        self.ws_z, self.wvo_z = make_fused_attn_params(kz, dim)   # z attends to x
        self.ws_x, self.wvo_x = make_fused_attn_params(kx, dim)   # x attends to z


class SelfAttentionLayer:
    """t -> t': residual self attention. H/W mirror the Swin block interface."""

    def __init__(self, key, dim):
        self.ws, self.wvo = make_fused_attn_params(key, dim)
        self.H = None
        self.W = None


class CrossAttentionModule:
    """Faithful port of the PyTorch container's forward, fused into one kernel."""

    def __init__(self, cross_attentions, self_attentions, z_size, x_size):
        self.z_size = z_size
        self.x_size = x_size
        self.cross_attn = cross_attentions   # list / single / None
        self.self_attn = self_attentions     # list / single / None

        cross_list = self._as_list(cross_attentions)
        self_list = self._as_list(self_attentions)
        self._n_cross = len(cross_list)
        self._n_self = len(self_list)
        self._self_list = self_list

        dims = ([l.ws_z.shape[0] for l in cross_list] +
                [l.ws.shape[0] for l in self_list])
        dim = dims[0] if dims else 1

        # Weight packs built once at init, already cast to bf16 (halves weight DMA,
        # removes all in-kernel weight casts).
        if cross_list:
            self._w_cross = jnp.stack(
                [m for l in cross_list
                 for m in (l.ws_z, l.wvo_z, l.ws_x, l.wvo_x)]).astype(jnp.bfloat16)
        else:
            self._w_cross = jnp.zeros((1, dim, dim), jnp.bfloat16)  # dummy, never read
        if self_list:
            self._w_self = jnp.stack(
                [m for l in self_list for m in (l.ws, l.wvo)]).astype(jnp.bfloat16)
        else:
            self._w_self = jnp.zeros((1, dim, dim), jnp.bfloat16)   # dummy, never read

    @staticmethod
    def _as_list(layers):
        if layers is None:
            return []
        if isinstance(layers, (list, tuple)):
            return list(layers)
        return [layers]

    def __call__(self, z, x):
        if self._n_cross == 0 and self._n_self == 0:
            return z, x
        # Mirror the container's H/W bookkeeping: the PyTorch forward sets H/W to
        # z_size before the z pass and x_size before the x pass of each self layer.
        # TODO(synk): H/W are only consumed by the injected Swin windowed partition,
        # which is not defined in this container; recorded for interface fidelity.
        for layer in self._self_list:
            layer.H, layer.W = self.x_size[0], self.x_size[1]
        return fused_cross_self_forward(
            z, x, self._w_cross, self._w_self, self._n_cross, self._n_self)


if __name__ == "__main__":
    B, C = 2, 32
    z_size = (4, 4)    # template feature map  -> Nz = 16 tokens
    x_size = (8, 8)    # search feature map    -> Nx = 64 tokens
    Nz = z_size[0] * z_size[1]
    Nx = x_size[0] * x_size[1]

    root = jax.random.PRNGKey(0)
    k_z, k_x, k_c0, k_c1, k_s0, k_s1 = jax.random.split(root, 6)

    z = jax.random.normal(k_z, (B, Nz, C), jnp.float32)
    x = jax.random.normal(k_x, (B, Nx, C), jnp.float32)

    cross_layers = [CrossAttentionLayer(k_c0, C), CrossAttentionLayer(k_c1, C)]
    self_layers = [SelfAttentionLayer(k_s0, C), SelfAttentionLayer(k_s1, C)]

    module = CrossAttentionModule(cross_layers, self_layers, z_size, x_size)

    z_out, x_out = module(z, x)
    jax.block_until_ready((z_out, x_out))

    assert z_out.shape == (B, Nz, C) and x_out.shape == (B, Nx, C)
    assert jnp.all(jnp.isfinite(z_out)) and jnp.all(jnp.isfinite(x_out))
    print("KERNEL_OK")
</pallas_src>

<mosaic_0001>
module attributes {stable_mosaic.version = 11 : i64} {
  func.func @_fused_stack_kernel(%arg0: i32, %arg1: memref<2x16x32xf32, #tpu.memory_space<vmem>>, %arg2: memref<2x64x32xf32, #tpu.memory_space<vmem>>, %arg3: memref<8x32x32xbf16, #tpu.memory_space<vmem>>, %arg4: memref<4x32x32xbf16, #tpu.memory_space<vmem>>, %arg5: memref<2x16x32xf32, #tpu.memory_space<vmem>>, %arg6: memref<2x64x32xf32, #tpu.memory_space<vmem>>) attributes {dimension_semantics = [#tpu.dimension_semantics<arbitrary>], iteration_bounds = array<i64: 1>, scalar_prefetch = 0 : i64, scratch_operands = 0 : i64, tpu.core_type = #tpu.core_type<tc>, window_params = [{pipeline_mode = #tpu.pipeline_mode<synchronous>, transform_indices = @transform_0, window_bounds = array<i64: 2, 16, 32>}, {pipeline_mode = #tpu.pipeline_mode<synchronous>, transform_indices = @transform_1, window_bounds = array<i64: 2, 64, 32>}, {pipeline_mode = #tpu.pipeline_mode<synchronous>, transform_indices = @transform_2, window_bounds = array<i64: 8, 32, 32>}, {pipeline_mode = #tpu.pipeline_mode<synchronous>, transform_indices = @transform_3, window_bounds = array<i64: 4, 32, 32>}, {pipeline_mode = #tpu.pipeline_mode<synchronous>, transform_indices = @transform_4, window_bounds = array<i64: 2, 16, 32>}, {pipeline_mode = #tpu.pipeline_mode<synchronous>, transform_indices = @transform_5, window_bounds = array<i64: 2, 64, 32>}]} {
    %c0 = arith.constant 0 : index
    %c0_0 = arith.constant 0 : index
    %c0_1 = arith.constant 0 : index
    %0 = vector.load %arg1[%c0, %c0_0, %c0_1] : memref<2x16x32xf32, #tpu.memory_space<vmem>>, vector<2x16x32xf32>
    %1 = vector.shape_cast %0 : vector<2x16x32xf32> to vector<32x32xf32>
    %c0_2 = arith.constant 0 : index
    %c0_3 = arith.constant 0 : index
    %c0_4 = arith.constant 0 : index
    %2 = vector.load %arg2[%c0_2, %c0_3, %c0_4] : memref<2x64x32xf32, #tpu.memory_space<vmem>>, vector<2x64x32xf32>
    %3 = vector.shape_cast %2 : vector<2x64x32xf32> to vector<128x32xf32>
    %4 = tpu.concatenate %1, %3 in 0 : vector<32x32xf32>, vector<128x32xf32> -> vector<160x32xf32>
    %c0_5 = arith.constant 0 : index
    %c0_6 = arith.constant 0 : index
    %c0_7 = arith.constant 0 : index
    %5 = vector.load %arg3[%c0_5, %c0_6, %c0_7] : memref<8x32x32xbf16, #tpu.memory_space<vmem>>, vector<1x32x32xbf16>
    %6 = vector.shape_cast %5 : vector<1x32x32xbf16> to vector<32x32xbf16>
    %c1 = arith.constant 1 : index
    %c0_8 = arith.constant 0 : index
    %c0_9 = arith.constant 0 : index
    %7 = vector.load %arg3[%c1, %c0_8, %c0_9] : memref<8x32x32xbf16, #tpu.memory_space<vmem>>, vector<1x32x32xbf16>
    %8 = vector.shape_cast %7 : vector<1x32x32xbf16> to vector<32x32xbf16>
    %c2 = arith.constant 2 : index
    %c0_10 = arith.constant 0 : index
    %c0_11 = arith.constant 0 : index
    %9 = vector.load %arg3[%c2, %c0_10, %c0_11] : memref<8x32x32xbf16, #tpu.memory_space<vmem>>, vector<1x32x32xbf16>
    %10 = vector.shape_cast %9 : vector<1x32x32xbf16> to vector<32x32xbf16>
    %c3 = arith.constant 3 : index
    %c0_12 = arith.constant 0 : index
    %c0_13 = arith.constant 0 : index
    %11 = vector.load %arg3[%c3, %c0_12, %c0_13] : memref<8x32x32xbf16, #tpu.memory_space<vmem>>, vector<1x32x32xbf16>
    %12 = vector.shape_cast %11 : vector<1x32x32xbf16> to vector<32x32xbf16>
    %13 = arith.truncf %4 : vector<160x32xf32> to vector<160x32xbf16>
    %14 = vector.extract_strided_slice %13 {offsets = [0, 0], sizes = [32, 32], strides = [1, 1]} : vector<160x32xbf16> to vector<32x32xbf16>
    %cst = arith.constant dense<0.000000e+00> : vector<32x32xf32>
    %15 = tpu.matmul %14, %6, %cst {dimension_numbers = #tpu.dot_dimension_numbers<[1], [0], [0], [1], [0, 0, 1, 1], [], []>} : vector<32x32xbf16>, vector<32x32xbf16>, vector<32x32xf32> -> vector<32x32xf32>
    %16 = arith.truncf %15 : vector<32x32xf32> to vector<32x32xbf16>
    %17 = vector.extract_strided_slice %13 {offsets = [32, 0], sizes = [64, 32], strides = [1, 1]} : vector<160x32xbf16> to vector<64x32xbf16>
    %18 = vector.extract_strided_slice %16 {offsets = [0, 0], sizes = [16, 32], strides = [1, 1]} : vector<32x32xbf16> to vector<16x32xbf16>
    %cst_14 = arith.constant dense<0.000000e+00> : vector<16x64xf32>
    %19 = tpu.matmul %18, %17, %cst_14 {dimension_numbers = #tpu.dot_dimension_numbers<[1], [1], [0], [0], [0, 0, 1, 0], [], []>} : vector<16x32xbf16>, vector<64x32xbf16>, vector<16x64xf32> -> vector<16x64xf32>
    %cst_15 = arith.constant dense<0xFF800000> : vector<16xf32>
    %20 = vector.multi_reduction <maximumf>, %19, %cst_15 [1] : vector<16x64xf32> to vector<16xf32>
    %21 = vector.shape_cast %20 : vector<16xf32> to vector<16x1xf32>
    %22 = vector.broadcast %21 : vector<16x1xf32> to vector<16x64xf32>
    %23 = arith.subf %19, %22 : vector<16x64xf32>
    %24 = math.exp %23 : vector<16x64xf32>
    %cst_16 = arith.constant dense<0.000000e+00> : vector<16xf32>
    %25 = vector.multi_reduction <add>, %24, %cst_16 [1] : vector<16x64xf32> to vector<16xf32>
    %26 = vector.shape_cast %25 : vector<16xf32> to vector<16x1xf32>
    %27 = tpu.reciprocal %26 {approx = true} : vector<16x1xf32> -> vector<16x1xf32>
    %28 = vector.broadcast %27 : vector<16x1xf32> to vector<16x64xf32>
    %29 = arith.mulf %24, %28 : vector<16x64xf32>
    %30 = arith.truncf %29 : vector<16x64xf32> to vector<16x64xbf16>
    %cst_17 = arith.constant dense<0.000000e+00> : vector<16x32xf32>
    %31 = tpu.matmul %30, %17, %cst_17 {dimension_numbers = #tpu.dot_dimension_numbers<[1], [0], [0], [1], [0, 0, 1, 1], [], []>} : vector<16x64xbf16>, vector<64x32xbf16>, vector<16x32xf32> -> vector<16x32xf32>
    %32 = vector.extract_strided_slice %13 {offsets = [96, 0], sizes = [64, 32], strides = [1, 1]} : vector<160x32xbf16> to vector<64x32xbf16>
    %33 = vector.extract_strided_slice %16 {offsets = [16, 0], sizes = [16, 32], strides = [1, 1]} : vector<32x32xbf16> to vector<16x32xbf16>
    %cst_18 = arith.constant dense<0.000000e+00> : vector<16x64xf32>
    %34 = tpu.matmul %33, %32, %cst_18 {dimension_numbers = #tpu.dot_dimension_numbers<[1], [1], [0], [0], [0, 0, 1, 0], [], []>} : vector<16x32xbf16>, vector<64x32xbf16>, vector<16x64xf32> -> vector<16x64xf32>
    %cst_19 = arith.constant dense<0xFF800000> : vector<16xf32>
    %35 = vector.multi_reduction <maximumf>, %34, %cst_19 [1] : vector<16x64xf32> to vector<16xf32>
    %36 = vector.shape_cast %35 : vector<16xf32> to vector<16x1xf32>
    %37 = vector.broadcast %36 : vector<16x1xf32> to vector<16x64xf32>
    %38 = arith.subf %34, %37 : vector<16x64xf32>
    %39 = math.exp %38 : vector<16x64xf32>
    %cst_20 = arith.constant dense<0.000000e+00> : vector<16xf32>
    %40 = vector.multi_reduction <add>, %39, %cst_20 [1] : vector<16x64xf32> to vector<16xf32>
    %41 = vector.shape_cast %40 : vector<16xf32> to vector<16x1xf32>
    %42 = tpu.reciprocal %41 {approx = true} : vector<16x1xf32> -> vector<16x1xf32>
    %43 = vector.broadcast %42 : vector<16x1xf32> to vector<16x64xf32>
    %44 = arith.mulf %39, %43 : vector<16x64xf32>
    %45 = arith.truncf %44 : vector<16x64xf32> to vector<16x64xbf16>
    %cst_21 = arith.constant dense<0.000000e+00> : vector<16x32xf32>
    %46 = tpu.matmul %45, %32, %cst_21 {dimension_numbers = #tpu.dot_dimension_numbers<[1], [0], [0], [1], [0, 0, 1, 1], [], []>} : vector<16x64xbf16>, vector<64x32xbf16>, vector<16x32xf32> -> vector<16x32xf32>
    %47 = tpu.concatenate %31, %46 in 0 : vector<16x32xf32>, vector<16x32xf32> -> vector<32x32xf32>
    %48 = arith.truncf %47 : vector<32x32xf32> to vector<32x32xbf16>
    %cst_22 = arith.constant dense<0.000000e+00> : vector<32x32xf32>
    %49 = tpu.matmul %48, %8, %cst_22 {dimension_numbers = #tpu.dot_dimension_numbers<[1], [0], [0], [1], [0, 0, 1, 1], [], []>} : vector<32x32xbf16>, vector<32x32xbf16>, vector<32x32xf32> -> vector<32x32xf32>
    %50 = vector.extract_strided_slice %13 {offsets = [32, 0], sizes = [128, 32], strides = [1, 1]} : vector<160x32xbf16> to vector<128x32xbf16>
    %cst_23 = arith.constant dense<0.000000e+00> : vector<128x32xf32>
    %51 = tpu.matmul %50, %10, %cst_23 {dimension_numbers = #tpu.dot_dimension_numbers<[1], [0], [0], [1], [0, 0, 1, 1], [], []>} : vector<128x32xbf16>, vector<32x32xbf16>, vector<128x32xf32> -> vector<128x32xf32>
    %52 = arith.truncf %51 : vector<128x32xf32> to vector<128x32xbf16>
    %53 = vector.extract_strided_slice %13 {offsets = [0, 0], sizes = [16, 32], strides = [1, 1]} : vector<160x32xbf16> to vector<16x32xbf16>
    %54 = vector.extract_strided_slice %52 {offsets = [0, 0], sizes = [64, 32], strides = [1, 1]} : vector<128x32xbf16> to vector<64x32xbf16>
    %cst_24 = arith.constant dense<0.000000e+00> : vector<64x16xf32>
    %55 = tpu.matmul %54, %53, %cst_24 {dimension_numbers = #tpu.dot_dimension_numbers<[1], [1], [0], [0], [0, 0, 1, 0], [], []>} : vector<64x32xbf16>, vector<16x32xbf16>, vector<64x16xf32> -> vector<64x16xf32>
    %cst_25 = arith.constant dense<0xFF800000> : vector<64xf32>
    %56 = vector.multi_reduction <maximumf>, %55, %cst_25 [1] : vector<64x16xf32> to vector<64xf32>
    %57 = vector.shape_cast %56 : vector<64xf32> to vector<64x1xf32>
    %58 = vector.broadcast %57 : vector<64x1xf32> to vector<64x16xf32>
    %59 = arith.subf %55, %58 : vector<64x16xf32>
    %60 = math.exp %59 : vector<64x16xf32>
    %cst_26 = arith.constant dense<0.000000e+00> : vector<64xf32>
    %61 = vector.multi_reduction <add>, %60, %cst_26 [1] : vector<64x16xf32> to vector<64xf32>
    %62 = vector.shape_cast %61 : vector<64xf32> to vector<64x1xf32>
    %63 = tpu.reciprocal %62 {approx = true} : vector<64x1xf32> -> vector<64x1xf32>
    %64 = vector.broadcast %63 : vector<64x1xf32> to vector<64x16xf32>
    %65 = arith.mulf %60, %64 : vector<64x16xf32>
    %66 = arith.truncf %65 : vector<64x16xf32> to vector<64x16xbf16>
    %cst_27 = arith.constant dense<0.000000e+00> : vector<64x32xf32>
    %67 = tpu.matmul %66, %53, %cst_27 {dimension_numbers = #tpu.dot_dimension_numbers<[1], [0], [0], [1], [0, 0, 1, 1], [], []>} : vector<64x16xbf16>, vector<16x32xbf16>, vector<64x32xf32> -> vector<64x32xf32>
    %68 = vector.extract_strided_slice %13 {offsets = [16, 0], sizes = [16, 32], strides = [1, 1]} : vector<160x32xbf16> to vector<16x32xbf16>
    %69 = vector.extract_strided_slice %52 {offsets = [64, 0], sizes = [64, 32], strides = [1, 1]} : vector<128x32xbf16> to vector<64x32xbf16>
    %cst_28 = arith.constant dense<0.000000e+00> : vector<64x16xf32>
    %70 = tpu.matmul %69, %68, %cst_28 {dimension_numbers = #tpu.dot_dimension_numbers<[1], [1], [0], [0], [0, 0, 1, 0], [], []>} : vector<64x32xbf16>, vector<16x32xbf16>, vector<64x16xf32> -> vector<64x16xf32>
    %cst_29 = arith.constant dense<0xFF800000> : vector<64xf32>
    %71 = vector.multi_reduction <maximumf>, %70, %cst_29 [1] : vector<64x16xf32> to vector<64xf32>
    %72 = vector.shape_cast %71 : vector<64xf32> to vector<64x1xf32>
    %73 = vector.broadcast %72 : vector<64x1xf32> to vector<64x16xf32>
    %74 = arith.subf %70, %73 : vector<64x16xf32>
    %75 = math.exp %74 : vector<64x16xf32>
    %cst_30 = arith.constant dense<0.000000e+00> : vector<64xf32>
    %76 = vector.multi_reduction <add>, %75, %cst_30 [1] : vector<64x16xf32> to vector<64xf32>
    %77 = vector.shape_cast %76 : vector<64xf32> to vector<64x1xf32>
    %78 = tpu.reciprocal %77 {approx = true} : vector<64x1xf32> -> vector<64x1xf32>
    %79 = vector.broadcast %78 : vector<64x1xf32> to vector<64x16xf32>
    %80 = arith.mulf %75, %79 : vector<64x16xf32>
    %81 = arith.truncf %80 : vector<64x16xf32> to vector<64x16xbf16>
    %cst_31 = arith.constant dense<0.000000e+00> : vector<64x32xf32>
    %82 = tpu.matmul %81, %68, %cst_31 {dimension_numbers = #tpu.dot_dimension_numbers<[1], [0], [0], [1], [0, 0, 1, 1], [], []>} : vector<64x16xbf16>, vector<16x32xbf16>, vector<64x32xf32> -> vector<64x32xf32>
    %83 = tpu.concatenate %67, %82 in 0 : vector<64x32xf32>, vector<64x32xf32> -> vector<128x32xf32>
    %84 = arith.truncf %83 : vector<128x32xf32> to vector<128x32xbf16>
    %cst_32 = arith.constant dense<0.000000e+00> : vector<128x32xf32>
    %85 = tpu.matmul %84, %12, %cst_32 {dimension_numbers = #tpu.dot_dimension_numbers<[1], [0], [0], [1], [0, 0, 1, 1], [], []>} : vector<128x32xbf16>, vector<32x32xbf16>, vector<128x32xf32> -> vector<128x32xf32>
    %86 = tpu.concatenate %49, %85 in 0 : vector<32x32xf32>, vector<128x32xf32> -> vector<160x32xf32>
    %87 = arith.addf %4, %86 : vector<160x32xf32>
    %c4 = arith.constant 4 : index
    %c0_33 = arith.constant 0 : index
    %c0_34 = arith.constant 0 : index
    %88 = vector.load %arg3[%c4, %c0_33, %c0_34] : memref<8x32x32xbf16, #tpu.memory_space<vmem>>, vector<1x32x32xbf16>
    %89 = vector.shape_cast %88 : vector<1x32x32xbf16> to vector<32x32xbf16>
    %c5 = arith.constant 5 : index
    %c0_35 = arith.constant 0 : index
    %c0_36 = arith.constant 0 : index
    %90 = vector.load %arg3[%c5, %c0_35, %c0_36] : memref<8x32x32xbf16, #tpu.memory_space<vmem>>, vector<1x32x32xbf16>
    %91 = vector.shape_cast %90 : vector<1x32x32xbf16> to vector<32x32xbf16>
    %c6 = arith.constant 6 : index
    %c0_37 = arith.constant 0 : index
    %c0_38 = arith.constant 0 : index
    %92 = vector.load %arg3[%c6, %c0_37, %c0_38] : memref<8x32x32xbf16, #tpu.memory_space<vmem>>, vector<1x32x32xbf16>
    %93 = vector.shape_cast %92 : vector<1x32x32xbf16> to vector<32x32xbf16>
    %c7 = arith.constant 7 : index
    %c0_39 = arith.constant 0 : index
    %c0_40 = arith.constant 0 : index
    %94 = vector.load %arg3[%c7, %c0_39, %c0_40] : memref<8x32x32xbf16, #tpu.memory_space<vmem>>, vector<1x32x32xbf16>
    %95 = vector.shape_cast %94 : vector<1x32x32xbf16> to vector<32x32xbf16>
    %96 = arith.truncf %87 : vector<160x32xf32> to vector<160x32xbf16>
    %97 = vector.extract_strided_slice %96 {offsets = [0, 0], sizes = [32, 32], strides = [1, 1]} : vector<160x32xbf16> to vector<32x32xbf16>
    %cst_41 = arith.constant dense<0.000000e+00> : vector<32x32xf32>
    %98 = tpu.matmul %97, %89, %cst_41 {dimension_numbers = #tpu.dot_dimension_numbers<[1], [0], [0], [1], [0, 0, 1, 1], [], []>} : vector<32x32xbf16>, vector<32x32xbf16>, vector<32x32xf32> -> vector<32x32xf32>
    %99 = arith.truncf %98 : vector<32x32xf32> to vector<32x32xbf16>
    %100 = vector.extract_strided_slice %96 {offsets = [32, 0], sizes = [64, 32], strides = [1, 1]} : vector<160x32xbf16> to vector<64x32xbf16>
    %101 = vector.extract_strided_slice %99 {offsets = [0, 0], sizes = [16, 32], strides = [1, 1]} : vector<32x32xbf16> to vector<16x32xbf16>
    %cst_42 = arith.constant dense<0.000000e+00> : vector<16x64xf32>
    %102 = tpu.matmul %101, %100, %cst_42 {dimension_numbers = #tpu.dot_dimension_numbers<[1], [1], [0], [0], [0, 0, 1, 0], [], []>} : vector<16x32xbf16>, vector<64x32xbf16>, vector<16x64xf32> -> vector<16x64xf32>
    %cst_43 = arith.constant dense<0xFF800000> : vector<16xf32>
    %103 = vector.multi_reduction <maximumf>, %102, %cst_43 [1] : vector<16x64xf32> to vector<16xf32>
    %104 = vector.shape_cast %103 : vector<16xf32> to vector<16x1xf32>
    %105 = vector.broadcast %104 : vector<16x1xf32> to vector<16x64xf32>
    %106 = arith.subf %102, %105 : vector<16x64xf32>
    %107 = math.exp %106 : vector<16x64xf32>
    %cst_44 = arith.constant dense<0.000000e+00> : vector<16xf32>
    %108 = vector.multi_reduction <add>, %107, %cst_44 [1] : vector<16x64xf32> to vector<16xf32>
    %109 = vector.shape_cast %108 : vector<16xf32> to vector<16x1xf32>
    %110 = tpu.reciprocal %109 {approx = true} : vector<16x1xf32> -> vector<16x1xf32>
    %111 = vector.broadcast %110 : vector<16x1xf32> to vector<16x64xf32>
    %112 = arith.mulf %107, %111 : vector<16x64xf32>
    %113 = arith.truncf %112 : vector<16x64xf32> to vector<16x64xbf16>
    %cst_45 = arith.constant dense<0.000000e+00> : vector<16x32xf32>
    %114 = tpu.matmul %113, %100, %cst_45 {dimension_numbers = #tpu.dot_dimension_numbers<[1], [0], [0], [1], [0, 0, 1, 1], [], []>} : vector<16x64xbf16>, vector<64x32xbf16>, vector<16x32xf32> -> vector<16x32xf32>
    %115 = vector.extract_strided_slice %96 {offsets = [96, 0], sizes = [64, 32], strides = [1, 1]} : vector<160x32xbf16> to vector<64x32xbf16>
    %116 = vector.extract_strided_slice %99 {offsets = [16, 0], sizes = [16, 32], strides = [1, 1]} : vector<32x32xbf16> to vector<16x32xbf16>
    %cst_46 = arith.constant dense<0.000000e+00> : vector<16x64xf32>
    %117 = tpu.matmul %116, %115, %cst_46 {dimension_numbers = #tpu.dot_dimension_numbers<[1], [1], [0], [0], [0, 0, 1, 0], [], []>} : vector<16x32xbf16>, vector<64x32xbf16>, vector<16x64xf32> -> vector<16x64xf32>
    %cst_47 = arith.constant dense<0xFF800000> : vector<16xf32>
    %118 = vector.multi_reduction <maximumf>, %117, %cst_47 [1] : vector<16x64xf32> to vector<16xf32>
    %119 = vector.shape_cast %118 : vector<16xf32> to vector<16x1xf32>
    %120 = vector.broadcast %119 : vector<16x1xf32> to vector<16x64xf32>
    %121 = arith.subf %117, %120 : vector<16x64xf32>
    %122 = math.exp %121 : vector<16x64xf32>
    %cst_48 = arith.constant dense<0.000000e+00> : vector<16xf32>
    %123 = vector.multi_reduction <add>, %122, %cst_48 [1] : vector<16x64xf32> to vector<16xf32>
    %124 = vector.shape_cast %123 : vector<16xf32> to vector<16x1xf32>
    %125 = tpu.reciprocal %124 {approx = true} : vector<16x1xf32> -> vector<16x1xf32>
    %126 = vector.broadcast %125 : vector<16x1xf32> to vector<16x64xf32>
    %127 = arith.mulf %122, %126 : vector<16x64xf32>
    %128 = arith.truncf %127 : vector<16x64xf32> to vector<16x64xbf16>
    %cst_49 = arith.constant dense<0.000000e+00> : vector<16x32xf32>
    %129 = tpu.matmul %128, %115, %cst_49 {dimension_numbers = #tpu.dot_dimension_numbers<[1], [0], [0], [1], [0, 0, 1, 1], [], []>} : vector<16x64xbf16>, vector<64x32xbf16>, vector<16x32xf32> -> vector<16x32xf32>
    %130 = tpu.concatenate %114, %129 in 0 : vector<16x32xf32>, vector<16x32xf32> -> vector<32x32xf32>
    %131 = arith.truncf %130 : vector<32x32xf32> to vector<32x32xbf16>
    %cst_50 = arith.constant dense<0.000000e+00> : vector<32x32xf32>
    %132 = tpu.matmul %131, %91, %cst_50 {dimension_numbers = #tpu.dot_dimension_numbers<[1], [0], [0], [1], [0, 0, 1, 1], [], []>} : vector<32x32xbf16>, vector<32x32xbf16>, vector<32x32xf32> -> vector<32x32xf32>
    %133 = vector.extract_strided_slice %96 {offsets = [32, 0], sizes = [128, 32], strides = [1, 1]} : vector<160x32xbf16> to vector<128x32xbf16>
    %cst_51 = arith.constant dense<0.000000e+00> : vector<128x32xf32>
    %134 = tpu.matmul %133, %93, %cst_51 {dimension_numbers = #tpu.dot_dimension_numbers<[1], [0], [0], [1], [0, 0, 1, 1], [], []>} : vector<128x32xbf16>, vector<32x32xbf16>, vector<128x32xf32> -> vector<128x32xf32>
    %135 = arith.truncf %134 : vector<128x32xf32> to vector<128x32xbf16>
    %136 = vector.extract_strided_slice %96 {offsets = [0, 0], sizes = [16, 32], strides = [1, 1]} : vector<160x32xbf16> to vector<16x32xbf16>
    %137 = vector.extract_strided_slice %135 {offsets = [0, 0], sizes = [64, 32], strides = [1, 1]} : vector<128x32xbf16> to vector<64x32xbf16>
    %cst_52 = arith.constant dense<0.000000e+00> : vector<64x16xf32>
    %138 = tpu.matmul %137, %136, %cst_52 {dimension_numbers = #tpu.dot_dimension_numbers<[1], [1], [0], [0], [0, 0, 1, 0], [], []>} : vector<64x32xbf16>, vector<16x32xbf16>, vector<64x16xf32> -> vector<64x16xf32>
    %cst_53 = arith.constant dense<0xFF800000> : vector<64xf32>
    %139 = vector.multi_reduction <maximumf>, %138, %cst_53 [1] : vector<64x16xf32> to vector<64xf32>
    %140 = vector.shape_cast %139 : vector<64xf32> to vector<64x1xf32>
    %141 = vector.broadcast %140 : vector<64x1xf32> to vector<64x16xf32>
    %142 = arith.subf %138, %141 : vector<64x16xf32>
    %143 = math.exp %142 : vector<64x16xf32>
    %cst_54 = arith.constant dense<0.000000e+00> : vector<64xf32>
    %144 = vector.multi_reduction <add>, %143, %cst_54 [1] : vector<64x16xf32> to vector<64xf32>
    %145 = vector.shape_cast %144 : vector<64xf32> to vector<64x1xf32>
    %146 = tpu.reciprocal %145 {approx = true} : vector<64x1xf32> -> vector<64x1xf32>
    %147 = vector.broadcast %146 : vector<64x1xf32> to vector<64x16xf32>
    %148 = arith.mulf %143, %147 : vector<64x16xf32>
    %149 = arith.truncf %148 : vector<64x16xf32> to vector<64x16xbf16>
    %cst_55 = arith.constant dense<0.000000e+00> : vector<64x32xf32>
    %150 = tpu.matmul %149, %136, %cst_55 {dimension_numbers = #tpu.dot_dimension_numbers<[1], [0], [0], [1], [0, 0, 1, 1], [], []>} : vector<64x16xbf16>, vector<16x32xbf16>, vector<64x32xf32> -> vector<64x32xf32>
    %151 = vector.extract_strided_slice %96 {offsets = [16, 0], sizes = [16, 32], strides = [1, 1]} : vector<160x32xbf16> to vector<16x32xbf16>
    %152 = vector.extract_strided_slice %135 {offsets = [64, 0], sizes = [64, 32], strides = [1, 1]} : vector<128x32xbf16> to vector<64x32xbf16>
    %cst_56 = arith.constant dense<0.000000e+00> : vector<64x16xf32>
    %153 = tpu.matmul %152, %151, %cst_56 {dimension_numbers = #tpu.dot_dimension_numbers<[1], [1], [0], [0], [0, 0, 1, 0], [], []>} : vector<64x32xbf16>, vector<16x32xbf16>, vector<64x16xf32> -> vector<64x16xf32>
    %cst_57 = arith.constant dense<0xFF800000> : vector<64xf32>
    %154 = vector.multi_reduction <maximumf>, %153, %cst_57 [1] : vector<64x16xf32> to vector<64xf32>
    %155 = vector.shape_cast %154 : vector<64xf32> to vector<64x1xf32>
    %156 = vector.broadcast %155 : vector<64x1xf32> to vector<64x16xf32>
    %157 = arith.subf %153, %156 : vector<64x16xf32>
    %158 = math.exp %157 : vector<64x16xf32>
    %cst_58 = arith.constant dense<0.000000e+00> : vector<64xf32>
    %159 = vector.multi_reduction <add>, %158, %cst_58 [1] : vector<64x16xf32> to vector<64xf32>
    %160 = vector.shape_cast %159 : vector<64xf32> to vector<64x1xf32>
    %161 = tpu.reciprocal %160 {approx = true} : vector<64x1xf32> -> vector<64x1xf32>
    %162 = vector.broadcast %161 : vector<64x1xf32> to vector<64x16xf32>
    %163 = arith.mulf %158, %162 : vector<64x16xf32>
    %164 = arith.truncf %163 : vector<64x16xf32> to vector<64x16xbf16>
    %cst_59 = arith.constant dense<0.000000e+00> : vector<64x32xf32>
    %165 = tpu.matmul %164, %151, %cst_59 {dimension_numbers = #tpu.dot_dimension_numbers<[1], [0], [0], [1], [0, 0, 1, 1], [], []>} : vector<64x16xbf16>, vector<16x32xbf16>, vector<64x32xf32> -> vector<64x32xf32>
    %166 = tpu.concatenate %150, %165 in 0 : vector<64x32xf32>, vector<64x32xf32> -> vector<128x32xf32>
    %167 = arith.truncf %166 : vector<128x32xf32> to vector<128x32xbf16>
    %cst_60 = arith.constant dense<0.000000e+00> : vector<128x32xf32>
    %168 = tpu.matmul %167, %95, %cst_60 {dimension_numbers = #tpu.dot_dimension_numbers<[1], [0], [0], [1], [0, 0, 1, 1], [], []>} : vector<128x32xbf16>, vector<32x32xbf16>, vector<128x32xf32> -> vector<128x32xf32>
    %169 = tpu.concatenate %132, %168 in 0 : vector<32x32xf32>, vector<128x32xf32> -> vector<160x32xf32>
    %170 = arith.addf %87, %169 : vector<160x32xf32>
    %c0_61 = arith.constant 0 : index
    %c0_62 = arith.constant 0 : index
    %c0_63 = arith.constant 0 : index
    %171 = vector.load %arg4[%c0_61, %c0_62, %c0_63] : memref<4x32x32xbf16, #tpu.memory_space<vmem>>, vector<1x32x32xbf16>
    %172 = vector.shape_cast %171 : vector<1x32x32xbf16> to vector<32x32xbf16>
    %c1_64 = arith.constant 1 : index
    %c0_65 = arith.constant 0 : index
    %c0_66 = arith.constant 0 : index
    %173 = vector.load %arg4[%c1_64, %c0_65, %c0_66] : memref<4x32x32xbf16, #tpu.memory_space<vmem>>, vector<1x32x32xbf16>
    %174 = vector.shape_cast %173 : vector<1x32x32xbf16> to vector<32x32xbf16>
    %175 = arith.truncf %170 : vector<160x32xf32> to vector<160x32xbf16>
    %cst_67 = arith.constant dense<0.000000e+00> : vector<160x32xf32>
    %176 = tpu.matmul %175, %172, %cst_67 {dimension_numbers = #tpu.dot_dimension_numbers<[1], [0], [0], [1], [0, 0, 1, 1], [], []>} : vector<160x32xbf16>, vector<32x32xbf16>, vector<160x32xf32> -> vector<160x32xf32>
    %177 = arith.truncf %176 : vector<160x32xf32> to vector<160x32xbf16>
    %178 = vector.extract_strided_slice %175 {offsets = [0, 0], sizes = [16, 32], strides = [1, 1]} : vector<160x32xbf16> to vector<16x32xbf16>
    %179 = vector.extract_strided_slice %177 {offsets = [0, 0], sizes = [16, 32], strides = [1, 1]} : vector<160x32xbf16> to vector<16x32xbf16>
    %cst_68 = arith.constant dense<0.000000e+00> : vector<16x16xf32>
    %180 = tpu.matmul %179, %178, %cst_68 {dimension_numbers = #tpu.dot_dimension_numbers<[1], [1], [0], [0], [0, 0, 1, 0], [], []>} : vector<16x32xbf16>, vector<16x32xbf16>, vector<16x16xf32> -> vector<16x16xf32>
    %cst_69 = arith.constant dense<0xFF800000> : vector<16xf32>
    %181 = vector.multi_reduction <maximumf>, %180, %cst_69 [1] : vector<16x16xf32> to vector<16xf32>
    %182 = vector.shape_cast %181 : vector<16xf32> to vector<16x1xf32>
    %183 = vector.broadcast %182 : vector<16x1xf32> to vector<16x16xf32>
    %184 = arith.subf %180, %183 : vector<16x16xf32>
    %185 = math.exp %184 : vector<16x16xf32>
    %cst_70 = arith.constant dense<0.000000e+00> : vector<16xf32>
    %186 = vector.multi_reduction <add>, %185, %cst_70 [1] : vector<16x16xf32> to vector<16xf32>
    %187 = vector.shape_cast %186 : vector<16xf32> to vector<16x1xf32>
    %188 = tpu.reciprocal %187 {approx = true} : vector<16x1xf32> -> vector<16x1xf32>
    %189 = vector.broadcast %188 : vector<16x1xf32> to vector<16x16xf32>
    %190 = arith.mulf %185, %189 : vector<16x16xf32>
    %191 = arith.truncf %190 : vector<16x16xf32> to vector<16x16xbf16>
    %cst_71 = arith.constant dense<0.000000e+00> : vector<16x32xf32>
    %192 = tpu.matmul %191, %178, %cst_71 {dimension_numbers = #tpu.dot_dimension_numbers<[1], [0], [0], [1], [0, 0, 1, 1], [], []>} : vector<16x16xbf16>, vector<16x32xbf16>, vector<16x32xf32> -> vector<16x32xf32>
    %193 = vector.extract_strided_slice %175 {offsets = [16, 0], sizes = [16, 32], strides = [1, 1]} : vector<160x32xbf16> to vector<16x32xbf16>
    %194 = vector.extract_strided_slice %177 {offsets = [16, 0], sizes = [16, 32], strides = [1, 1]} : vector<160x32xbf16> to vector<16x32xbf16>
    %cst_72 = arith.constant dense<0.000000e+00> : vector<16x16xf32>
    %195 = tpu.matmul %194, %193, %cst_72 {dimension_numbers = #tpu.dot_dimension_numbers<[1], [1], [0], [0], [0, 0, 1, 0], [], []>} : vector<16x32xbf16>, vector<16x32xbf16>, vector<16x16xf32> -> vector<16x16xf32>
    %cst_73 = arith.constant dense<0xFF800000> : vector<16xf32>
    %196 = vector.multi_reduction <maximumf>, %195, %cst_73 [1] : vector<16x16xf32> to vector<16xf32>
    %197 = vector.shape_cast %196 : vector<16xf32> to vector<16x1xf32>
    %198 = vector.broadcast %197 : vector<16x1xf32> to vector<16x16xf32>
    %199 = arith.subf %195, %198 : vector<16x16xf32>
    %200 = math.exp %199 : vector<16x16xf32>
    %cst_74 = arith.constant dense<0.000000e+00> : vector<16xf32>
    %201 = vector.multi_reduction <add>, %200, %cst_74 [1] : vector<16x16xf32> to vector<16xf32>
    %202 = vector.shape_cast %201 : vector<16xf32> to vector<16x1xf32>
    %203 = tpu.reciprocal %202 {approx = true} : vector<16x1xf32> -> vector<16x1xf32>
    %204 = vector.broadcast %203 : vector<16x1xf32> to vector<16x16xf32>
    %205 = arith.mulf %200, %204 : vector<16x16xf32>
    %206 = arith.truncf %205 : vector<16x16xf32> to vector<16x16xbf16>
    %cst_75 = arith.constant dense<0.000000e+00> : vector<16x32xf32>
    %207 = tpu.matmul %206, %193, %cst_75 {dimension_numbers = #tpu.dot_dimension_numbers<[1], [0], [0], [1], [0, 0, 1, 1], [], []>} : vector<16x16xbf16>, vector<16x32xbf16>, vector<16x32xf32> -> vector<16x32xf32>
    %208 = vector.extract_strided_slice %175 {offsets = [32, 0], sizes = [64, 32], strides = [1, 1]} : vector<160x32xbf16> to vector<64x32xbf16>
    %209 = vector.extract_strided_slice %177 {offsets = [32, 0], sizes = [64, 32], strides = [1, 1]} : vector<160x32xbf16> to vector<64x32xbf16>
    %cst_76 = arith.constant dense<0.000000e+00> : vector<64x64xf32>
    %210 = tpu.matmul %209, %208, %cst_76 {dimension_numbers = #tpu.dot_dimension_numbers<[1], [1], [0], [0], [0, 0, 1, 0], [], []>} : vector<64x32xbf16>, vector<64x32xbf16>, vector<64x64xf32> -> vector<64x64xf32>
    %cst_77 = arith.constant dense<0xFF800000> : vector<64xf32>
    %211 = vector.multi_reduction <maximumf>, %210, %cst_77 [1] : vector<64x64xf32> to vector<64xf32>
    %212 = vector.shape_cast %211 : vector<64xf32> to vector<64x1xf32>
    %213 = vector.broadcast %212 : vector<64x1xf32> to vector<64x64xf32>
    %214 = arith.subf %210, %213 : vector<64x64xf32>
    %215 = math.exp %214 : vector<64x64xf32>
    %cst_78 = arith.constant dense<0.000000e+00> : vector<64xf32>
    %216 = vector.multi_reduction <add>, %215, %cst_78 [1] : vector<64x64xf32> to vector<64xf32>
    %217 = vector.shape_cast %216 : vector<64xf32> to vector<64x1xf32>
    %218 = tpu.reciprocal %217 {approx = true} : vector<64x1xf32> -> vector<64x1xf32>
    %219 = vector.broadcast %218 : vector<64x1xf32> to vector<64x64xf32>
    %220 = arith.mulf %215, %219 : vector<64x64xf32>
    %221 = arith.truncf %220 : vector<64x64xf32> to vector<64x64xbf16>
    %cst_79 = arith.constant dense<0.000000e+00> : vector<64x32xf32>
    %222 = tpu.matmul %221, %208, %cst_79 {dimension_numbers = #tpu.dot_dimension_numbers<[1], [0], [0], [1], [0, 0, 1, 1], [], []>} : vector<64x64xbf16>, vector<64x32xbf16>, vector<64x32xf32> -> vector<64x32xf32>
    %223 = vector.extract_strided_slice %175 {offsets = [96, 0], sizes = [64, 32], strides = [1, 1]} : vector<160x32xbf16> to vector<64x32xbf16>
    %224 = vector.extract_strided_slice %177 {offsets = [96, 0], sizes = [64, 32], strides = [1, 1]} : vector<160x32xbf16> to vector<64x32xbf16>
    %cst_80 = arith.constant dense<0.000000e+00> : vector<64x64xf32>
    %225 = tpu.matmul %224, %223, %cst_80 {dimension_numbers = #tpu.dot_dimension_numbers<[1], [1], [0], [0], [0, 0, 1, 0], [], []>} : vector<64x32xbf16>, vector<64x32xbf16>, vector<64x64xf32> -> vector<64x64xf32>
    %cst_81 = arith.constant dense<0xFF800000> : vector<64xf32>
    %226 = vector.multi_reduction <maximumf>, %225, %cst_81 [1] : vector<64x64xf32> to vector<64xf32>
    %227 = vector.shape_cast %226 : vector<64xf32> to vector<64x1xf32>
    %228 = vector.broadcast %227 : vector<64x1xf32> to vector<64x64xf32>
    %229 = arith.subf %225, %228 : vector<64x64xf32>
    %230 = math.exp %229 : vector<64x64xf32>
    %cst_82 = arith.constant dense<0.000000e+00> : vector<64xf32>
    %231 = vector.multi_reduction <add>, %230, %cst_82 [1] : vector<64x64xf32> to vector<64xf32>
    %232 = vector.shape_cast %231 : vector<64xf32> to vector<64x1xf32>
    %233 = tpu.reciprocal %232 {approx = true} : vector<64x1xf32> -> vector<64x1xf32>
    %234 = vector.broadcast %233 : vector<64x1xf32> to vector<64x64xf32>
    %235 = arith.mulf %230, %234 : vector<64x64xf32>
    %236 = arith.truncf %235 : vector<64x64xf32> to vector<64x64xbf16>
    %cst_83 = arith.constant dense<0.000000e+00> : vector<64x32xf32>
    %237 = tpu.matmul %236, %223, %cst_83 {dimension_numbers = #tpu.dot_dimension_numbers<[1], [0], [0], [1], [0, 0, 1, 1], [], []>} : vector<64x64xbf16>, vector<64x32xbf16>, vector<64x32xf32> -> vector<64x32xf32>
    %238 = tpu.concatenate %192, %207, %222, %237 in 0 : vector<16x32xf32>, vector<16x32xf32>, vector<64x32xf32>, vector<64x32xf32> -> vector<160x32xf32>
    %239 = arith.truncf %238 : vector<160x32xf32> to vector<160x32xbf16>
    %cst_84 = arith.constant dense<0.000000e+00> : vector<160x32xf32>
    %240 = tpu.matmul %239, %174, %cst_84 {dimension_numbers = #tpu.dot_dimension_numbers<[1], [0], [0], [1], [0, 0, 1, 1], [], []>} : vector<160x32xbf16>, vector<32x32xbf16>, vector<160x32xf32> -> vector<160x32xf32>
    %241 = arith.addf %170, %240 : vector<160x32xf32>
    %c2_85 = arith.constant 2 : index
    %c0_86 = arith.constant 0 : index
    %c0_87 = arith.constant 0 : index
    %242 = vector.load %arg4[%c2_85, %c0_86, %c0_87] : memref<4x32x32xbf16, #tpu.memory_space<vmem>>, vector<1x32x32xbf16>
    %243 = vector.shape_cast %242 : vector<1x32x32xbf16> to vector<32x32xbf16>
    %c3_88 = arith.constant 3 : index
    %c0_89 = arith.constant 0 : index
    %c0_90 = arith.constant 0 : index
    %244 = vector.load %arg4[%c3_88, %c0_89, %c0_90] : memref<4x32x32xbf16, #tpu.memory_space<vmem>>, vector<1x32x32xbf16>
    %245 = vector.shape_cast %244 : vector<1x32x32xbf16> to vector<32x32xbf16>
    %246 = arith.truncf %241 : vector<160x32xf32> to vector<160x32xbf16>
    %cst_91 = arith.constant dense<0.000000e+00> : vector<160x32xf32>
    %247 = tpu.matmul %246, %243, %cst_91 {dimension_numbers = #tpu.dot_dimension_numbers<[1], [0], [0], [1], [0, 0, 1, 1], [], []>} : vector<160x32xbf16>, vector<32x32xbf16>, vector<160x32xf32> -> vector<160x32xf32>
    %248 = arith.truncf %247 : vector<160x32xf32> to vector<160x32xbf16>
    %249 = vector.extract_strided_slice %246 {offsets = [0, 0], sizes = [16, 32], strides = [1, 1]} : vector<160x32xbf16> to vector<16x32xbf16>
    %250 = vector.extract_strided_slice %248 {offsets = [0, 0], sizes = [16, 32], strides = [1, 1]} : vector<160x32xbf16> to vector<16x32xbf16>
    %cst_92 = arith.constant dense<0.000000e+00> : vector<16x16xf32>
    %251 = tpu.matmul %250, %249, %cst_92 {dimension_numbers = #tpu.dot_dimension_numbers<[1], [1], [0], [0], [0, 0, 1, 0], [], []>} : vector<16x32xbf16>, vector<16x32xbf16>, vector<16x16xf32> -> vector<16x16xf32>
    %cst_93 = arith.constant dense<0xFF800000> : vector<16xf32>
    %252 = vector.multi_reduction <maximumf>, %251, %cst_93 [1] : vector<16x16xf32> to vector<16xf32>
    %253 = vector.shape_cast %252 : vector<16xf32> to vector<16x1xf32>
    %254 = vector.broadcast %253 : vector<16x1xf32> to vector<16x16xf32>
    %255 = arith.subf %251, %254 : vector<16x16xf32>
    %256 = math.exp %255 : vector<16x16xf32>
    %cst_94 = arith.constant dense<0.000000e+00> : vector<16xf32>
    %257 = vector.multi_reduction <add>, %256, %cst_94 [1] : vector<16x16xf32> to vector<16xf32>
    %258 = vector.shape_cast %257 : vector<16xf32> to vector<16x1xf32>
    %259 = tpu.reciprocal %258 {approx = true} : vector<16x1xf32> -> vector<16x1xf32>
    %260 = vector.broadcast %259 : vector<16x1xf32> to vector<16x16xf32>
    %261 = arith.mulf %256, %260 : vector<16x16xf32>
    %262 = arith.truncf %261 : vector<16x16xf32> to vector<16x16xbf16>
    %cst_95 = arith.constant dense<0.000000e+00> : vector<16x32xf32>
    %263 = tpu.matmul %262, %249, %cst_95 {dimension_numbers = #tpu.dot_dimension_numbers<[1], [0], [0], [1], [0, 0, 1, 1], [], []>} : vector<16x16xbf16>, vector<16x32xbf16>, vector<16x32xf32> -> vector<16x32xf32>
    %264 = vector.extract_strided_slice %246 {offsets = [16, 0], sizes = [16, 32], strides = [1, 1]} : vector<160x32xbf16> to vector<16x32xbf16>
    %265 = vector.extract_strided_slice %248 {offsets = [16, 0], sizes = [16, 32], strides = [1, 1]} : vector<160x32xbf16> to vector<16x32xbf16>
    %cst_96 = arith.constant dense<0.000000e+00> : vector<16x16xf32>
    %266 = tpu.matmul %265, %264, %cst_96 {dimension_numbers = #tpu.dot_dimension_numbers<[1], [1], [0], [0], [0, 0, 1, 0], [], []>} : vector<16x32xbf16>, vector<16x32xbf16>, vector<16x16xf32> -> vector<16x16xf32>
    %cst_97 = arith.constant dense<0xFF800000> : vector<16xf32>
    %267 = vector.multi_reduction <maximumf>, %266, %cst_97 [1] : vector<16x16xf32> to vector<16xf32>
    %268 = vector.shape_cast %267 : vector<16xf32> to vector<16x1xf32>
    %269 = vector.broadcast %268 : vector<16x1xf32> to vector<16x16xf32>
    %270 = arith.subf %266, %269 : vector<16x16xf32>
    %271 = math.exp %270 : vector<16x16xf32>
    %cst_98 = arith.constant dense<0.000000e+00> : vector<16xf32>
    %272 = vector.multi_reduction <add>, %271, %cst_98 [1] : vector<16x16xf32> to vector<16xf32>
    %273 = vector.shape_cast %272 : vector<16xf32> to vector<16x1xf32>
    %274 = tpu.reciprocal %273 {approx = true} : vector<16x1xf32> -> vector<16x1xf32>
    %275 = vector.broadcast %274 : vector<16x1xf32> to vector<16x16xf32>
    %276 = arith.mulf %271, %275 : vector<16x16xf32>
    %277 = arith.truncf %276 : vector<16x16xf32> to vector<16x16xbf16>
    %cst_99 = arith.constant dense<0.000000e+00> : vector<16x32xf32>
    %278 = tpu.matmul %277, %264, %cst_99 {dimension_numbers = #tpu.dot_dimension_numbers<[1], [0], [0], [1], [0, 0, 1, 1], [], []>} : vector<16x16xbf16>, vector<16x32xbf16>, vector<16x32xf32> -> vector<16x32xf32>
    %279 = vector.extract_strided_slice %246 {offsets = [32, 0], sizes = [64, 32], strides = [1, 1]} : vector<160x32xbf16> to vector<64x32xbf16>
    %280 = vector.extract_strided_slice %248 {offsets = [32, 0], sizes = [64, 32], strides = [1, 1]} : vector<160x32xbf16> to vector<64x32xbf16>
    %cst_100 = arith.constant dense<0.000000e+00> : vector<64x64xf32>
    %281 = tpu.matmul %280, %279, %cst_100 {dimension_numbers = #tpu.dot_dimension_numbers<[1], [1], [0], [0], [0, 0, 1, 0], [], []>} : vector<64x32xbf16>, vector<64x32xbf16>, vector<64x64xf32> -> vector<64x64xf32>
    %cst_101 = arith.constant dense<0xFF800000> : vector<64xf32>
    %282 = vector.multi_reduction <maximumf>, %281, %cst_101 [1] : vector<64x64xf32> to vector<64xf32>
    %283 = vector.shape_cast %282 : vector<64xf32> to vector<64x1xf32>
    %284 = vector.broadcast %283 : vector<64x1xf32> to vector<64x64xf32>
    %285 = arith.subf %281, %284 : vector<64x64xf32>
    %286 = math.exp %285 : vector<64x64xf32>
    %cst_102 = arith.constant dense<0.000000e+00> : vector<64xf32>
    %287 = vector.multi_reduction <add>, %286, %cst_102 [1] : vector<64x64xf32> to vector<64xf32>
    %288 = vector.shape_cast %287 : vector<64xf32> to vector<64x1xf32>
    %289 = tpu.reciprocal %288 {approx = true} : vector<64x1xf32> -> vector<64x1xf32>
    %290 = vector.broadcast %289 : vector<64x1xf32> to vector<64x64xf32>
    %291 = arith.mulf %286, %290 : vector<64x64xf32>
    %292 = arith.truncf %291 : vector<64x64xf32> to vector<64x64xbf16>
    %cst_103 = arith.constant dense<0.000000e+00> : vector<64x32xf32>
    %293 = tpu.matmul %292, %279, %cst_103 {dimension_numbers = #tpu.dot_dimension_numbers<[1], [0], [0], [1], [0, 0, 1, 1], [], []>} : vector<64x64xbf16>, vector<64x32xbf16>, vector<64x32xf32> -> vector<64x32xf32>
    %294 = vector.extract_strided_slice %246 {offsets = [96, 0], sizes = [64, 32], strides = [1, 1]} : vector<160x32xbf16> to vector<64x32xbf16>
    %295 = vector.extract_strided_slice %248 {offsets = [96, 0], sizes = [64, 32], strides = [1, 1]} : vector<160x32xbf16> to vector<64x32xbf16>
    %cst_104 = arith.constant dense<0.000000e+00> : vector<64x64xf32>
    %296 = tpu.matmul %295, %294, %cst_104 {dimension_numbers = #tpu.dot_dimension_numbers<[1], [1], [0], [0], [0, 0, 1, 0], [], []>} : vector<64x32xbf16>, vector<64x32xbf16>, vector<64x64xf32> -> vector<64x64xf32>
    %cst_105 = arith.constant dense<0xFF800000> : vector<64xf32>
    %297 = vector.multi_reduction <maximumf>, %296, %cst_105 [1] : vector<64x64xf32> to vector<64xf32>
    %298 = vector.shape_cast %297 : vector<64xf32> to vector<64x1xf32>
    %299 = vector.broadcast %298 : vector<64x1xf32> to vector<64x64xf32>
    %300 = arith.subf %296, %299 : vector<64x64xf32>
    %301 = math.exp %300 : vector<64x64xf32>
    %cst_106 = arith.constant dense<0.000000e+00> : vector<64xf32>
    %302 = vector.multi_reduction <add>, %301, %cst_106 [1] : vector<64x64xf32> to vector<64xf32>
    %303 = vector.shape_cast %302 : vector<64xf32> to vector<64x1xf32>
    %304 = tpu.reciprocal %303 {approx = true} : vector<64x1xf32> -> vector<64x1xf32>
    %305 = vector.broadcast %304 : vector<64x1xf32> to vector<64x64xf32>
    %306 = arith.mulf %301, %305 : vector<64x64xf32>
    %307 = arith.truncf %306 : vector<64x64xf32> to vector<64x64xbf16>
    %cst_107 = arith.constant dense<0.000000e+00> : vector<64x32xf32>
    %308 = tpu.matmul %307, %294, %cst_107 {dimension_numbers = #tpu.dot_dimension_numbers<[1], [0], [0], [1], [0, 0, 1, 1], [], []>} : vector<64x64xbf16>, vector<64x32xbf16>, vector<64x32xf32> -> vector<64x32xf32>
    %309 = tpu.concatenate %263, %278, %293, %308 in 0 : vector<16x32xf32>, vector<16x32xf32>, vector<64x32xf32>, vector<64x32xf32> -> vector<160x32xf32>
    %310 = arith.truncf %309 : vector<160x32xf32> to vector<160x32xbf16>
    %cst_108 = arith.constant dense<0.000000e+00> : vector<160x32xf32>
    %311 = tpu.matmul %310, %245, %cst_108 {dimension_numbers = #tpu.dot_dimension_numbers<[1], [0], [0], [1], [0, 0, 1, 1], [], []>} : vector<160x32xbf16>, vector<32x32xbf16>, vector<160x32xf32> -> vector<160x32xf32>
    %312 = arith.addf %241, %311 : vector<160x32xf32>
    %313 = vector.extract_strided_slice %312 {offsets = [0, 0], sizes = [32, 32], strides = [1, 1]} : vector<160x32xf32> to vector<32x32xf32>
    %314 = vector.shape_cast %313 : vector<32x32xf32> to vector<2x16x32xf32>
    %c0_109 = arith.constant 0 : index
    %c0_110 = arith.constant 0 : index
    %c0_111 = arith.constant 0 : index
    %315 = vector.load %arg5[%c0_109, %c0_110, %c0_111] : memref<2x16x32xf32, #tpu.memory_space<vmem>>, vector<2x16x32xf32>
    tpu.vector_store %arg5[%c0_109, %c0_110, %c0_111], %314 {strides = array<i32>} : memref<2x16x32xf32, #tpu.memory_space<vmem>>, vector<2x16x32xf32>,
    %316 = vector.extract_strided_slice %312 {offsets = [32, 0], sizes = [128, 32], strides = [1, 1]} : vector<160x32xf32> to vector<128x32xf32>
    %317 = vector.shape_cast %316 : vector<128x32xf32> to vector<2x64x32xf32>
    %c0_112 = arith.constant 0 : index
    %c0_113 = arith.constant 0 : index
    %c0_114 = arith.constant 0 : index
    %318 = vector.load %arg6[%c0_112, %c0_113, %c0_114] : memref<2x64x32xf32, #tpu.memory_space<vmem>>, vector<2x64x32xf32>
    tpu.vector_store %arg6[%c0_112, %c0_113, %c0_114], %317 {strides = array<i32>} : memref<2x64x32xf32, #tpu.memory_space<vmem>>, vector<2x64x32xf32>,
    return
  }
  func.func @transform_0(%arg0: i32) -> (i32, i32, i32) {
    %c0_i32 = arith.constant 0 : i32
    %c0_i32_0 = arith.constant 0 : i32
    %c0_i32_1 = arith.constant 0 : i32
    %c0_i32_2 = arith.constant 0 : i32
    return %c0_i32, %c0_i32_0, %c0_i32_1 : i32, i32, i32
  }
  func.func @transform_1(%arg0: i32) -> (i32, i32, i32) {
    %c0_i32 = arith.constant 0 : i32
    %c0_i32_0 = arith.constant 0 : i32
    %c0_i32_1 = arith.constant 0 : i32
    %c0_i32_2 = arith.constant 0 : i32
    return %c0_i32, %c0_i32_0, %c0_i32_1 : i32, i32, i32
  }
  func.func @transform_2(%arg0: i32) -> (i32, i32, i32) {
    %c0_i32 = arith.constant 0 : i32
    %c0_i32_0 = arith.constant 0 : i32
    %c0_i32_1 = arith.constant 0 : i32
    %c0_i32_2 = arith.constant 0 : i32
    return %c0_i32, %c0_i32_0, %c0_i32_1 : i32, i32, i32
  }
  func.func @transform_3(%arg0: i32) -> (i32, i32, i32) {
    %c0_i32 = arith.constant 0 : i32
    %c0_i32_0 = arith.constant 0 : i32
    %c0_i32_1 = arith.constant 0 : i32
    %c0_i32_2 = arith.constant 0 : i32
    return %c0_i32, %c0_i32_0, %c0_i32_1 : i32, i32, i32
  }
  func.func @transform_4(%arg0: i32) -> (i32, i32, i32) {
    %c0_i32 = arith.constant 0 : i32
    %c0_i32_0 = arith.constant 0 : i32
    %c0_i32_1 = arith.constant 0 : i32
    %c0_i32_2 = arith.constant 0 : i32
    return %c0_i32, %c0_i32_0, %c0_i32_1 : i32, i32, i32
  }
  func.func @transform_5(%arg0: i32) -> (i32, i32, i32) {
    %c0_i32 = arith.constant 0 : i32
    %c0_i32_0 = arith.constant 0 : i32
    %c0_i32_1 = arith.constant 0 : i32
    %c0_i32_2 = arith.constant 0 : i32
    return %c0_i32, %c0_i32_0, %c0_i32_1 : i32, i32, i32
  }
}

</mosaic_0001>

<bundles_post_ra>
// kernel: tpu_custom_call.1
= control target key start
LH: loop header
LB: loop body
LE: loop exit
PB: predicated region body
PF: predicated region fallthrough
CT: control target
= control target key end

     0   :  { %11 = vsyncpa [#allocation3], 0  ;;  %s5930_s0 = inlined_call_operand.hbm [shape: f32[2,16,32], index: 0, kind: input, shape index: {}]   ;;  %s5931_s1 = inlined_call_operand.vmem [shape: f32[2,64,32], index: 1, kind: input, shape index: {}]   ;;  %s5932_s2 = inlined_call_operand.vmem [shape: bf16[8,32,32], index: 2, kind: input, shape index: {}]   ;;  %s5933_s3 = inlined_call_operand.vmem [shape: bf16[4,32,32], index: 3, kind: input, shape index: {}]   ;;  %s5934_s4 = inlined_call_operand.hbm [shape: f32[2,16,32], index: 4, kind: output, shape index: {0}]   ;;  %s5935_s5 = inlined_call_operand.vmem [shape: f32[2,64,32], index: 5, kind: output, shape index: {1}]  }
   0x1   :  { %12 = vsyncpa [#allocation4], 0  ;;  %s17_s20 = sshll.u32 %s5930_s0, 4  ;;  %s4334_s21 = smov [#allocation2]   ;;  %s18_s20 = int_to_ptr.hbm [resolvable:$true] %s17_s20 }
   0x2   :  { %s19_s22 = sshll.u32 %s4334_s21, 4  ;;  %s4335_s23 = smov 128   ;;  %s20_s22 = int_to_ptr.vmem [resolvable:$true] %s19_s22 }
   0x3   :  { %s4336_s24 = smov 8  }
   0x4   :  { %25 = dma.hbm_to_vmem [thread:$0]  %s18_s20, 512, %s20_s22, [#allocation3], %s4335_s23, %s4335_s23, %s4336_s24  }
   0x5   :  { %4330 = dma.done.wait [#allocation3], 512  }
   0x6   :  { %4331 = vsyncadd [#allocation3], 4294966784  ;;  %v3918_v0 = vld [vmem:[%s5932_s2 + $0x8] sm:$0xff]  ;;  %v4377_v1 = vld [vmem:[#allocation2] sm:$0xff]  ;;  %vm118_vm0 = vcmask 261120   ;;  %vm202_vm1 = vcmask 523264  }
   0x7   :  { %v3917_v2 = vld [vmem:[%s5932_s2] sm:$0xff]  ;;  %v4382_v3 = vld [vmem:[#allocation2 + $0x8] sm:$0xff]  ;;  %v76_v4 = vpack.c.bf16 %v4377_v1, %v4377_v1  ;;  %131 = vmatpush.bf16.msra.mxu0 %v3918_v0  ;;  %v47_v6 = vld [vmem:[%s5931_s1 + $0x30] sm:$0xff]  ;;  %vm522_vm2 = vcmask 130048   ;;  %s4337_s0 = smov [#allocation5]   ;;  %s3604_s6 = sshll.u32 %s5934_s4, 4  ;;  %s3605_s6 = int_to_ptr.hbm [resolvable:$true] %s3604_s6 }
   0x8   :  { %v77_v5 = vpack.c.bf16 %v4382_v3, %v4382_v3  ;;  %v48_v7 = vld [vmem:[%s5931_s1 + $0x38] sm:$0xff]  ;;  %v45_v8 = vld [vmem:[%s5931_s1 + $0x20] sm:$0xff]  ;;  %v86_v10 = vpack.c.bf16 %v47_v6, %v47_v6  ;;  %v46_v12 = vld [vmem:[%s5931_s1 + $0x28] sm:$0xff]  ;;  %s3602_s28 = sshll.u32 %s4337_s0, 4  ;;  %s3603_s28 = int_to_ptr.vmem [resolvable:$true] %s3602_s28 }
   0x9   :  { %v100_v9 = vunpack.c.l.b16 %v76_v4  ;;  %v87_v11 = vpack.c.bf16 %v48_v7, %v48_v7  ;;  %v84_v13 = vpack.c.bf16 %v45_v8, %v45_v8  ;;  %v85_v15 = vpack.c.bf16 %v46_v12, %v46_v12  ;;  %v4408_v23 = vld [vmem:[#allocation2 + $0x10] sm:$0xff]  ;;  %v4410_v24 = vld [vmem:[#allocation2 + $0x18] sm:$0xff]  ;;  %v41_v48 = vld [vmem:[%s5931_s1] sm:$0xff] }
   0xa   :  { %v101_v14 = vunpack.c.l.b16 %v77_v5  ;;  %v167_v16 = vunpack.c.l.b16 %v86_v10  ;;  %v78_v26 = vpack.c.bf16 %v4408_v23, %v4408_v23  ;;  %v79_v27 = vpack.c.bf16 %v4410_v24, %v4410_v24  ;;  %v43_v32 = vld [vmem:[%s5931_s1 + $0x10] sm:$0xff]  ;;  %v44_v33 = vld [vmem:[%s5931_s1 + $0x18] sm:$0xff]  ;;  %v42_v49 = vld [vmem:[%s5931_s1 + $0x8] sm:$0xff] }
   0xb   :  { %v168_v17 = vunpack.c.l.b16 %v87_v11  ;;  %132 = vmatpush.bf16.msra.mxu0 %v3917_v2  ;;  %v165_v20 = vunpack.c.l.b16 %v84_v13  ;;  %v166_v21 = vunpack.c.l.b16 %v85_v15  ;;  %v55_v34 = vld [vmem:[%s5931_s1 + $0x70] sm:$0xff]  ;;  %v82_v35 = vpack.c.bf16 %v43_v32, %v43_v32  ;;  %v56_v37 = vld [vmem:[%s5931_s1 + $0x78] sm:$0xff]  ;;  %v53_v50 = vld [vmem:[%s5931_s1 + $0x60] sm:$0xff] }
   0xc   :  { %v4400_v18 = vpack.c.b16 %v101_v14, %v100_v9  ;;  %v102_v29 = vunpack.c.l.b16 %v78_v26  ;;  %v103_v30 = vunpack.c.l.b16 %v79_v27  ;;  %v83_v36 = vpack.c.bf16 %v44_v33, %v44_v33  ;;  %v54_v53 = vld [vmem:[%s5931_s1 + $0x68] sm:$0xff]  ;;  %v51_v0 = vld [vmem:[%s5931_s1 + $0x50] sm:$0xff]  ;;  %v52_v2 = vld [vmem:[%s5931_s1 + $0x58] sm:$0xff] }
   0xd   :  { %v4402_v19 = vpack.c.b16 %v168_v17, %v167_v16  ;;  %v4413_v25 = vpack.c.b16 %v166_v21, %v165_v20  ;;  %v94_v38 = vpack.c.bf16 %v55_v34, %v55_v34  ;;  %v95_v39 = vpack.c.bf16 %v56_v37, %v56_v37  ;;  %v49_v10 = vld [vmem:[%s5931_s1 + $0x40] sm:$0xff]  ;;  %v50_v11 = vld [vmem:[%s5931_s1 + $0x48] sm:$0xff] }
   0xe   :  { %3641 = vmatmul.msk.bf16.vlgmr.msra.gmra.mxu0 %vm118_vm0, %v4400_v18  ;;  %v4422_v31 = vpack.c.b16 %v103_v30, %v102_v29  ;;  %v163_v40 = vunpack.c.l.b16 %v82_v35  ;;  %v164_v41 = vunpack.c.l.b16 %v83_v36  ;;  %v80_v51 = vpack.c.bf16 %v41_v48, %v41_v48  ;;  %v3922_v20 = vld [vmem:[%s5932_s2 + $0x28] sm:$0xff] }
   0xf   :  { %v186_v22 = vsel %vm118_vm0, %v4402_v19, 0  ;;  %237 = vmatpush.bf16.msrb.mxu0 %v4402_v19  ;;  %v183_v28 = vsel %vm118_vm0, %v4413_v25, 0  ;;  %v266_v42 = vunpack.c.l.b16 %v94_v38  ;;  %v267_v43 = vunpack.c.l.b16 %v95_v39 }
  0x10   :  { %192 = vmatpush.bf16.xpose.msra.mxu1 %v186_v22  ;;  %v4438_v44 = vpack.c.b16 %v164_v41, %v163_v40  ;;  %v81_v52 = vpack.c.bf16 %v42_v49, %v42_v49  ;;  %v92_v54 = vpack.c.bf16 %v53_v50, %v53_v50  ;;  %v93_v55 = vpack.c.bf16 %v54_v53, %v54_v53  ;;  %v3921_v22 = vld [vmem:[%s5932_s2 + $0x20] sm:$0xff] }
  0x11   :  { %v4440_v45 = vpack.c.b16 %v267_v43, %v266_v42  ;;  %v161_v56 = vunpack.c.l.b16 %v80_v51  ;;  %v90_v4 = vpack.c.bf16 %v51_v0, %v51_v0  ;;  %v91_v5 = vpack.c.bf16 %v52_v2, %v52_v2 }
  0x12   :  { %v180_v46 = vsel %vm118_vm0, %v4438_v44, 0  ;;  %v162_v57 = vunpack.c.l.b16 %v81_v52  ;;  %v264_v58 = vunpack.c.l.b16 %v92_v54  ;;  %v265_v59 = vunpack.c.l.b16 %v93_v55 }
  0x13   :  { %238 = vmatpush.bf16.msrb.mxu0 %v4413_v25  ;;  %v285_v47 = vsel %vm118_vm0, %v4440_v45, 0  ;;  %335 = vmatpush.bf16.msra.mxu2 %v4440_v45  ;;  %v262_v6 = vunpack.c.l.b16 %v90_v4  ;;  %v263_v7 = vunpack.c.l.b16 %v91_v5  ;;  %v88_v12 = vpack.c.bf16 %v49_v10, %v49_v10 }
  0x14   :  { %291 = vmatpush.bf16.xpose.msra.mxu3 %v285_v47  ;;  %v169_v60 = vpack.c.b16 %v162_v57, %v161_v56  ;;  %v270_v61 = vpack.c.b16 %v265_v59, %v264_v58  ;;  %v89_v13 = vpack.c.bf16 %v50_v11, %v50_v11  ;;  %v120_v41 = vsel %vm118_vm0, %v4400_v18, 0 }
  0x15   :  { %v269_v8 = vpack.c.b16 %v263_v7, %v262_v6  ;;  %v260_v14 = vunpack.c.l.b16 %v88_v12 }
  0x16   :  { %v177_v62 = vsel %vm118_vm0, %v169_v60, 0  ;;  %v282_v63 = vsel %vm118_vm0, %v270_v61, 0  ;;  %v261_v15 = vunpack.c.l.b16 %v89_v13 }
  0x17   :  { %239 = vmatpush.bf16.msrb.mxu0 %v4438_v44  ;;  %336 = vmatpush.bf16.msra.mxu2 %v270_v61  ;;  %v279_v9 = vsel %vm118_vm0, %v269_v8, 0 }
  0x18   :  { %193 = vmatpush.bf16.xpose.msra.mxu1 %v183_v28  ;;  %v268_v16 = vpack.c.b16 %v261_v15, %v260_v14 }
  0x1a   :  { %v276_v17 = vsel %vm118_vm0, %v268_v16, 0 }
  0x1b   :  { %240 = vmatpush.bf16.msrb.mxu0 %v169_v60  ;;  %337 = vmatpush.bf16.msra.mxu2 %v269_v8 }
  0x1c   :  { %292 = vmatpush.bf16.xpose.msra.mxu3 %v282_v63 }
  0x1e   :  { %3642 = vmatmul.msk.bf16.gmra.mxu0 %vm118_vm0, %v4422_v31 }
  0x1f   :  { %338 = vmatpush.bf16.msra.mxu2 %v268_v16 }
  0x20   :  { %194 = vmatpush.bf16.xpose.msra.mxu1 %v180_v46 }
  0x23   :  { %830 = vmatpush.bf16.msrb.mxu2 %v4422_v31 }
  0x24   :  { %293 = vmatpush.bf16.xpose.msra.mxu3 %v279_v9 }
  0x28   :  { %195 = vmatpush.bf16.xpose.msra.mxu1 %v177_v62 }
  0x2c   :  { %294 = vmatpush.bf16.xpose.msra.mxu3 %v276_v17 }
  0x30   :  { %402 = vmatpush.bf16.msrb.mxu1 %v3922_v20 }
  0x34   :  { %403 = vmatpush.bf16.msrb.mxu1 %v3921_v22  ;;  %3941 = vmatpush.bf16.xpose.msrb.mxu3 %v120_v41 }
  0x8b   :  { %v134_v21 = vpop.f32.mrf.mxu0 }
  0x8c   :  { %v144_v26 = vpack.c.bf16 %v134_v21, %v134_v21 }
  0x8e   :  { %v150_v29 = vunpack.c.l.b16 %v144_v26 }
  0x93   :  { %v136_v27 = vpop.f32.mrf.mxu0 }
  0x94   :  { %v145_v28 = vpack.c.bf16 %v136_v27, %v136_v27 }
  0x96   :  { %v151_v30 = vunpack.c.l.b16 %v145_v28 }
  0x98   :  { %v152_v32 = vpack.c.b16 %v151_v30, %v150_v29 }
  0x9a   :  { %3643 = vmatmul.msk.bf16.vlgmr.msra.gmra.mxu1 %vm118_vm0, %v152_v32 }
  0x9b   :  { %v139_v33 = vpop.f32.mrf.mxu0  ;;  %500 = vmatpush.bf16.xpose.msra.mxu1 %v120_v41 }
  0x9c   :  { %v146_v34 = vpack.c.bf16 %v139_v33, %v139_v33 }
  0x9e   :  { %v249_v37 = vunpack.c.l.b16 %v146_v34 }
  0xa3   :  { %v141_v35 = vpop.f32.mrf.mxu0 }
  0xa4   :  { %v147_v36 = vpack.c.bf16 %v141_v35, %v141_v35 }
  0xa6   :  { %v250_v38 = vunpack.c.l.b16 %v147_v36 }
  0xa8   :  { %v251_v39 = vpack.c.b16 %v250_v38, %v249_v37 }
  0xaa   :  { %3645 = vmatmul.msk.bf16.vlgmr.msra.gmra.mxu3 %vm118_vm0, %v251_v39  ;;  %3665 = vmatmul.msk.bf16.vlgmr.msrb.gmra.mxu1 %vm118_vm0, %v169_v60 }
  0xab   :  { %635 = vmatpush.bf16.msra.mxu3 %v4400_v18 }
  0xba   :  { %3666 = vmatmul.msk.bf16.gmra.mxu1 %vm118_vm0, %v4438_v44 }
  0xca   :  { %3667 = vmatmul.msk.bf16.gmra.mxu1 %vm118_vm0, %v4413_v25 }
  0xda   :  { %3668 = vmatmul.msk.bf16.gmra.mxu1 %vm118_vm0, %v4402_v19 }
  0xea   :  { %3669 = vmatmul.msk.bf16.gmra.mxu1 %vm118_vm0, %v268_v16 }
  0xfa   :  { %3670 = vmatmul.msk.bf16.gmra.mxu1 %vm118_vm0, %v269_v8 }
 0x10a   :  { %3671 = vmatmul.msk.bf16.gmra.mxu1 %vm118_vm0, %v270_v61 }
 0x117   :  { %v197_v40 = vpop.f32.mrf.mxu1 }
 0x118   :  { %v203_v42 = vsel %vm202_vm1, %v197_v40, -inf }
 0x119   :  { %204 = vmax.xlane.f32.xlu0 %v203_v42 }
 0x11a   :  { %3672 = vmatmul.msk.bf16.gmra.mxu1 %vm118_vm0, %v4440_v45 }
 0x11f   :  { %v199_v19 = vpop.f32.mrf.mxu1 }
 0x120   :  { %v206_v25 = vsel %vm202_vm1, %v199_v19, -inf }
 0x121   :  { %207 = vmax.xlane.f32.xlu0 %v206_v25 }
 0x127   :  { %v405_v43 = vpop.f32.mrf.mxu1 }
 0x128   :  { %v445_v44 = vpack.c.bf16 %v405_v43, %v405_v43 }
 0x12a   :  { %v469_v49 = vunpack.c.l.b16 %v445_v44 }
 0x12d   :  { %v296_v46 = vpop.f32.mrf.mxu3 }
 0x12e   :  { %v301_v47 = vsel %vm202_vm1, %v296_v46, -inf }
 0x12f   :  { %302 = vmax.xlane.f32.xlu1 %v301_v47  ;;  %v407_v48 = vpop.f32.mrf.mxu1 }
 0x130   :  { %v446_v50 = vpack.c.bf16 %v407_v48, %v407_v48 }
 0x132   :  { %v470_v51 = vunpack.c.l.b16 %v446_v50 }
 0x134   :  { %v477_v52 = vpack.c.b16 %v470_v51, %v469_v49 }
 0x135   :  { %v298_v53 = vpop.f32.mrf.mxu3 }
 0x136   :  { %v304_v18 = vsel %vm202_vm1, %v298_v53, -inf  ;;  %3673 = vmatmul.msk.bf16.vlgmr.msra.gmra.mxu1 %vm118_vm0, %v477_v52 }
 0x137   :  { %305 = vmax.xlane.f32.xlu1 %v304_v18  ;;  %v410_v45 = vpop.f32.mrf.mxu1 }
 0x138   :  { %v447_v54 = vpack.c.bf16 %v410_v45, %v410_v45 }
 0x13a   :  { %v471_v56 = vunpack.c.l.b16 %v447_v54 }
 0x13f   :  { %v412_v55 = vpop.f32.mrf.mxu1 }
 0x140   :  { %v448_v57 = vpack.c.bf16 %v412_v55, %v412_v55 }
 0x142   :  { %v472_v58 = vunpack.c.l.b16 %v448_v57 }
 0x144   :  { %v478_v59 = vpack.c.b16 %v472_v58, %v471_v56 }
 0x146   :  { %3674 = vmatmul.msk.bf16.vlgmr.msrb.gmra.mxu3 %vm118_vm0, %v478_v59 }
 0x147   :  { %v415_v60 = vpop.f32.mrf.mxu1 }
 0x148   :  { %v449_v6 = vpack.c.bf16 %v415_v60, %v415_v60 }
 0x14a   :  { %v473_v8 = vunpack.c.l.b16 %v449_v6 }
 0x14f   :  { %v417_v61 = vpop.f32.mrf.mxu1 }
 0x150   :  { %v450_v7 = vpack.c.bf16 %v417_v61, %v417_v61 }
 0x152   :  { %v474_v9 = vunpack.c.l.b16 %v450_v7 }
 0x154   :  { %v479_v13 = vpack.c.b16 %v474_v9, %v473_v8 }
 0x156   :  { %3675 = vmatmul.msk.bf16.gmra.mxu3 %vm118_vm0, %v479_v13 }
 0x157   :  { %v420_v62 = vpop.f32.mrf.mxu1 }
 0x158   :  { %v451_v15 = vpack.c.bf16 %v420_v62, %v420_v62 }
 0x15a   :  { %v475_v26 = vunpack.c.l.b16 %v451_v15 }
 0x15f   :  { %v422_v63 = vpop.f32.mrf.mxu1 }
 0x160   :  { %v452_v16 = vpack.c.bf16 %v422_v63, %v422_v63 }
 0x162   :  { %v476_v27 = vunpack.c.l.b16 %v452_v16 }
 0x164   :  { %v480_v30 = vpack.c.b16 %v476_v27, %v475_v26 }
 0x166   :  { %3676 = vmatmul.msk.bf16.gmra.mxu3 %vm118_vm0, %v480_v30 }
 0x167   :  { %v4506_v0 = vpop.f32.mrf.mxu1 }
 0x16f   :  { %v4508_v2 = vpop.f32.mrf.mxu1 }
 0x177   :  { %v4510_v4 = vpop.f32.mrf.mxu1 }
 0x17f   :  { %v4512_v5 = vpop.f32.mrf.mxu1 }
 0x187   :  { %v4514_v10 = vpop.f32.mrf.mxu1 }
 0x18c   :  { %v205_v11 = vpop.xlane.xlu0 %204 }
 0x18d   :  { %v209_v12 = vsub.f32 %v197_v40, %v205_v11 }
 0x18f   :  { %v211_v14 = vmul.f32 1.442695, %v209_v12  ;;  %v4517_v21 = vpop.f32.mrf.mxu1 }
 0x191   :  { %3946 = vpow2.f32 %v211_v14 }
 0x194   :  { %v208_v17 = vpop.xlane.xlu0 %207 }
 0x195   :  { %v210_v20 = vsub.f32 %v199_v19, %v208_v17 }
 0x197   :  { %v3947_v22 = vpop.eup %3946  ;;  %v213_v28 = vmul.f32 1.442695, %v210_v20  ;;  %v4520_v33 = vpop.f32.mrf.mxu1 }
 0x198   :  { %v215_v29 = vsel %vm202_vm1, %v3947_v22, 0.0 }
 0x199   :  { %3948 = vpow2.f32 %v213_v28  ;;  %216 = vadd.xlane.f32.xlu2 %v215_v29 }
 0x19f   :  { %v3949_v32 = vpop.eup %3948  ;;  %v4524_v38 = vpop.f32.mrf.mxu1 }
 0x1a0   :  { %v218_v34 = vsel %vm202_vm1, %v3949_v32, 0.0 }
 0x1a1   :  { %219 = vadd.xlane.f32.xlu2 %v218_v34 }
 0x1a2   :  { %v303_v35 = vpop.xlane.xlu1 %302 }
 0x1a3   :  { %v307_v36 = vsub.f32 %v296_v46, %v303_v35 }
 0x1a5   :  { %v309_v37 = vmul.f32 1.442695, %v307_v36 }
 0x1a7   :  { %3950 = vpow2.f32 %v309_v37 }
 0x1aa   :  { %v306_v39 = vpop.xlane.xlu1 %305 }
 0x1ab   :  { %v308_v40 = vsub.f32 %v298_v53, %v306_v39 }
 0x1ad   :  { %v3951_v41 = vpop.eup %3950  ;;  %v311_v42 = vmul.f32 1.442695, %v308_v40  ;;  %v3920_v40 = vld [vmem:[%s5932_s2 + $0x18] sm:$0xff] }
 0x1ae   :  { %v313_v19 = vsel %vm202_vm1, %v3951_v41, 0.0  ;;  %371 = vmatpush.bf16.msra.mxu0 %v3920_v40 }
 0x1af   :  { %3952 = vpow2.f32 %v311_v42  ;;  %314 = vadd.xlane.f32.xlu0 %v313_v19 }
 0x1b3   :  { %v502_v25 = vpop.f32.mrf.mxu1 }
 0x1b4   :  { %v523_v43 = vsel %vm522_vm2, %v502_v25, -inf }
 0x1b5   :  { %v3953_v44 = vpop.eup %3952  ;;  %524 = vmax.xlane.f32.xlu2 %v523_v43  ;;  %v123_v43 = vsel %vm118_vm0, %v4422_v31, 0 }
 0x1b6   :  { %v316_v46 = vsel %vm202_vm1, %v3953_v44, 0.0 }
 0x1b7   :  { %317 = vadd.xlane.f32.xlu1 %v316_v46 }
 0x1bb   :  { %v504_v47 = vpop.f32.mrf.mxu1 }
 0x1bc   :  { %v526_v48 = vsel %vm522_vm2, %v504_v47, -inf }
 0x1bd   :  { %527 = vmax.xlane.f32.xlu0 %v526_v48 }
 0x1c9   :  { %v507_v49 = vpop.f32.mrf.mxu3 }
 0x1ca   :  { %v529_v50 = vsel %vm522_vm2, %v507_v49, -inf }
 0x1cb   :  { %530 = vmax.xlane.f32.xlu1 %v529_v50 }
 0x1d1   :  { %v4531_v51 = vpop.f32.mrf.mxu3 }
 0x1d2   :  { %v532_v45 = vsel %vm522_vm2, %v4531_v51, -inf }
 0x1d3   :  { %533 = vmax.xlane.f32.xlu2 %v532_v45 }
 0x1d9   :  { %v4533_v53 = vpop.f32.mrf.mxu3 }
 0x1da   :  { %v535_v11 = vsel %vm522_vm2, %v4533_v53, -inf }
 0x1db   :  { %536 = vmax.xlane.f32.xlu0 %v535_v11 }
 0x1e1   :  { %v4537_v55 = vpop.f32.mrf.mxu3 }
 0x1e2   :  { %v538_v57 = vsel %vm522_vm2, %v4537_v55, -inf }
 0x1e3   :  { %539 = vmax.xlane.f32.xlu1 %v538_v57 }
 0x1e9   :  { %v4542_v61 = vpop.f32.mrf.mxu3 }
 0x1ea   :  { %v541_v62 = vsel %vm522_vm2, %v4542_v61, -inf }
 0x1eb   :  { %542 = vmax.xlane.f32.xlu2 %v541_v62 }
 0x1f1   :  { %v4548_v12 = vpop.f32.mrf.mxu3 }
 0x1f2   :  { %v544_v17 = vsel %vm522_vm2, %v4548_v12, -inf }
 0x1f3   :  { %545 = vmax.xlane.f32.xlu0 %v544_v17 }
 0x20c   :  { %v217_v52 = vpop.xlane.xlu2 %216 }
 0x20d   :  { %3954 = vrcp.f32 %v217_v52 }
 0x213   :  { %v3955_v54 = vpop.eup %3954 }
 0x214   :  { %v220_v18 = vpop.xlane.xlu2 %219  ;;  %v223_v58 = vmul.f32 %v3955_v54, %v3947_v22 }
 0x215   :  { %3956 = vrcp.f32 %v220_v18 }
 0x21b   :  { %v3957_v56 = vpop.eup %3956 }
 0x21c   :  { %v224_v59 = vmul.f32 %v3957_v56, %v3949_v32 }
 0x21e   :  { %v225_v60 = vpack.c.bf16 %v224_v59, %v223_v58  ;;  %v453_v58 = vpack.c.bf16 %v4506_v0, %v4506_v0  ;;  %v454_v59 = vpack.c.bf16 %v4508_v2, %v4508_v2  ;;  %v457_v0 = vpack.c.bf16 %v4514_v10, %v4514_v10  ;;  %v3926_v10 = vld [vmem:[%s5932_s2 + $0x48] sm:$0xff] }
 0x21f   :  { %v458_v2 = vpack.c.bf16 %v4517_v21, %v4517_v21  ;;  %v3925_v21 = vld [vmem:[%s5932_s2 + $0x40] sm:$0xff] }
 0x220   :  { %3644 = vmatmul.msk.bf16.vlgmr.msrb.gmra.mxu0 %vm202_vm1, %v225_v60  ;;  %v665_v60 = vunpack.c.l.b16 %v453_v58  ;;  %v666_v62 = vunpack.c.l.b16 %v454_v59 }
 0x222   :  { %v315_v63 = vpop.xlane.xlu0 %314 }
 0x223   :  { %3958 = vrcp.f32 %v315_v63  ;;  %v673_v63 = vpack.c.b16 %v666_v62, %v665_v60 }
 0x228   :  { %v525_v6 = vpop.xlane.xlu2 %524 }
 0x229   :  { %v547_v7 = vsub.f32 %v502_v25, %v525_v6  ;;  %v3959_v13 = vpop.eup %3958  ;;  %v455_v6 = vpack.c.bf16 %v4510_v4, %v4510_v4  ;;  %v459_v4 = vpack.c.bf16 %v4520_v33, %v4520_v33 }
 0x22a   :  { %v318_v8 = vpop.xlane.xlu1 %317  ;;  %v321_v20 = vmul.f32 %v3959_v13, %v3951_v41  ;;  %v3919_v41 = vld [vmem:[%s5932_s2 + $0x10] sm:$0xff]  ;;  %v669_v13 = vunpack.c.l.b16 %v457_v0 }
 0x22b   :  { %3960 = vrcp.f32 %v318_v8  ;;  %v555_v9 = vmul.f32 1.442695, %v547_v7  ;;  %372 = vmatpush.bf16.msra.mxu0 %v3919_v41  ;;  %v456_v7 = vpack.c.bf16 %v4512_v5, %v4512_v5  ;;  %v667_v8 = vunpack.c.l.b16 %v455_v6 }
 0x22c   :  { %v460_v5 = vpack.c.bf16 %v4524_v38, %v4524_v38  ;;  %v3924_v38 = vld [vmem:[%s5932_s2 + $0x38] sm:$0xff] }
 0x22d   :  { %3962 = vpow2.f32 %v555_v9  ;;  %v668_v9 = vunpack.c.l.b16 %v456_v7  ;;  %902 = vmatpush.bf16.msrb.mxu3 %v3924_v38 }
 0x22e   :  { %v672_v17 = vunpack.c.l.b16 %v460_v5 }
 0x22f   :  { %696 = vmatpush.bf16.xpose.msrb.mxu0 %v123_v43  ;;  %v674_v11 = vpack.c.b16 %v668_v9, %v667_v8 }
 0x230   :  { %v528_v14 = vpop.xlane.xlu0 %527 }
 0x231   :  { %v3961_v15 = vpop.eup %3960  ;;  %v548_v16 = vsub.f32 %v504_v47, %v528_v14  ;;  %v670_v14 = vunpack.c.l.b16 %v458_v2 }
 0x232   :  { %v322_v22 = vmul.f32 %v3961_v15, %v3953_v44 }
 0x233   :  { %v3963_v26 = vpop.eup %3962  ;;  %v557_v27 = vmul.f32 1.442695, %v548_v16  ;;  %v675_v15 = vpack.c.b16 %v670_v14, %v669_v13  ;;  %v671_v16 = vunpack.c.l.b16 %v459_v4 }
 0x234   :  { %v323_v28 = vpack.c.bf16 %v322_v22, %v321_v20  ;;  %v571_v29 = vsel %vm522_vm2, %v3963_v26, 0.0 }
 0x235   :  { %3964 = vpow2.f32 %v557_v27  ;;  %572 = vadd.xlane.f32.xlu1 %v571_v29  ;;  %v676_v20 = vpack.c.b16 %v672_v17, %v671_v16 }
 0x236   :  { %3646 = vmatmul.msk.bf16.vlgmr.msra.gmra.mxu2 %vm202_vm1, %v323_v28 }
 0x23b   :  { %v3965_v30 = vpop.eup %3964 }
 0x23c   :  { %v574_v32 = vsel %vm522_vm2, %v3965_v30, 0.0 }
 0x23d   :  { %575 = vadd.xlane.f32.xlu2 %v574_v32 }
 0x23e   :  { %v531_v34 = vpop.xlane.xlu1 %530 }
 0x23f   :  { %v549_v35 = vsub.f32 %v507_v49, %v531_v34 }
 0x241   :  { %v559_v36 = vmul.f32 1.442695, %v549_v35 }
 0x243   :  { %3966 = vpow2.f32 %v559_v36 }
 0x246   :  { %v4565_v42 = vpop.xlane.xlu2 %533 }
 0x247   :  { %v550_v36 = vsub.f32 %v4531_v51, %v4565_v42 }
 0x249   :  { %v4555_v37 = vpop.eup %3966  ;;  %v561_v43 = vmul.f32 1.442695, %v550_v36 }
 0x24a   :  { %v577_v39 = vsel %vm522_vm2, %v4555_v37, 0.0 }
 0x24b   :  { %578 = vadd.xlane.f32.xlu2 %v577_v39 }
 0x256   :  { %v4567_v25 = vpop.xlane.xlu1 %539 }
 0x25e   :  { %v4571_v47 = vpop.xlane.xlu2 %542 }
 0x29d   :  { %v242_v19 = vpop.f32.mrf.mxu0 }
 0x2a5   :  { %v244_v44 = vpop.f32.mrf.mxu0 }
 0x2a6   :  { %v345_v46 = vpack.c.bf16 %v244_v44, %v242_v19  ;;  %v537_v44 = vpop.xlane.xlu0 %536 }
 0x2a8   :  { %3655 = vmatmul.msk.bf16.vlgmr.msra.gmra.mxu0 %vm118_vm0, %v345_v46  ;;  %v573_v48 = vpop.xlane.xlu1 %572 }
 0x2a9   :  { %3968 = vrcp.f32 %v573_v48  ;;  %1039 = vmatpush.bf16.msra.mxu0 %v3926_v10 }
 0x2ad   :  { %1040 = vmatpush.bf16.msra.mxu0 %v3925_v21 }
 0x2ae   :  { %v546_v60 = vpop.xlane.xlu0 %545 }
 0x2af   :  { %v3969_v50 = vpop.eup %3968 }
 0x2b0   :  { %v576_v49 = vpop.xlane.xlu2 %575  ;;  %v603_v52 = vmul.f32 %v3969_v50, %v3963_v26 }
 0x2b1   :  { %3970 = vrcp.f32 %v576_v49 }
 0x2b2   :  { %3972 = vpow2.f32 %v561_v43 }
 0x2b7   :  { %v3971_v18 = vpop.eup %3970 }
 0x2b8   :  { %v604_v45 = vmul.f32 %v3971_v18, %v3965_v30  ;;  %v552_v18 = vsub.f32 %v4537_v55, %v4567_v25 }
 0x2b9   :  { %v340_v54 = vpop.f32.mrf.mxu2 }
 0x2ba   :  { %v611_v56 = vpack.c.bf16 %v604_v45, %v603_v52  ;;  %v4642_v52 = vpop.eup %3972 }
 0x2bc   :  { %3677 = vmatmul.msk.bf16.vlgmr.msra.gmra.mxu3 %vm522_vm2, %v611_v56  ;;  %v565_v56 = vmul.f32 1.442695, %v552_v18 }
 0x2be   :  { %v579_v21 = vpop.xlane.xlu2 %578 }
 0x2c1   :  { %v342_v31 = vpop.f32.mrf.mxu2 }
 0x2c2   :  { %v346_v57 = vpack.c.bf16 %v342_v31, %v340_v54  ;;  %v580_v54 = vsel %vm522_vm2, %v4642_v52, 0.0 }
 0x2c4   :  { %3656 = vmatmul.msk.bf16.gmra.mxu0 %vm118_vm0, %v346_v57  ;;  %v553_v57 = vsub.f32 %v4542_v61, %v4571_v47 }
 0x2c6   :  { %v567_v25 = vmul.f32 1.442695, %v553_v57 }
 0x2d4   :  { %3681 = vmatmul.msk.bf16.vlgmr.msrb.gmra.mxu0 %vm118_vm0, %v673_v63  ;;  %v554_v63 = vsub.f32 %v4548_v12, %v546_v60 }
 0x2d6   :  { %v569_v47 = vmul.f32 1.442695, %v554_v63 }
 0x2e4   :  { %3682 = vmatmul.msk.bf16.gmra.mxu0 %vm118_vm0, %v674_v11 }
 0x2f4   :  { %3683 = vmatmul.msk.bf16.gmra.mxu0 %vm118_vm0, %v675_v15 }
 0x304   :  { %3684 = vmatmul.msk.bf16.gmra.mxu0 %vm118_vm0, %v676_v20 }
 0x325   :  { %v374_v22 = vpop.f32.mrf.mxu0 }
 0x326   :  { %v4603_v33 = vadd.f32 %v374_v22, %v4377_v1  ;;  %v3923_v1 = vld [vmem:[%s5932_s2 + $0x30] sm:$0xff] }
 0x327   :  { %903 = vmatpush.bf16.msrb.mxu3 %v3923_v1 }
 0x328   :  { %v985_v27 = vpack.c.bf16 %v4603_v33, %v4603_v33 }
 0x32a   :  { %v1009_v30 = vunpack.c.l.b16 %v985_v27 }
 0x32d   :  { %v376_v26 = vpop.f32.mrf.mxu0 }
 0x32e   :  { %v4611_v28 = vadd.f32 %v376_v26, %v4382_v3 }
 0x330   :  { %v986_v29 = vpack.c.bf16 %v4611_v28, %v4611_v28 }
 0x332   :  { %v1010_v32 = vunpack.c.l.b16 %v986_v29 }
 0x334   :  { %v4618_v34 = vpack.c.b16 %v1010_v32, %v1009_v30 }
 0x336   :  { %3729 = vmatmul.msk.bf16.vlgmr.msra.gmra.mxu0 %vm118_vm0, %v4618_v34 }
 0x341   :  { %v379_v35 = vpop.f32.mrf.mxu0 }
 0x342   :  { %v4623_v3 = vadd.f32 %v379_v35, %v4408_v23  ;;  %v551_v23 = vsub.f32 %v4533_v53, %v537_v44 }
 0x344   :  { %v987_v40 = vpack.c.bf16 %v4623_v3, %v4623_v3  ;;  %v563_v50 = vmul.f32 1.442695, %v551_v23 }
 0x346   :  { %v1011_v46 = vunpack.c.l.b16 %v987_v40  ;;  %3974 = vpow2.f32 %v563_v50 }
 0x347   :  { %3976 = vpow2.f32 %v565_v56 }
 0x348   :  { %3978 = vpow2.f32 %v567_v25 }
 0x349   :  { %v381_v39 = vpop.f32.mrf.mxu0  ;;  %3980 = vpow2.f32 %v569_v47 }
 0x34a   :  { %v4630_v41 = vadd.f32 %v381_v39, %v4410_v24 }
 0x34c   :  { %v988_v19 = vpack.c.bf16 %v4630_v41, %v4630_v41  ;;  %v4649_v31 = vpop.eup %3974 }
 0x34d   :  { %v583_v55 = vsel %vm522_vm2, %v4649_v31, 0.0  ;;  %v4656_v62 = vpop.eup %3976 }
 0x34e   :  { %v1012_v48 = vunpack.c.l.b16 %v988_v19  ;;  %v586_v7 = vsel %vm522_vm2, %v4656_v62, 0.0  ;;  %v4662_v8 = vpop.eup %3978 }
 0x34f   :  { %v589_v11 = vsel %vm522_vm2, %v4662_v8, 0.0  ;;  %v4670_v0 = vpop.eup %3980 }
 0x350   :  { %v4634_v49 = vpack.c.b16 %v1012_v48, %v1011_v46  ;;  %v592_v14 = vsel %vm522_vm2, %v4670_v0, 0.0 }
 0x351   :  { %v698_v51 = vpop.f32.mrf.mxu0 }
 0x352   :  { %3730 = vmatmul.msk.bf16.gmra.mxu0 %vm118_vm0, %v4634_v49  ;;  %v718_v42 = vsel %vm522_vm2, %v698_v51, -inf  ;;  %v1031_v24 = vsel %vm118_vm0, %v4634_v49, 0 }
 0x353   :  { %719 = vmax.xlane.f32.xlu0 %v718_v42  ;;  %1602 = vmatpush.bf16.xpose.msra.mxu3 %v1031_v24 }
 0x359   :  { %v700_v45 = vpop.f32.mrf.mxu0 }
 0x35a   :  { %v721_v53 = vsel %vm522_vm2, %v700_v45, -inf }
 0x35b   :  { %722 = vmax.xlane.f32.xlu1 %v721_v53  ;;  %581 = vadd.xlane.f32.xlu0 %v580_v54 }
 0x361   :  { %v703_v58 = vpop.f32.mrf.mxu0 }
 0x362   :  { %v724_v59 = vsel %vm522_vm2, %v703_v58, -inf }
 0x363   :  { %725 = vmax.xlane.f32.xlu1 %v724_v59  ;;  %584 = vadd.xlane.f32.xlu0 %v583_v55 }
 0x369   :  { %v705_v6 = vpop.f32.mrf.mxu0 }
 0x36a   :  { %v727_v61 = vsel %vm522_vm2, %v705_v6, -inf }
 0x36b   :  { %587 = vadd.xlane.f32.xlu1 %v586_v7  ;;  %728 = vmax.xlane.f32.xlu2 %v727_v61 }
 0x371   :  { %v4664_v9 = vpop.f32.mrf.mxu0 }
 0x372   :  { %v730_v12 = vsel %vm522_vm2, %v4664_v9, -inf }
 0x373   :  { %590 = vadd.xlane.f32.xlu1 %v589_v11  ;;  %731 = vmax.xlane.f32.xlu2 %v730_v12 }
 0x379   :  { %v4672_v2 = vpop.f32.mrf.mxu0 }
 0x37a   :  { %v733_v13 = vsel %vm522_vm2, %v4672_v2, -inf }
 0x37b   :  { %734 = vmax.xlane.f32.xlu0 %v733_v13  ;;  %593 = vadd.xlane.f32.xlu2 %v592_v14 }
 0x381   :  { %v4678_v15 = vpop.f32.mrf.mxu0 }
 0x382   :  { %v736_v4 = vsel %vm522_vm2, %v4678_v15, -inf }
 0x383   :  { %737 = vmax.xlane.f32.xlu0 %v736_v4 }
 0x389   :  { %v4682_v5 = vpop.f32.mrf.mxu0 }
 0x38a   :  { %v739_v16 = vsel %vm522_vm2, %v4682_v5, -inf }
 0x38b   :  { %740 = vmax.xlane.f32.xlu1 %v739_v16 }
 0x3c6   :  { %v720_v17 = vpop.xlane.xlu0 %719 }
 0x3c7   :  { %v742_v20 = vsub.f32 %v698_v51, %v720_v17  ;;  %v637_v17 = vpop.f32.mrf.mxu3 }
 0x3c9   :  { %v750_v10 = vmul.f32 1.442695, %v742_v20 }
 0x3cb   :  { %3982 = vpow2.f32 %v750_v10 }
 0x3cc   :  { %3984 = vrcp.f32 %v579_v21 }
 0x3ce   :  { %v723_v22 = vpop.xlane.xlu1 %722  ;;  %v582_v38 = vpop.xlane.xlu0 %581 }
 0x3cf   :  { %v743_v26 = vsub.f32 %v700_v45, %v723_v22  ;;  %3986 = vrcp.f32 %v582_v38 }
 0x3d1   :  { %v4686_v27 = vpop.eup %3982  ;;  %v752_v29 = vmul.f32 1.442695, %v743_v26 }
 0x3d2   :  { %v766_v1 = vsel %vm522_vm2, %v4686_v27, 0.0  ;;  %v3985_v30 = vpop.eup %3984 }
 0x3d3   :  { %3988 = vpow2.f32 %v752_v29  ;;  %767 = vadd.xlane.f32.xlu2 %v766_v1  ;;  %v605_v36 = vmul.f32 %v3985_v30, %v4555_v37 }
 0x3d5   :  { %v3987_v32 = vpop.eup %3986 }
 0x3d6   :  { %v726_v35 = vpop.xlane.xlu1 %725  ;;  %v606_v39 = vmul.f32 %v3987_v32, %v4642_v52  ;;  %v585_v46 = vpop.xlane.xlu0 %584 }
 0x3d7   :  { %v744_v40 = vsub.f32 %v703_v58, %v726_v35 }
 0x3d8   :  { %v612_v19 = vpack.c.bf16 %v606_v39, %v605_v36 }
 0x3d9   :  { %v4692_v43 = vpop.eup %3988  ;;  %v754_v44 = vmul.f32 1.442695, %v744_v40 }
 0x3da   :  { %3678 = vmatmul.msk.bf16.gmra.mxu3 %vm522_vm2, %v612_v19  ;;  %v769_v48 = vsel %vm522_vm2, %v4692_v43, 0.0 }
 0x3db   :  { %3990 = vpow2.f32 %v754_v44  ;;  %770 = vadd.xlane.f32.xlu0 %v769_v48 }
 0x3dc   :  { %3992 = vrcp.f32 %v585_v46 }
 0x3de   :  { %v588_v23 = vpop.xlane.xlu1 %587  ;;  %v729_v51 = vpop.xlane.xlu2 %728 }
 0x3df   :  { %3994 = vrcp.f32 %v588_v23  ;;  %v745_v37 = vsub.f32 %v705_v6, %v729_v51 }
 0x3e1   :  { %v4697_v42 = vpop.eup %3990  ;;  %v756_v24 = vmul.f32 1.442695, %v745_v37 }
 0x3e2   :  { %v772_v50 = vsel %vm522_vm2, %v4697_v42, 0.0  ;;  %v3993_v52 = vpop.eup %3992 }
 0x3e3   :  { %3996 = vpow2.f32 %v756_v24  ;;  %773 = vadd.xlane.f32.xlu1 %v772_v50  ;;  %v607_v53 = vmul.f32 %v3993_v52, %v4649_v31 }
 0x3e5   :  { %v3995_v18 = vpop.eup %3994 }
 0x3e6   :  { %v732_v45 = vpop.xlane.xlu2 %731  ;;  %v608_v54 = vmul.f32 %v3995_v18, %v4656_v62  ;;  %v591_v55 = vpop.xlane.xlu1 %590 }
 0x3e7   :  { %v746_v56 = vsub.f32 %v4664_v9, %v732_v45 }
 0x3e8   :  { %v613_v57 = vpack.c.bf16 %v608_v54, %v607_v53 }
 0x3e9   :  { %v4704_v58 = vpop.eup %3996  ;;  %v758_v59 = vmul.f32 1.442695, %v746_v56 }
 0x3ea   :  { %3679 = vmatmul.msk.bf16.gmra.mxu3 %vm522_vm2, %v613_v57  ;;  %v775_v25 = vsel %vm522_vm2, %v4704_v58, 0.0 }
 0x3eb   :  { %3998 = vpow2.f32 %v758_v59  ;;  %776 = vadd.xlane.f32.xlu2 %v775_v25 }
 0x3ec   :  { %4000 = vrcp.f32 %v591_v55 }
 0x3ee   :  { %v594_v60 = vpop.xlane.xlu2 %593  ;;  %v735_v63 = vpop.xlane.xlu0 %734 }
 0x3ef   :  { %4002 = vrcp.f32 %v594_v60  ;;  %v747_v31 = vsub.f32 %v4672_v2, %v735_v63 }
 0x3f1   :  { %v4710_v62 = vpop.eup %3998  ;;  %v760_v6 = vmul.f32 1.442695, %v747_v31 }
 0x3f2   :  { %v778_v7 = vsel %vm522_vm2, %v4710_v62, 0.0  ;;  %v4001_v61 = vpop.eup %4000 }
 0x3f3   :  { %4004 = vpow2.f32 %v760_v6  ;;  %779 = vadd.xlane.f32.xlu0 %v778_v7  ;;  %v609_v11 = vmul.f32 %v4001_v61, %v4662_v8 }
 0x3f5   :  { %v4003_v47 = vpop.eup %4002 }
 0x3f6   :  { %v738_v9 = vpop.xlane.xlu0 %737  ;;  %v610_v12 = vmul.f32 %v4003_v47, %v4670_v0  ;;  %v639_v0 = vpop.f32.mrf.mxu3 }
 0x3f7   :  { %v748_v13 = vsub.f32 %v4678_v15, %v738_v9  ;;  %v852_v15 = vpack.c.bf16 %v639_v0, %v637_v17  ;;  %v4266_v0 = vld [vmem:[%s5931_s1 + $0x30] sm:$0xff] }
 0x3f8   :  { %v614_v14 = vpack.c.bf16 %v610_v12, %v609_v11 }
 0x3f9   :  { %v4005_v4 = vpop.eup %4004  ;;  %v762_v2 = vmul.f32 1.442695, %v748_v13 }
 0x3fa   :  { %3680 = vmatmul.msk.bf16.gmra.mxu3 %vm522_vm2, %v614_v14  ;;  %v781_v16 = vsel %vm522_vm2, %v4005_v4, 0.0 }
 0x3fb   :  { %4006 = vpow2.f32 %v762_v2  ;;  %782 = vadd.xlane.f32.xlu1 %v781_v16 }
 0x3fe   :  { %v741_v20 = vpop.xlane.xlu1 %740 }
 0x3ff   :  { %v749_v10 = vsub.f32 %v4682_v5, %v741_v20 }
 0x401   :  { %v4007_v21 = vpop.eup %4006  ;;  %v764_v22 = vmul.f32 1.442695, %v749_v10 }
 0x402   :  { %v784_v8 = vsel %vm522_vm2, %v4007_v21, 0.0 }
 0x403   :  { %4008 = vpow2.f32 %v764_v22  ;;  %785 = vadd.xlane.f32.xlu2 %v784_v8 }
 0x409   :  { %v4009_v38 = vpop.eup %4008 }
 0x40a   :  { %3697 = vmatmul.msk.bf16.vlgmr.msrb.gmra.mxu3 %vm118_vm0, %v852_v15  ;;  %v787_v26 = vsel %vm522_vm2, %v4009_v38, 0.0 }
 0x40b   :  { %788 = vadd.xlane.f32.xlu0 %v787_v26 }
 0x446   :  { %v768_v29 = vpop.xlane.xlu2 %767 }
 0x447   :  { %4010 = vrcp.f32 %v768_v29 }
 0x44d   :  { %v4011_v30 = vpop.eup %4010 }
 0x44e   :  { %v771_v1 = vpop.xlane.xlu0 %770  ;;  %v798_v32 = vmul.f32 %v4011_v30, %v4686_v27 }
 0x44f   :  { %4012 = vrcp.f32 %v771_v1  ;;  %v4268_v1 = vld [vmem:[%s5931_s1 + $0x20] sm:$0xff] }
 0x455   :  { %v4013_v5 = vpop.eup %4012 }
 0x456   :  { %v799_v35 = vmul.f32 %v4013_v5, %v4692_v43  ;;  %v774_v39 = vpop.xlane.xlu1 %773 }
 0x457   :  { %4014 = vrcp.f32 %v774_v39  ;;  %v4270_v39 = vld [vmem:[%s5931_s1 + $0x18] sm:$0xff] }
 0x458   :  { %v806_v36 = vpack.c.bf16 %v799_v35, %v798_v32  ;;  %v4269_v32 = vld [vmem:[%s5931_s1 + $0x38] sm:$0xff] }
 0x45a   :  { %3685 = vmatmul.msk.bf16.vlgmr.msrb.gmra.mxu2 %vm522_vm2, %v806_v36 }
 0x45d   :  { %v642_v40 = vpop.f32.mrf.mxu3  ;;  %v4015_v44 = vpop.eup %4014 }
 0x45e   :  { %v777_v19 = vpop.xlane.xlu2 %776  ;;  %v800_v51 = vmul.f32 %v4015_v44, %v4697_v42 }
 0x45f   :  { %4016 = vrcp.f32 %v777_v19 }
 0x465   :  { %v4017_v46 = vpop.eup %4016  ;;  %v644_v48 = vpop.f32.mrf.mxu3 }
 0x466   :  { %v853_v23 = vpack.c.bf16 %v644_v48, %v642_v40  ;;  %v801_v37 = vmul.f32 %v4017_v46, %v4704_v58  ;;  %v780_v43 = vpop.xlane.xlu0 %779  ;;  %v4271_v48 = vld [vmem:[%s5931_s1 + $0x10] sm:$0xff] }
 0x467   :  { %4018 = vrcp.f32 %v780_v43  ;;  %v4272_v43 = vld [vmem:[%s5931_s1 + $0x8] sm:$0xff] }
 0x468   :  { %3698 = vmatmul.msk.bf16.gmra.mxu3 %vm118_vm0, %v853_v23  ;;  %v807_v27 = vpack.c.bf16 %v801_v37, %v800_v51 }
 0x46a   :  { %3686 = vmatmul.msk.bf16.gmra.mxu2 %vm522_vm2, %v807_v27 }
 0x46d   :  { %v647_v24 = vpop.f32.mrf.mxu3  ;;  %v4019_v52 = vpop.eup %4018 }
 0x46e   :  { %v783_v50 = vpop.xlane.xlu1 %782  ;;  %v802_v54 = vmul.f32 %v4019_v52, %v4710_v62 }
 0x46f   :  { %4020 = vrcp.f32 %v783_v50 }
 0x475   :  { %v4021_v18 = vpop.eup %4020  ;;  %v649_v45 = vpop.f32.mrf.mxu3 }
 0x476   :  { %v854_v53 = vpack.c.bf16 %v649_v45, %v647_v24  ;;  %v803_v56 = vmul.f32 %v4021_v18, %v4005_v4  ;;  %v786_v57 = vpop.xlane.xlu2 %785  ;;  %v4273_v45 = vld [vmem:[%s5931_s1] sm:$0xff] }
 0x477   :  { %4022 = vrcp.f32 %v786_v57 }
 0x478   :  { %3699 = vmatmul.msk.bf16.gmra.mxu3 %vm118_vm0, %v854_v53  ;;  %v808_v42 = vpack.c.bf16 %v803_v56, %v802_v54 }
 0x47a   :  { %3687 = vmatmul.msk.bf16.gmra.mxu2 %vm522_vm2, %v808_v42 }
 0x47d   :  { %v652_v58 = vpop.f32.mrf.mxu3  ;;  %v4023_v55 = vpop.eup %4022 }
 0x47e   :  { %v789_v59 = vpop.xlane.xlu0 %788  ;;  %v804_v31 = vmul.f32 %v4023_v55, %v4007_v21 }
 0x47f   :  { %4024 = vrcp.f32 %v789_v59 }
 0x485   :  { %v4025_v25 = vpop.eup %4024  ;;  %v654_v60 = vpop.f32.mrf.mxu3 }
 0x486   :  { %v855_v63 = vpack.c.bf16 %v654_v60, %v652_v58  ;;  %v805_v6 = vmul.f32 %v4025_v25, %v4009_v38  ;;  %v4267_v38 = vld [vmem:[%s5931_s1 + $0x28] sm:$0xff] }
 0x488   :  { %3700 = vmatmul.msk.bf16.gmra.mxu3 %vm118_vm0, %v855_v63  ;;  %v809_v62 = vpack.c.bf16 %v805_v6, %v804_v31 }
 0x48a   :  { %3688 = vmatmul.msk.bf16.gmra.mxu2 %vm522_vm2, %v809_v62  ;;  %v1042_v62 = vpop.f32.mrf.mxu0 }
 0x48d   :  { %v905_v7 = vpop.f32.mrf.mxu3 }
 0x48e   :  { %v4789_v53 = vadd.f32 %v4273_v45, %v905_v7  ;;  %v4280_v45 = vld [vmem:[%s5931_s1 + $0x48] sm:$0xff] }
 0x490   :  { %v989_v55 = vpack.c.bf16 %v4789_v53, %v4789_v53 }
 0x492   :  { %v1069_v31 = vunpack.c.l.b16 %v989_v55 }
 0x495   :  { %v907_v47 = vpop.f32.mrf.mxu3 }
 0x496   :  { %v4780_v24 = vadd.f32 %v4272_v43, %v907_v47  ;;  %v1044_v47 = vpop.f32.mrf.mxu0 }
 0x498   :  { %v990_v57 = vpack.c.bf16 %v4780_v24, %v4780_v24 }
 0x49a   :  { %v1070_v60 = vunpack.c.l.b16 %v990_v57 }
 0x49c   :  { %v4808_v7 = vpack.c.b16 %v1070_v60, %v1069_v31 }
 0x4dd   :  { %v832_v61 = vpop.f32.mrf.mxu2 }
 0x4e5   :  { %v834_v9 = vpop.f32.mrf.mxu2 }
 0x4e6   :  { %v856_v11 = vpack.c.bf16 %v834_v9, %v832_v61  ;;  %v1053_v9 = vpack.c.bf16 %v1044_v47, %v1044_v47 }
 0x4e8   :  { %3701 = vmatmul.msk.bf16.gmra.mxu3 %vm118_vm0, %v856_v11  ;;  %v1052_v11 = vpack.c.bf16 %v1042_v62, %v1042_v62 }
 0x4eb   :  { %v910_v12 = vpop.f32.mrf.mxu3 }
 0x4ec   :  { %v4772_v23 = vadd.f32 %v4271_v48, %v910_v12  ;;  %v1085_v12 = vsel %vm118_vm0, %v4808_v7, 0 }
 0x4ed   :  { %v837_v13 = vpop.f32.mrf.mxu2 }
 0x4ee   :  { %v991_v54 = vpack.c.bf16 %v4772_v23, %v4772_v23 }
 0x4f0   :  { %v1071_v25 = vunpack.c.l.b16 %v991_v54 }
 0x4f3   :  { %v912_v14 = vpop.f32.mrf.mxu3 }
 0x4f4   :  { %v4763_v40 = vadd.f32 %v4270_v39, %v912_v14  ;;  %v1058_v14 = vunpack.c.l.b16 %v1052_v11  ;;  %v4277_v39 = vld [vmem:[%s5931_s1 + $0x78] sm:$0xff] }
 0x4f5   :  { %v839_v4 = vpop.f32.mrf.mxu2 }
 0x4f6   :  { %v857_v2 = vpack.c.bf16 %v839_v4, %v837_v13  ;;  %v992_v50 = vpack.c.bf16 %v4763_v40, %v4763_v40  ;;  %v1059_v13 = vunpack.c.l.b16 %v1053_v9 }
 0x4f8   :  { %3702 = vmatmul.msk.bf16.gmra.mxu3 %vm118_vm0, %v857_v2  ;;  %v1072_v58 = vunpack.c.l.b16 %v992_v50  ;;  %v1060_v4 = vpack.c.b16 %v1059_v13, %v1058_v14 }
 0x4fa   :  { %v4803_v63 = vpack.c.b16 %v1072_v58, %v1071_v25  ;;  %v4281_v58 = vld [vmem:[%s5931_s1 + $0x40] sm:$0xff] }
 0x4fb   :  { %v915_v16 = vpop.f32.mrf.mxu3 }
 0x4fc   :  { %v4751_v30 = vadd.f32 %v4268_v1, %v915_v16  ;;  %v1088_v61 = vsel %vm118_vm0, %v4803_v63, 0 }
 0x4fd   :  { %v842_v17 = vpop.f32.mrf.mxu2 }
 0x4fe   :  { %v993_v51 = vpack.c.bf16 %v4751_v30, %v4751_v30 }
 0x500   :  { %v1073_v56 = vunpack.c.l.b16 %v993_v51 }
 0x503   :  { %v917_v20 = vpop.f32.mrf.mxu3 }
 0x504   :  { %v4746_v26 = vadd.f32 %v4267_v38, %v917_v20  ;;  %v4275_v38 = vld [vmem:[%s5931_s1 + $0x68] sm:$0xff] }
 0x505   :  { %v844_v10 = vpop.f32.mrf.mxu2 }
 0x506   :  { %v858_v21 = vpack.c.bf16 %v844_v10, %v842_v17  ;;  %v994_v19 = vpack.c.bf16 %v4746_v26, %v4746_v26 }
 0x508   :  { %3703 = vmatmul.msk.bf16.gmra.mxu3 %vm118_vm0, %v858_v21  ;;  %v1074_v52 = vunpack.c.l.b16 %v994_v19 }
 0x50a   :  { %v4798_v59 = vpack.c.b16 %v1074_v52, %v1073_v56 }
 0x50b   :  { %v920_v22 = vpop.f32.mrf.mxu3 }
 0x50c   :  { %v4741_v15 = vadd.f32 %v4266_v0, %v920_v22  ;;  %v1091_v6 = vsel %vm118_vm0, %v4798_v59, 0 }
 0x50d   :  { %v847_v8 = vpop.f32.mrf.mxu2 }
 0x50e   :  { %v995_v5 = vpack.c.bf16 %v4741_v15, %v4741_v15 }
 0x510   :  { %v1075_v37 = vunpack.c.l.b16 %v995_v5  ;;  %v4276_v5 = vld [vmem:[%s5931_s1 + $0x60] sm:$0xff] }
 0x513   :  { %v922_v29 = vpop.f32.mrf.mxu3 }
 0x514   :  { %v4758_v35 = vadd.f32 %v4269_v32, %v922_v29 }
 0x515   :  { %v849_v36 = vpop.f32.mrf.mxu2 }
 0x516   :  { %v996_v44 = vpack.c.bf16 %v4758_v35, %v4758_v35  ;;  %v859_v46 = vpack.c.bf16 %v849_v36, %v847_v8  ;;  %v4274_v8 = vld [vmem:[%s5931_s1 + $0x70] sm:$0xff] }
 0x518   :  { %v1076_v27 = vunpack.c.l.b16 %v996_v44  ;;  %3704 = vmatmul.msk.bf16.gmra.mxu3 %vm118_vm0, %v859_v46  ;;  %v4278_v44 = vld [vmem:[%s5931_s1 + $0x58] sm:$0xff] }
 0x51a   :  { %v4784_v18 = vpack.c.b16 %v1076_v27, %v1075_v37  ;;  %v4279_v37 = vld [vmem:[%s5931_s1 + $0x50] sm:$0xff] }
 0x51c   :  { %1144 = vmatpush.bf16.msrb.mxu1 %v4784_v18  ;;  %v1094_v42 = vsel %vm118_vm0, %v4784_v18, 0 }
 0x51d   :  { %1100 = vmatpush.bf16.xpose.msrb.mxu0 %v1094_v42 }
 0x520   :  { %1145 = vmatpush.bf16.msrb.mxu1 %v4798_v59 }
 0x524   :  { %1146 = vmatpush.bf16.msrb.mxu1 %v4803_v63 }
 0x525   :  { %1101 = vmatpush.bf16.xpose.msrb.mxu0 %v1091_v6 }
 0x528   :  { %1147 = vmatpush.bf16.msrb.mxu1 %v4808_v7 }
 0x52d   :  { %1102 = vmatpush.bf16.xpose.msrb.mxu0 %v1088_v61 }
 0x535   :  { %1103 = vmatpush.bf16.xpose.msrb.mxu0 %v1085_v12 }
 0x53c   :  { %3731 = vmatmul.msk.bf16.vlgmr.msrb.gmra.mxu0 %vm118_vm0, %v1060_v4  ;;  %v1047_v4 = vpop.f32.mrf.mxu0 }
 0x56b   :  { %v925_v2 = vpop.f32.mrf.mxu3 }
 0x56c   :  { %v4864_v55 = vadd.f32 %v4281_v58, %v925_v2 }
 0x56e   :  { %v997_v47 = vpack.c.bf16 %v4864_v55, %v4864_v55 }
 0x570   :  { %v1167_v13 = vunpack.c.l.b16 %v997_v47 }
 0x573   :  { %v927_v16 = vpop.f32.mrf.mxu3 }
 0x574   :  { %v4857_v54 = vadd.f32 %v4280_v45, %v927_v16  ;;  %v1028_v16 = vsel %vm118_vm0, %v4618_v34, 0 }
 0x576   :  { %v998_v6 = vpack.c.bf16 %v4857_v54, %v4857_v54 }
 0x578   :  { %v1168_v11 = vunpack.c.l.b16 %v998_v6 }
 0x57a   :  { %v1175_v2 = vpack.c.b16 %v1168_v11, %v1167_v13 }
 0x57b   :  { %v930_v17 = vpop.f32.mrf.mxu3 }
 0x57c   :  { %v4850_v27 = vadd.f32 %v4279_v37, %v930_v17 }
 0x57e   :  { %v999_v25 = vpack.c.bf16 %v4850_v27, %v4850_v27 }
 0x580   :  { %v1169_v9 = vunpack.c.l.b16 %v999_v25 }
 0x583   :  { %v932_v20 = vpop.f32.mrf.mxu3 }
 0x584   :  { %v4841_v46 = vadd.f32 %v4278_v44, %v932_v20  ;;  %v1049_v20 = vpop.f32.mrf.mxu0 }
 0x586   :  { %v1000_v56 = vpack.c.bf16 %v4841_v46, %v4841_v46 }
 0x588   :  { %v1170_v62 = vunpack.c.l.b16 %v1000_v56 }
 0x58a   :  { %v1176_v12 = vpack.c.b16 %v1170_v62, %v1169_v9 }
 0x58b   :  { %v935_v10 = vpop.f32.mrf.mxu3 }
 0x58c   :  { %v4829_v32 = vadd.f32 %v4276_v5, %v935_v10  ;;  %v1186_v17 = vsel %vm118_vm0, %v1176_v12, 0  ;;  %v1055_v10 = vpack.c.bf16 %v1049_v20, %v1049_v20 }
 0x58e   :  { %v1001_v43 = vpack.c.bf16 %v4829_v32, %v4829_v32 }
 0x590   :  { %v1171_v60 = vunpack.c.l.b16 %v1001_v43 }
 0x593   :  { %v937_v21 = vpop.f32.mrf.mxu3 }
 0x594   :  { %v4824_v29 = vadd.f32 %v4275_v38, %v937_v21  ;;  %v3930_v21 = vld [vmem:[%s5932_s2 + $0x68] sm:$0xff]  ;;  %v1157_v38 = vunpack.c.l.b16 %v1055_v10 }
 0x596   :  { %v1002_v48 = vpack.c.bf16 %v4824_v29, %v4824_v29 }
 0x598   :  { %v1172_v42 = vunpack.c.l.b16 %v1002_v48 }
 0x59a   :  { %v1177_v61 = vpack.c.b16 %v1172_v42, %v1171_v60 }
 0x59b   :  { %v940_v22 = vpop.f32.mrf.mxu3 }
 0x59c   :  { %v4819_v0 = vadd.f32 %v4274_v8, %v940_v22  ;;  %v1189_v14 = vsel %vm118_vm0, %v1177_v61, 0  ;;  %v1054_v22 = vpack.c.bf16 %v1047_v4, %v1047_v4  ;;  %v1183_v8 = vsel %vm118_vm0, %v1175_v2, 0 }
 0x59e   :  { %v1003_v36 = vpack.c.bf16 %v4819_v0, %v4819_v0  ;;  %v1156_v5 = vunpack.c.l.b16 %v1054_v22 }
 0x5a0   :  { %v1173_v50 = vunpack.c.l.b16 %v1003_v36  ;;  %v1158_v36 = vpack.c.b16 %v1157_v38, %v1156_v5 }
 0x5a3   :  { %v942_v1 = vpop.f32.mrf.mxu3 }
 0x5a4   :  { %v4836_v19 = vadd.f32 %v4277_v39, %v942_v1  ;;  %v3929_v1 = vld [vmem:[%s5932_s2 + $0x60] sm:$0xff] }
 0x5a6   :  { %v1004_v51 = vpack.c.bf16 %v4836_v19, %v4836_v19 }
 0x5a8   :  { %v1174_v52 = vunpack.c.l.b16 %v1004_v51 }
 0x5aa   :  { %v1178_v57 = vpack.c.b16 %v1174_v52, %v1173_v50 }
 0x5ac   :  { %1242 = vmatpush.bf16.msra.mxu0 %v1178_v57  ;;  %v1192_v31 = vsel %vm118_vm0, %v1178_v57, 0 }
 0x5ad   :  { %1198 = vmatpush.bf16.xpose.msra.mxu2 %v1192_v31 }
 0x5b0   :  { %1243 = vmatpush.bf16.msra.mxu0 %v1177_v61 }
 0x5b4   :  { %1244 = vmatpush.bf16.msra.mxu0 %v1176_v12 }
 0x5b5   :  { %1199 = vmatpush.bf16.xpose.msra.mxu2 %v1189_v14 }
 0x5b8   :  { %1245 = vmatpush.bf16.msra.mxu0 %v1175_v2 }
 0x5bc   :  { %1407 = vmatpush.bf16.xpose.msrb.mxu0 %v1028_v16 }
 0x5bd   :  { %1200 = vmatpush.bf16.xpose.msra.mxu2 %v1186_v17 }
 0x5c5   :  { %1201 = vmatpush.bf16.xpose.msra.mxu2 %v1183_v8 }
 0x5cc   :  { %3733 = vmatmul.msk.bf16.vlgmr.msra.gmra.mxu2 %vm118_vm0, %v1158_v36 }
 0x5cd   :  { %1309 = vmatpush.bf16.msrb.mxu2 %v3930_v21 }
 0x5d1   :  { %1310 = vmatpush.bf16.msrb.mxu2 %v3929_v1 }
 0x5dc   :  { %3753 = vmatmul.msk.bf16.vlgmr.msrb.gmra.mxu2 %vm118_vm0, %v4808_v7 }
 0x5ec   :  { %3754 = vmatmul.msk.bf16.gmra.mxu2 %vm118_vm0, %v4803_v63 }
 0x5fc   :  { %3755 = vmatmul.msk.bf16.gmra.mxu2 %vm118_vm0, %v4798_v59  ;;  %v1105_v59 = vpop.f32.mrf.mxu0 }
 0x60c   :  { %3756 = vmatmul.msk.bf16.gmra.mxu2 %vm118_vm0, %v4784_v18  ;;  %v1110_v18 = vsel %vm202_vm1, %v1105_v59, -inf }
 0x61c   :  { %3757 = vmatmul.msk.bf16.gmra.mxu2 %vm118_vm0, %v1175_v2 }
 0x62c   :  { %3758 = vmatmul.msk.bf16.gmra.mxu2 %vm118_vm0, %v1176_v12 }
 0x63c   :  { %3759 = vmatmul.msk.bf16.gmra.mxu2 %vm118_vm0, %v1177_v61 }
 0x64c   :  { %3760 = vmatmul.msk.bf16.gmra.mxu2 %vm118_vm0, %v1178_v57 }
 0x64f   :  { %v1203_v39 = vpop.f32.mrf.mxu2 }
 0x650   :  { %v1208_v7 = vsel %vm202_vm1, %v1203_v39, -inf }
 0x651   :  { %1209 = vmax.xlane.f32.xlu1 %v1208_v7 }
 0x657   :  { %v1205_v44 = vpop.f32.mrf.mxu2 }
 0x658   :  { %v1211_v63 = vsel %vm202_vm1, %v1205_v44, -inf }
 0x659   :  { %1212 = vmax.xlane.f32.xlu2 %v1211_v63 }
 0x65f   :  { %v4899_v48 = vpop.f32.mrf.mxu2 }
 0x661   :  { %1111 = vmax.xlane.f32.xlu2 %v1110_v18  ;;  %v1107_v18 = vpop.f32.mrf.mxu0 }
 0x667   :  { %v4902_v51 = vpop.f32.mrf.mxu2 }
 0x66f   :  { %v4904_v37 = vpop.f32.mrf.mxu2 }
 0x677   :  { %v4906_v43 = vpop.f32.mrf.mxu2 }
 0x67f   :  { %v4908_v50 = vpop.f32.mrf.mxu2 }
 0x687   :  { %v4910_v52 = vpop.f32.mrf.mxu2 }
 0x68f   :  { %v4912_v45 = vpop.f32.mrf.mxu2 }
 0x697   :  { %v4914_v56 = vpop.f32.mrf.mxu2 }
 0x69f   :  { %v1332_v42 = vpop.f32.mrf.mxu2 }
 0x6a0   :  { %v1360_v57 = vpack.c.bf16 %v1332_v42, %v1332_v42 }
 0x6a2   :  { %v1571_v60 = vunpack.c.l.b16 %v1360_v57 }
 0x6a7   :  { %v1334_v58 = vpop.f32.mrf.mxu2 }
 0x6a8   :  { %v1361_v25 = vpack.c.bf16 %v1334_v58, %v1334_v58 }
 0x6aa   :  { %v1572_v31 = vunpack.c.l.b16 %v1361_v25 }
 0x6ac   :  { %v1579_v6 = vpack.c.b16 %v1572_v31, %v1571_v60 }
 0x6ae   :  { %3769 = vmatmul.msk.bf16.vlgmr.msra.gmra.mxu3 %vm118_vm0, %v1579_v6  ;;  %v1113_v6 = vsel %vm202_vm1, %v1107_v18, -inf }
 0x6af   :  { %v1337_v62 = vpop.f32.mrf.mxu2 }
 0x6b0   :  { %v1362_v61 = vpack.c.bf16 %v1337_v62, %v1337_v62 }
 0x6b2   :  { %v1573_v11 = vunpack.c.l.b16 %v1362_v61 }
 0x6b7   :  { %v1339_v47 = vpop.f32.mrf.mxu2 }
 0x6b8   :  { %v1363_v9 = vpack.c.bf16 %v1339_v47, %v1339_v47 }
 0x6ba   :  { %v1574_v12 = vunpack.c.l.b16 %v1363_v9 }
 0x6bc   :  { %v1580_v13 = vpack.c.b16 %v1574_v12, %v1573_v11 }
 0x6be   :  { %3770 = vmatmul.msk.bf16.gmra.mxu3 %vm118_vm0, %v1580_v13 }
 0x6bf   :  { %v1342_v14 = vpop.f32.mrf.mxu2 }
 0x6c0   :  { %v1364_v16 = vpack.c.bf16 %v1342_v14, %v1342_v14 }
 0x6c2   :  { %v1575_v21 = vunpack.c.l.b16 %v1364_v16 }
 0x6c4   :  { %v1210_v4 = vpop.xlane.xlu1 %1209 }
 0x6c5   :  { %v1214_v2 = vsub.f32 %v1203_v39, %v1210_v4 }
 0x6c7   :  { %v1216_v17 = vmul.f32 1.442695, %v1214_v2  ;;  %v1344_v20 = vpop.f32.mrf.mxu2 }
 0x6c8   :  { %v1365_v10 = vpack.c.bf16 %v1344_v20, %v1344_v20 }
 0x6c9   :  { %4026 = vpow2.f32 %v1216_v17 }
 0x6ca   :  { %v1576_v22 = vunpack.c.l.b16 %v1365_v10 }
 0x6cc   :  { %v1581_v8 = vpack.c.b16 %v1576_v22, %v1575_v21  ;;  %v1213_v38 = vpop.xlane.xlu2 %1212 }
 0x6cd   :  { %v1215_v1 = vsub.f32 %v1205_v44, %v1213_v38  ;;  %v1352_v38 = vpack.c.bf16 %v4899_v48, %v4899_v48  ;;  %v1356_v48 = vpack.c.bf16 %v4908_v50, %v4908_v50  ;;  %v3928_v50 = vld [vmem:[%s5932_s2 + $0x58] sm:$0xff] }
 0x6ce   :  { %3771 = vmatmul.msk.bf16.gmra.mxu3 %vm118_vm0, %v1581_v8  ;;  %v1353_v8 = vpack.c.bf16 %v4902_v51, %v4902_v51  ;;  %v1357_v51 = vpack.c.bf16 %v4910_v52, %v4910_v52  ;;  %1278 = vmatpush.bf16.msra.mxu1 %v3928_v50  ;;  %v3927_v52 = vld [vmem:[%s5932_s2 + $0x50] sm:$0xff] }
 0x6cf   :  { %v4027_v5 = vpop.eup %4026  ;;  %v1218_v36 = vmul.f32 1.442695, %v1215_v1  ;;  %v1347_v7 = vpop.f32.mrf.mxu2 }
 0x6d0   :  { %v1220_v63 = vsel %vm202_vm1, %v4027_v5, 0.0  ;;  %v1366_v57 = vpack.c.bf16 %v1347_v7, %v1347_v7  ;;  %v1377_v1 = vunpack.c.l.b16 %v1353_v8 }
 0x6d1   :  { %4028 = vpow2.f32 %v1218_v36  ;;  %1221 = vadd.xlane.f32.xlu0 %v1220_v63  ;;  %v1376_v36 = vunpack.c.l.b16 %v1352_v38  ;;  %v1354_v63 = vpack.c.bf16 %v4904_v37, %v4904_v37  ;;  %v1358_v37 = vpack.c.bf16 %v4912_v45, %v4912_v45 }
 0x6d2   :  { %v1577_v62 = vunpack.c.l.b16 %v1366_v57  ;;  %v1380_v57 = vunpack.c.l.b16 %v1356_v48  ;;  %1279 = vmatpush.bf16.msra.mxu1 %v3927_v52 }
 0x6d3   :  { %v1384_v7 = vpack.c.b16 %v1377_v1, %v1376_v36 }
 0x6d4   :  { %v1112_v39 = vpop.xlane.xlu2 %1111 }
 0x6d5   :  { %v1116_v42 = vsub.f32 %v1105_v59, %v1112_v39 }
 0x6d7   :  { %v4029_v58 = vpop.eup %4028  ;;  %v1118_v25 = vmul.f32 1.442695, %v1116_v42  ;;  %v1349_v60 = vpop.f32.mrf.mxu2  ;;  %v1381_v42 = vunpack.c.l.b16 %v1357_v51 }
 0x6d8   :  { %v1367_v31 = vpack.c.bf16 %v1349_v60, %v1349_v60  ;;  %v1223_v44 = vsel %vm202_vm1, %v4029_v58, 0.0  ;;  %v1382_v60 = vunpack.c.l.b16 %v1358_v37 }
 0x6d9   :  { %4030 = vpow2.f32 %v1118_v25  ;;  %1114 = vmax.xlane.f32.xlu0 %v1113_v6  ;;  %1224 = vadd.xlane.f32.xlu1 %v1223_v44 }
 0x6da   :  { %v1578_v61 = vunpack.c.l.b16 %v1367_v31 }
 0x6dc   :  { %v1582_v47 = vpack.c.b16 %v1578_v61, %v1577_v62 }
 0x6de   :  { %3772 = vmatmul.msk.bf16.gmra.mxu3 %vm118_vm0, %v1582_v47 }
 0x6df   :  { %v4031_v9 = vpop.eup %4030 }
 0x6e0   :  { %v1122_v59 = vsel %vm202_vm1, %v4031_v9, 0.0 }
 0x6e1   :  { %1123 = vadd.xlane.f32.xlu1 %v1122_v59 }
 0x744   :  { %v1222_v11 = vpop.xlane.xlu0 %1221 }
 0x745   :  { %4032 = vrcp.f32 %v1222_v11 }
 0x74b   :  { %v4033_v2 = vpop.eup %4032 }
 0x74c   :  { %v1115_v12 = vpop.xlane.xlu0 %1114  ;;  %v1225_v13 = vpop.xlane.xlu1 %1224  ;;  %v1228_v17 = vmul.f32 %v4033_v2, %v4027_v5  ;;  %v1355_v5 = vpack.c.bf16 %v4906_v43, %v4906_v43  ;;  %v1359_v43 = vpack.c.bf16 %v4914_v56, %v4914_v56 }
 0x74d   :  { %v1117_v14 = vsub.f32 %v1107_v18, %v1115_v12  ;;  %4034 = vrcp.f32 %v1225_v13 }
 0x74e   :  { %v1379_v39 = vunpack.c.l.b16 %v1355_v5  ;;  %v1383_v25 = vunpack.c.l.b16 %v1359_v43 }
 0x74f   :  { %v1120_v4 = vmul.f32 1.442695, %v1117_v14 }
 0x750   :  { %v1387_v31 = vpack.c.b16 %v1383_v25, %v1382_v60 }
 0x751   :  { %4036 = vpow2.f32 %v1120_v4 }
 0x753   :  { %v4035_v16 = vpop.eup %4034 }
 0x754   :  { %v1229_v20 = vmul.f32 %v4035_v16, %v4029_v58  ;;  %v1386_v58 = vpack.c.b16 %v1381_v42, %v1380_v57  ;;  %v1124_v6 = vpop.xlane.xlu1 %1123  ;;  %v4969_v42 = vpop.f32.mrf.mxu3 }
 0x755   :  { %4038 = vrcp.f32 %v1124_v6 }
 0x756   :  { %v1230_v10 = vpack.c.bf16 %v1229_v20, %v1228_v17 }
 0x757   :  { %v4037_v21 = vpop.eup %4036 }
 0x758   :  { %3734 = vmatmul.msk.bf16.vlgmr.msra.gmra.mxu0 %vm202_vm1, %v1230_v10  ;;  %v1125_v22 = vsel %vm202_vm1, %v4037_v21, 0.0 }
 0x759   :  { %1736 = vmatpush.bf16.msra.mxu0 %v4634_v49  ;;  %1126 = vadd.xlane.f32.xlu2 %v1125_v22  ;;  %v1378_v49 = vunpack.c.l.b16 %v1354_v63 }
 0x75b   :  { %v1385_v18 = vpack.c.b16 %v1379_v39, %v1378_v49  ;;  %v4039_v45 = vpop.eup %4038 }
 0x75c   :  { %v1130_v62 = vmul.f32 %v4039_v45, %v4031_v9  ;;  %v4977_v52 = vpop.f32.mrf.mxu3 }
 0x768   :  { %3761 = vmatmul.msk.bf16.vlgmr.msrb.gmra.mxu0 %vm118_vm0, %v1384_v7 }
 0x778   :  { %3762 = vmatmul.msk.bf16.gmra.mxu0 %vm118_vm0, %v1385_v18 }
 0x788   :  { %3763 = vmatmul.msk.bf16.gmra.mxu0 %vm118_vm0, %v1386_v58 }
 0x798   :  { %3764 = vmatmul.msk.bf16.gmra.mxu0 %vm118_vm0, %v1387_v31 }
 0x7cc   :  { %v1127_v56 = vpop.xlane.xlu2 %1126 }
 0x7cd   :  { %4040 = vrcp.f32 %v1127_v56 }
 0x7d3   :  { %v4041_v44 = vpop.eup %4040 }
 0x7d4   :  { %v1131_v61 = vmul.f32 %v4041_v44, %v4037_v21 }
 0x7d5   :  { %v1247_v47 = vpop.f32.mrf.mxu0 }
 0x7d6   :  { %v1132_v59 = vpack.c.bf16 %v1131_v61, %v1130_v62  ;;  %v4984_v61 = vpop.f32.mrf.mxu3 }
 0x7d8   :  { %3732 = vmatmul.msk.bf16.vlgmr.msrb.gmra.mxu1 %vm202_vm1, %v1132_v59 }
 0x7d9   :  { %1541 = vmatpush.bf16.msrb.mxu1 %v4618_v34 }
 0x7dd   :  { %v1249_v11 = vpop.f32.mrf.mxu0 }
 0x7de   :  { %v1253_v31 = vpack.c.bf16 %v1249_v11, %v1247_v47 }
 0x7e5   :  { %v1409_v12 = vpop.f32.mrf.mxu0 }
 0x7e6   :  { %v1429_v13 = vsel %vm522_vm2, %v1409_v12, -inf }
 0x7e7   :  { %1430 = vmax.xlane.f32.xlu0 %v1429_v13 }
 0x7ed   :  { %v1411_v14 = vpop.f32.mrf.mxu0 }
 0x7ee   :  { %v1432_v4 = vsel %vm522_vm2, %v1411_v14, -inf }
 0x7ef   :  { %1433 = vmax.xlane.f32.xlu1 %v1432_v4  ;;  %v4990_v4 = vpop.f32.mrf.mxu3 }
 0x7f5   :  { %v1414_v2 = vpop.f32.mrf.mxu0 }
 0x7f6   :  { %v1435_v16 = vsel %vm522_vm2, %v1414_v2, -inf }
 0x7f7   :  { %1436 = vmax.xlane.f32.xlu2 %v1435_v16 }
 0x7fd   :  { %v1416_v9 = vpop.f32.mrf.mxu0 }
 0x7fe   :  { %v1438_v17 = vsel %vm522_vm2, %v1416_v9, -inf }
 0x7ff   :  { %1439 = vmax.xlane.f32.xlu0 %v1438_v17 }
 0x805   :  { %v1419_v20 = vpop.f32.mrf.mxu0 }
 0x806   :  { %v1441_v34 = vsel %vm522_vm2, %v1419_v20, -inf }
 0x807   :  { %1442 = vmax.xlane.f32.xlu1 %v1441_v34 }
 0x80d   :  { %v1421_v10 = vpop.f32.mrf.mxu0 }
 0x80e   :  { %v1444_v21 = vsel %vm522_vm2, %v1421_v10, -inf }
 0x80f   :  { %1445 = vmax.xlane.f32.xlu2 %v1444_v21 }
 0x815   :  { %v1424_v22 = vpop.f32.mrf.mxu0 }
 0x816   :  { %v1447_v8 = vsel %vm522_vm2, %v1424_v22, -inf }
 0x817   :  { %1448 = vmax.xlane.f32.xlu0 %v1447_v8  ;;  %v4998_v8 = vpop.f32.mrf.mxu3 }
 0x81d   :  { %v4962_v38 = vpop.f32.mrf.mxu0 }
 0x81e   :  { %v1450_v1 = vsel %vm522_vm2, %v4962_v38, -inf }
 0x81f   :  { %1451 = vmax.xlane.f32.xlu1 %v1450_v1 }
 0x855   :  { %v1149_v36 = vpop.f32.mrf.mxu1 }
 0x85a   :  { %v1431_v7 = vpop.xlane.xlu0 %1430 }
 0x85b   :  { %v1453_v5 = vsub.f32 %v1409_v12, %v1431_v7 }
 0x85d   :  { %v1461_v63 = vmul.f32 1.442695, %v1453_v5  ;;  %v1151_v39 = vpop.f32.mrf.mxu1 }
 0x85e   :  { %v1252_v49 = vpack.c.bf16 %v1151_v39, %v1149_v36 }
 0x85f   :  { %4042 = vpow2.f32 %v1461_v63 }
 0x860   :  { %3743 = vmatmul.msk.bf16.vlgmr.msra.gmra.mxu1 %vm118_vm0, %v1252_v49  ;;  %v5009_v49 = vpop.f32.mrf.mxu3 }
 0x862   :  { %v1434_v18 = vpop.xlane.xlu1 %1433 }
 0x863   :  { %v1454_v51 = vsub.f32 %v1411_v14, %v1434_v18 }
 0x865   :  { %v4967_v48 = vpop.eup %4042  ;;  %v1463_v57 = vmul.f32 1.442695, %v1454_v51  ;;  %v1627_v51 = vsel %vm522_vm2, %v4977_v52, -inf }
 0x866   :  { %v1477_v58 = vsel %vm522_vm2, %v4967_v48, 0.0 }
 0x867   :  { %4044 = vpow2.f32 %v1463_v57  ;;  %1478 = vadd.xlane.f32.xlu2 %v1477_v58  ;;  %v1633_v57 = vsel %vm522_vm2, %v4990_v4, -inf }
 0x868   :  { %v5019_v58 = vpop.f32.mrf.mxu3 }
 0x86a   :  { %v1437_v43 = vpop.xlane.xlu2 %1436 }
 0x86b   :  { %v1455_v37 = vsub.f32 %v1414_v2, %v1437_v43  ;;  %v1636_v43 = vsel %vm522_vm2, %v4998_v8, -inf }
 0x86d   :  { %v4973_v25 = vpop.eup %4044  ;;  %v1465_v60 = vmul.f32 1.442695, %v1455_v37  ;;  %v1630_v37 = vsel %vm522_vm2, %v4984_v61, -inf }
 0x86e   :  { %v1480_v50 = vsel %vm522_vm2, %v4973_v25, 0.0 }
 0x86f   :  { %4046 = vpow2.f32 %v1465_v60  ;;  %1481 = vadd.xlane.f32.xlu0 %v1480_v50  ;;  %v1642_v60 = vsel %vm522_vm2, %v5019_v58, -inf }
 0x870   :  { %3744 = vmatmul.msk.bf16.gmra.mxu1 %vm118_vm0, %v1253_v31  ;;  %v5027_v31 = vpop.f32.mrf.mxu3 }
 0x871   :  { %v1645_v50 = vsel %vm522_vm2, %v5027_v31, -inf }
 0x872   :  { %v1440_v6 = vpop.xlane.xlu0 %1439 }
 0x873   :  { %v1456_v56 = vsub.f32 %v1416_v9, %v1440_v6  ;;  %v1639_v6 = vsel %vm522_vm2, %v5009_v49, -inf }
 0x875   :  { %v4980_v45 = vpop.eup %4046  ;;  %v1467_v44 = vmul.f32 1.442695, %v1456_v56  ;;  %v3934_v56 = vld [vmem:[%s5933_s3 + $0x8] sm:$0xff] }
 0x876   :  { %v1483_v62 = vsel %vm522_vm2, %v4980_v45, 0.0  ;;  %1998 = vmatpush.bf16.msrb.mxu3 %v3934_v56 }
 0x877   :  { %4048 = vpow2.f32 %v1467_v44  ;;  %1484 = vadd.xlane.f32.xlu1 %v1483_v62  ;;  %v3933_v44 = vld [vmem:[%s5933_s3] sm:$0xff] }
 0x87a   :  { %v1443_v47 = vpop.xlane.xlu1 %1442  ;;  %1999 = vmatpush.bf16.msrb.mxu3 %v3933_v44 }
 0x87b   :  { %v1457_v59 = vsub.f32 %v1419_v20, %v1443_v47 }
 0x87d   :  { %v4986_v11 = vpop.eup %4048  ;;  %v1469_v12 = vmul.f32 1.442695, %v1457_v59 }
 0x87e   :  { %v1486_v13 = vsel %vm522_vm2, %v4986_v11, 0.0 }
 0x87f   :  { %4050 = vpow2.f32 %v1469_v12  ;;  %1487 = vadd.xlane.f32.xlu2 %v1486_v13 }
 0x882   :  { %v1446_v14 = vpop.xlane.xlu2 %1445 }
 0x883   :  { %v1458_v2 = vsub.f32 %v1421_v10, %v1446_v14 }
 0x885   :  { %v4992_v16 = vpop.eup %4050  ;;  %v1471_v9 = vmul.f32 1.442695, %v1458_v2 }
 0x886   :  { %v1489_v17 = vsel %vm522_vm2, %v4992_v16, 0.0 }
 0x887   :  { %4052 = vpow2.f32 %v1471_v9  ;;  %1490 = vadd.xlane.f32.xlu0 %v1489_v17 }
 0x88a   :  { %v1449_v20 = vpop.xlane.xlu0 %1448 }
 0x88b   :  { %v1459_v34 = vsub.f32 %v1424_v22, %v1449_v20  ;;  %v1624_v22 = vsel %vm522_vm2, %v4969_v42, -inf }
 0x88d   :  { %v4996_v21 = vpop.eup %4052  ;;  %v1473_v1 = vmul.f32 1.442695, %v1459_v34 }
 0x88e   :  { %v1492_v36 = vsel %vm522_vm2, %v4996_v21, 0.0 }
 0x88f   :  { %4054 = vpow2.f32 %v1473_v1  ;;  %1493 = vadd.xlane.f32.xlu1 %v1492_v36 }
 0x892   :  { %v1452_v10 = vpop.xlane.xlu1 %1451 }
 0x893   :  { %v1460_v7 = vsub.f32 %v4962_v38, %v1452_v10 }
 0x895   :  { %v5003_v5 = vpop.eup %4054  ;;  %v1475_v63 = vmul.f32 1.442695, %v1460_v7 }
 0x896   :  { %v1495_v39 = vsel %vm522_vm2, %v5003_v5, 0.0 }
 0x897   :  { %4056 = vpow2.f32 %v1475_v63  ;;  %1496 = vadd.xlane.f32.xlu2 %v1495_v39  ;;  %1625 = vmax.xlane.f32.xlu1 %v1624_v22 }
 0x89d   :  { %v5011_v18 = vpop.eup %4056 }
 0x89e   :  { %v1498_v38 = vsel %vm522_vm2, %v5011_v18, 0.0 }
 0x89f   :  { %1628 = vmax.xlane.f32.xlu2 %v1627_v51  ;;  %1499 = vadd.xlane.f32.xlu0 %v1498_v38 }
 0x8a0   :  { %1634 = vmax.xlane.f32.xlu1 %v1633_v57 }
 0x8a7   :  { %1637 = vmax.xlane.f32.xlu2 %v1636_v43  ;;  %1631 = vmax.xlane.f32.xlu0 %v1630_v37 }
 0x8a8   :  { %1643 = vmax.xlane.f32.xlu1 %v1642_v60 }
 0x8af   :  { %1646 = vmax.xlane.f32.xlu2 %v1645_v50  ;;  %1640 = vmax.xlane.f32.xlu0 %v1639_v6 }
 0x8da   :  { %v1479_v47 = vpop.xlane.xlu2 %1478 }
 0x8db   :  { %4058 = vrcp.f32 %v1479_v47 }
 0x8dd   :  { %v1281_v62 = vpop.f32.mrf.mxu1 }
 0x8de   :  { %v5040_v59 = vadd.f32 %v1281_v62, %v4603_v33 }
 0x8e0   :  { %v1880_v14 = vpack.c.bf16 %v5040_v59, %v5040_v59 }
 0x8e1   :  { %v4059_v9 = vpop.eup %4058 }
 0x8e2   :  { %v1482_v12 = vpop.xlane.xlu0 %1481  ;;  %v1509_v34 = vmul.f32 %v4059_v9, %v4967_v48  ;;  %v1920_v1 = vunpack.c.l.b16 %v1880_v14 }
 0x8e3   :  { %4060 = vrcp.f32 %v1482_v12 }
 0x8e5   :  { %v1283_v13 = vpop.f32.mrf.mxu1 }
 0x8e6   :  { %v5045_v2 = vadd.f32 %v1283_v13, %v4611_v28 }
 0x8e8   :  { %v1881_v17 = vpack.c.bf16 %v5045_v2, %v5045_v2 }
 0x8e9   :  { %v4061_v20 = vpop.eup %4060 }
 0x8ea   :  { %v1510_v33 = vmul.f32 %v4061_v20, %v4973_v25  ;;  %v1921_v36 = vunpack.c.l.b16 %v1881_v17  ;;  %v1485_v39 = vpop.xlane.xlu1 %1484 }
 0x8eb   :  { %4062 = vrcp.f32 %v1485_v39 }
 0x8ec   :  { %v1517_v10 = vpack.c.bf16 %v1510_v33, %v1509_v34  ;;  %v1940_v7 = vpack.c.b16 %v1921_v36, %v1920_v1  ;;  %v3932_v1 = vld [vmem:[%s5932_s2 + $0x78] sm:$0xff] }
 0x8ed   :  { %v1286_v63 = vpop.f32.mrf.mxu1  ;;  %1808 = vmatpush.bf16.msra.mxu1 %v3932_v1 }
 0x8ee   :  { %3765 = vmatmul.msk.bf16.vlgmr.msrb.gmra.mxu1 %vm522_vm2, %v1517_v10  ;;  %3805 = vmatmul.msk.bf16.vlgmr.msrb.gmra.mxu3 %vm118_vm0, %v1940_v7  ;;  %v1963_v28 = vsel %vm118_vm0, %v1940_v7, 0  ;;  %v5055_v22 = vadd.f32 %v1286_v63, %v4623_v3 }
 0x8ef   :  { %2127 = vmatpush.bf16.msrb.mxu0 %v1940_v7  ;;  %2086 = vmatpush.bf16.xpose.msra.mxu2 %v1963_v28 }
 0x8f0   :  { %v1882_v51 = vpack.c.bf16 %v5055_v22, %v5055_v22 }
 0x8f1   :  { %v4063_v57 = vpop.eup %4062 }
 0x8f2   :  { %v1488_v48 = vpop.xlane.xlu2 %1487  ;;  %v1511_v60 = vmul.f32 %v4063_v57, %v4980_v45  ;;  %v1922_v50 = vunpack.c.l.b16 %v1882_v51 }
 0x8f3   :  { %4064 = vrcp.f32 %v1488_v48 }
 0x8f5   :  { %v1288_v25 = vpop.f32.mrf.mxu1 }
 0x8f6   :  { %v5060_v38 = vadd.f32 %v1288_v25, %v4630_v41 }
 0x8f8   :  { %v1883_v43 = vpack.c.bf16 %v5060_v38, %v5060_v38 }
 0x8f9   :  { %v4065_v37 = vpop.eup %4064 }
 0x8fa   :  { %v1512_v3 = vmul.f32 %v4065_v37, %v4986_v11  ;;  %v1923_v6 = vunpack.c.l.b16 %v1883_v43  ;;  %v1491_v62 = vpop.xlane.xlu0 %1490 }
 0x8fb   :  { %4066 = vrcp.f32 %v1491_v62 }
 0x8fc   :  { %v5066_v56 = vpack.c.b16 %v1923_v6, %v1922_v50  ;;  %v1518_v44 = vpack.c.bf16 %v1512_v3, %v1511_v60 }
 0x8fe   :  { %3766 = vmatmul.msk.bf16.gmra.mxu1 %vm522_vm2, %v1518_v44  ;;  %3806 = vmatmul.msk.bf16.gmra.mxu3 %vm118_vm0, %v5066_v56  ;;  %v1966_v41 = vsel %vm118_vm0, %v5066_v56, 0 }
 0x8ff   :  { %2149 = vmatpush.bf16.xpose.msrb.mxu2 %v1966_v41 }
 0x901   :  { %v4067_v45 = vpop.eup %4066 }
 0x902   :  { %v1494_v47 = vpop.xlane.xlu1 %1493  ;;  %v1513_v11 = vmul.f32 %v4067_v45, %v4992_v16 }
 0x903   :  { %4068 = vrcp.f32 %v1494_v47 }
 0x909   :  { %v4069_v12 = vpop.eup %4068 }
 0x90a   :  { %v1514_v13 = vmul.f32 %v4069_v12, %v4996_v21  ;;  %v1626_v14 = vpop.xlane.xlu1 %1625  ;;  %v1497_v9 = vpop.xlane.xlu2 %1496 }
 0x90b   :  { %v1648_v17 = vsub.f32 %v4969_v42, %v1626_v14 }
 0x90c   :  { %v1519_v20 = vpack.c.bf16 %v1514_v13, %v1513_v11 }
 0x90d   :  { %v1656_v34 = vmul.f32 1.442695, %v1648_v17 }
 0x90e   :  { %3767 = vmatmul.msk.bf16.gmra.mxu1 %vm522_vm2, %v1519_v20 }
 0x90f   :  { %4070 = vpow2.f32 %v1656_v34 }
 0x910   :  { %4072 = vrcp.f32 %v1497_v9 }
 0x912   :  { %v1500_v33 = vpop.xlane.xlu0 %1499  ;;  %v1629_v36 = vpop.xlane.xlu2 %1628 }
 0x913   :  { %4074 = vrcp.f32 %v1500_v33  ;;  %v1635_v16 = vpop.xlane.xlu1 %1634  ;;  %v1649_v21 = vsub.f32 %v4977_v52, %v1629_v36  ;;  %v3931_v33 = vld [vmem:[%s5932_s2 + $0x70] sm:$0xff] }
 0x914   :  { %v1651_v10 = vsub.f32 %v4990_v4, %v1635_v16  ;;  %1809 = vmatpush.bf16.msra.mxu1 %v3931_v33 }
 0x915   :  { %v5082_v42 = vpop.eup %4070  ;;  %v1658_v7 = vmul.f32 1.442695, %v1649_v21 }
 0x916   :  { %v1662_v63 = vmul.f32 1.442695, %v1651_v10  ;;  %v1672_v39 = vsel %vm522_vm2, %v5082_v42, 0.0  ;;  %v4073_v28 = vpop.eup %4072 }
 0x917   :  { %4076 = vpow2.f32 %v1658_v7  ;;  %1673 = vadd.xlane.f32.xlu0 %v1672_v39  ;;  %v1515_v25 = vmul.f32 %v4073_v28, %v5003_v5 }
 0x918   :  { %4078 = vpow2.f32 %v1662_v63 }
 0x919   :  { %v4075_v48 = vpop.eup %4074 }
 0x91a   :  { %v1516_v51 = vmul.f32 %v4075_v48, %v5011_v18  ;;  %v1632_v52 = vpop.xlane.xlu0 %1631  ;;  %v1638_v57 = vpop.xlane.xlu2 %1637 }
 0x91b   :  { %v1650_v4 = vsub.f32 %v4984_v61, %v1632_v52  ;;  %v1644_v43 = vpop.xlane.xlu1 %1643  ;;  %v1652_v37 = vsub.f32 %v4998_v8, %v1638_v57 }
 0x91c   :  { %v1654_v60 = vsub.f32 %v5019_v58, %v1644_v43  ;;  %v1520_v50 = vpack.c.bf16 %v1516_v51, %v1515_v25 }
 0x91d   :  { %v5091_v3 = vpop.eup %4076  ;;  %v1660_v6 = vmul.f32 1.442695, %v1650_v4  ;;  %v1664_v44 = vmul.f32 1.442695, %v1652_v37 }
 0x91e   :  { %v5093_v62 = vpop.eup %4078  ;;  %v1668_v41 = vmul.f32 1.442695, %v1654_v60  ;;  %3768 = vmatmul.msk.bf16.gmra.mxu1 %vm522_vm2, %v1520_v50  ;;  %v1675_v5 = vsel %vm522_vm2, %v5091_v3, 0.0 }
 0x91f   :  { %4080 = vpow2.f32 %v1660_v6  ;;  %v1681_v61 = vsel %vm522_vm2, %v5093_v62, 0.0  ;;  %1676 = vadd.xlane.f32.xlu1 %v1675_v5 }
 0x920   :  { %4082 = vpow2.f32 %v1668_v41  ;;  %1682 = vadd.xlane.f32.xlu0 %v1681_v61 }
 0x921   :  { %4084 = vpow2.f32 %v1664_v44 }
 0x922   :  { %v1641_v8 = vpop.xlane.xlu0 %1640  ;;  %v1647_v18 = vpop.xlane.xlu2 %1646 }
 0x923   :  { %v1653_v58 = vsub.f32 %v5009_v49, %v1641_v8  ;;  %v1655_v47 = vsub.f32 %v5027_v31, %v1647_v18 }
 0x925   :  { %v5102_v45 = vpop.eup %4080  ;;  %v1666_v12 = vmul.f32 1.442695, %v1653_v58  ;;  %v1670_v11 = vmul.f32 1.442695, %v1655_v47 }
 0x926   :  { %v5104_v13 = vpop.eup %4082  ;;  %v1678_v14 = vsel %vm522_vm2, %v5102_v45, 0.0 }
 0x927   :  { %v5108_v9 = vpop.eup %4084  ;;  %4086 = vpow2.f32 %v1666_v12  ;;  %1679 = vadd.xlane.f32.xlu2 %v1678_v14  ;;  %v1690_v17 = vsel %vm522_vm2, %v5104_v13, 0.0 }
 0x928   :  { %4088 = vpow2.f32 %v1670_v11  ;;  %1691 = vadd.xlane.f32.xlu0 %v1690_v17  ;;  %v1684_v49 = vsel %vm522_vm2, %v5108_v9, 0.0 }
 0x929   :  { %1685 = vadd.xlane.f32.xlu1 %v1684_v49 }
 0x92d   :  { %v5114_v31 = vpop.eup %4086 }
 0x92e   :  { %v5116_v20 = vpop.eup %4088  ;;  %v1687_v34 = vsel %vm522_vm2, %v5114_v31, 0.0 }
 0x92f   :  { %1688 = vadd.xlane.f32.xlu2 %v1687_v34  ;;  %v1693_v1 = vsel %vm522_vm2, %v5116_v20, 0.0 }
 0x931   :  { %1694 = vadd.xlane.f32.xlu1 %v1693_v1 }
 0x96b   :  { %v1543_v36 = vpop.f32.mrf.mxu1 }
 0x971   :  { %v2001_v16 = vpop.f32.mrf.mxu3 }
 0x972   :  { %v2051_v7 = vpack.c.bf16 %v2001_v16, %v2001_v16 }
 0x973   :  { %v1545_v21 = vpop.f32.mrf.mxu1 }
 0x974   :  { %v1758_v10 = vpack.c.bf16 %v1545_v21, %v1543_v36  ;;  %v2073_v48 = vunpack.c.l.b16 %v2051_v7 }
 0x976   :  { %3785 = vmatmul.msk.bf16.vlgmr.msra.gmra.mxu1 %vm118_vm0, %v1758_v10 }
 0x979   :  { %v2003_v63 = vpop.f32.mrf.mxu3 }
 0x97a   :  { %v2052_v39 = vpack.c.bf16 %v2003_v63, %v2003_v63 }
 0x97b   :  { %v1548_v28 = vpop.f32.mrf.mxu1 }
 0x97c   :  { %v2074_v25 = vunpack.c.l.b16 %v2052_v39 }
 0x97e   :  { %v2075_v51 = vpack.c.b16 %v2074_v25, %v2073_v48 }
 0x980   :  { %3815 = vmatmul.msk.bf16.vlgmr.msra.gmra.mxu2 %vm118_vm0, %v2075_v51 }
 0x981   :  { %v2006_v52 = vpop.f32.mrf.mxu3 }
 0x982   :  { %v2053_v43 = vpack.c.bf16 %v2006_v52, %v2006_v52 }
 0x983   :  { %v1550_v57 = vpop.f32.mrf.mxu1 }
 0x984   :  { %v1759_v4 = vpack.c.bf16 %v1550_v57, %v1548_v28  ;;  %v2136_v6 = vunpack.c.l.b16 %v2053_v43 }
 0x986   :  { %3786 = vmatmul.msk.bf16.gmra.mxu1 %vm118_vm0, %v1759_v4 }
 0x989   :  { %v2008_v37 = vpop.f32.mrf.mxu3 }
 0x98a   :  { %v2054_v60 = vpack.c.bf16 %v2008_v37, %v2008_v37  ;;  %v1674_v5 = vpop.xlane.xlu0 %1673 }
 0x98b   :  { %v1553_v50 = vpop.f32.mrf.mxu1  ;;  %4090 = vrcp.f32 %v1674_v5 }
 0x98c   :  { %v2137_v44 = vunpack.c.l.b16 %v2054_v60 }
 0x98e   :  { %v2138_v41 = vpack.c.b16 %v2137_v44, %v2136_v6 }
 0x990   :  { %3817 = vmatmul.msk.bf16.vlgmr.msrb.gmra.mxu2 %vm118_vm0, %v2138_v41 }
 0x991   :  { %v4091_v58 = vpop.eup %4090 }
 0x992   :  { %v1677_v61 = vpop.xlane.xlu1 %1676  ;;  %v1704_v12 = vmul.f32 %v4091_v58, %v5082_v42 }
 0x993   :  { %4092 = vrcp.f32 %v1677_v61  ;;  %v1555_v8 = vpop.f32.mrf.mxu1  ;;  %v1683_v34 = vpop.xlane.xlu0 %1682 }
 0x994   :  { %v1760_v18 = vpack.c.bf16 %v1555_v8, %v1553_v50 }
 0x996   :  { %3787 = vmatmul.msk.bf16.gmra.mxu1 %vm118_vm0, %v1760_v18 }
 0x999   :  { %v4093_v47 = vpop.eup %4092 }
 0x99a   :  { %v1705_v11 = vmul.f32 %v4093_v47, %v5091_v3  ;;  %v1680_v49 = vpop.xlane.xlu2 %1679 }
 0x99b   :  { %v1558_v14 = vpop.f32.mrf.mxu1  ;;  %4094 = vrcp.f32 %v1680_v49  ;;  %v1692_v51 = vpop.xlane.xlu0 %1691 }
 0x99c   :  { %v1712_v17 = vpack.c.bf16 %v1705_v11, %v1704_v12  ;;  %4096 = vrcp.f32 %v1683_v34  ;;  %v1686_v7 = vpop.xlane.xlu1 %1685 }
 0x99e   :  { %3773 = vmatmul.msk.bf16.vlgmr.msra.gmra.mxu0 %vm522_vm2, %v1712_v17 }
 0x99f   :  { %2190 = vmatpush.bf16.msra.mxu0 %v5066_v56 }
 0x9a1   :  { %v4095_v36 = vpop.eup %4094 }
 0x9a2   :  { %v4097_v16 = vpop.eup %4096  ;;  %v1706_v42 = vmul.f32 %v4095_v36, %v5102_v45  ;;  %v1689_v21 = vpop.xlane.xlu2 %1688 }
 0x9a3   :  { %v1560_v1 = vpop.f32.mrf.mxu1  ;;  %v1707_v3 = vmul.f32 %v4097_v16, %v5093_v62  ;;  %4098 = vrcp.f32 %v1689_v21 }
 0x9a4   :  { %v1761_v33 = vpack.c.bf16 %v1560_v1, %v1558_v14  ;;  %4100 = vrcp.f32 %v1686_v7  ;;  %v1695_v48 = vpop.xlane.xlu1 %1694 }
 0x9a5   :  { %v1713_v10 = vpack.c.bf16 %v1707_v3, %v1706_v42  ;;  %4102 = vrcp.f32 %v1695_v48 }
 0x9a6   :  { %3788 = vmatmul.msk.bf16.gmra.mxu1 %vm118_vm0, %v1761_v33  ;;  %4104 = vrcp.f32 %v1692_v51 }
 0x9a9   :  { %v4099_v63 = vpop.eup %4098 }
 0x9aa   :  { %v4101_v56 = vpop.eup %4100  ;;  %v1709_v39 = vmul.f32 %v4099_v63, %v5114_v31 }
 0x9ab   :  { %v1708_v28 = vmul.f32 %v4101_v56, %v5108_v9  ;;  %v4103_v62 = vpop.eup %4102 }
 0x9ac   :  { %v4105_v45 = vpop.eup %4104  ;;  %v1711_v52 = vmul.f32 %v4103_v62, %v5116_v20 }
 0x9ad   :  { %v1714_v25 = vpack.c.bf16 %v1709_v39, %v1708_v28  ;;  %v1710_v57 = vmul.f32 %v4105_v45, %v5104_v13 }
 0x9ae   :  { %3774 = vmatmul.msk.bf16.gmra.mxu0 %vm522_vm2, %v1713_v10 }
 0x9af   :  { %v1715_v4 = vpack.c.bf16 %v1711_v52, %v1710_v57 }
 0x9be   :  { %3775 = vmatmul.msk.bf16.gmra.mxu0 %vm522_vm2, %v1714_v25 }
 0x9ce   :  { %3776 = vmatmul.msk.bf16.gmra.mxu0 %vm522_vm2, %v1715_v4 }
 0x9f3   :  { %v1811_v43 = vpop.f32.mrf.mxu1 }
 0x9f4   :  { %v5145_v31 = vadd.f32 %v1811_v43, %v4789_v53 }
 0x9f6   :  { %v1884_v37 = vpack.c.bf16 %v5145_v31, %v5145_v31 }
 0x9f8   :  { %v1924_v20 = vunpack.c.l.b16 %v1884_v37 }
 0x9fb   :  { %v1813_v9 = vpop.f32.mrf.mxu1 }
 0x9fc   :  { %v5150_v60 = vadd.f32 %v1813_v9, %v4780_v24 }
 0x9fe   :  { %v1885_v50 = vpack.c.bf16 %v5150_v60, %v5150_v60 }
 0xa00   :  { %v1925_v6 = vunpack.c.l.b16 %v1885_v50 }
 0xa02   :  { %v5154_v13 = vpack.c.b16 %v1925_v6, %v1924_v20 }
 0xa03   :  { %v1816_v44 = vpop.f32.mrf.mxu1  ;;  %v5156_v41 = vpop.f32.mrf.mxu2 }
 0xa04   :  { %3807 = vmatmul.msk.bf16.gmra.mxu3 %vm118_vm0, %v5154_v13  ;;  %v2093_v53 = vsel %vm522_vm2, %v5156_v41, -inf  ;;  %v5163_v24 = vadd.f32 %v1816_v44, %v4772_v23  ;;  %v1969_v6 = vsel %vm118_vm0, %v5154_v13, 0 }
 0xa05   :  { %2094 = vmax.xlane.f32.xlu2 %v2093_v53 }
 0xa06   :  { %v1886_v8 = vpack.c.bf16 %v5163_v24, %v5163_v24 }
 0xa08   :  { %v1926_v12 = vunpack.c.l.b16 %v1886_v8 }
 0xa0b   :  { %v1818_v5 = vpop.f32.mrf.mxu1  ;;  %v5165_v61 = vpop.f32.mrf.mxu2 }
 0xa0c   :  { %v5170_v18 = vadd.f32 %v1818_v5, %v4763_v40  ;;  %v2096_v58 = vsel %vm522_vm2, %v5165_v61, -inf }
 0xa0d   :  { %2097 = vmax.xlane.f32.xlu0 %v2096_v58 }
 0xa0e   :  { %v1887_v47 = vpack.c.bf16 %v5170_v18, %v5170_v18 }
 0xa10   :  { %v1927_v11 = vunpack.c.l.b16 %v1887_v47 }
 0xa12   :  { %v5176_v23 = vpack.c.b16 %v1927_v11, %v1926_v12 }
 0xa13   :  { %v1821_v14 = vpop.f32.mrf.mxu1  ;;  %v5178_v17 = vpop.f32.mrf.mxu2 }
 0xa14   :  { %3808 = vmatmul.msk.bf16.gmra.mxu3 %vm118_vm0, %v5176_v23  ;;  %v2156_v40 = vsel %vm522_vm2, %v5178_v17, -inf  ;;  %v5185_v49 = vadd.f32 %v1821_v14, %v4751_v30  ;;  %v1972_v50 = vsel %vm118_vm0, %v5176_v23, 0 }
 0xa15   :  { %2157 = vmax.xlane.f32.xlu1 %v2156_v40 }
 0xa16   :  { %v1888_v33 = vpack.c.bf16 %v5185_v49, %v5185_v49 }
 0xa18   :  { %v1928_v21 = vunpack.c.l.b16 %v1888_v33 }
 0xa1b   :  { %v1738_v34 = vpop.f32.mrf.mxu0  ;;  %v1823_v1 = vpop.f32.mrf.mxu1 }
 0xa1c   :  { %v5190_v36 = vadd.f32 %v1823_v1, %v4746_v26  ;;  %v5192_v16 = vpop.f32.mrf.mxu2 }
 0xa1d   :  { %v2159_v42 = vsel %vm522_vm2, %v5192_v16, -inf }
 0xa1e   :  { %v1889_v3 = vpack.c.bf16 %v5190_v36, %v5190_v36  ;;  %2160 = vmax.xlane.f32.xlu2 %v2159_v42 }
 0xa20   :  { %v1929_v30 = vunpack.c.l.b16 %v1889_v3 }
 0xa22   :  { %v5198_v10 = vpack.c.b16 %v1929_v30, %v1928_v21 }
 0xa23   :  { %v1740_v7 = vpop.f32.mrf.mxu0  ;;  %v1826_v63 = vpop.f32.mrf.mxu1 }
 0xa24   :  { %v1762_v56 = vpack.c.bf16 %v1740_v7, %v1738_v34  ;;  %3809 = vmatmul.msk.bf16.gmra.mxu3 %vm118_vm0, %v5198_v10  ;;  %v5204_v26 = vadd.f32 %v1826_v63, %v4741_v15  ;;  %v1975_v43 = vsel %vm118_vm0, %v5198_v10, 0 }
 0xa26   :  { %3789 = vmatmul.msk.bf16.gmra.mxu1 %vm118_vm0, %v1762_v56  ;;  %v1890_v48 = vpack.c.bf16 %v5204_v26, %v5204_v26 }
 0xa28   :  { %v1930_v62 = vunpack.c.l.b16 %v1890_v48 }
 0xa2b   :  { %v1743_v39 = vpop.f32.mrf.mxu0  ;;  %v1828_v28 = vpop.f32.mrf.mxu1 }
 0xa2c   :  { %v5209_v25 = vadd.f32 %v1828_v28, %v4758_v35 }
 0xa2e   :  { %v1891_v51 = vpack.c.bf16 %v5209_v25, %v5209_v25 }
 0xa30   :  { %v1931_v45 = vunpack.c.l.b16 %v1891_v51 }
 0xa32   :  { %v5213_v52 = vpack.c.b16 %v1931_v45, %v1930_v62 }
 0xa33   :  { %v1745_v57 = vpop.f32.mrf.mxu0 }
 0xa34   :  { %v1763_v4 = vpack.c.bf16 %v1745_v57, %v1743_v39  ;;  %3810 = vmatmul.msk.bf16.gmra.mxu3 %vm118_vm0, %v5213_v52  ;;  %v1978_v15 = vsel %vm118_vm0, %v5213_v52, 0 }
 0xa35   :  { %2233 = vmatpush.bf16.xpose.msra.mxu2 %v1978_v15 }
 0xa36   :  { %3790 = vmatmul.msk.bf16.gmra.mxu1 %vm118_vm0, %v1763_v4 }
 0xa3b   :  { %v1748_v35 = vpop.f32.mrf.mxu0 }
 0xa3d   :  { %2234 = vmatpush.bf16.xpose.msra.mxu2 %v1975_v43 }
 0xa43   :  { %v1750_v9 = vpop.f32.mrf.mxu0 }
 0xa44   :  { %v1764_v37 = vpack.c.bf16 %v1750_v9, %v1748_v35 }
 0xa45   :  { %2235 = vmatpush.bf16.xpose.msra.mxu2 %v1972_v50 }
 0xa46   :  { %3791 = vmatmul.msk.bf16.gmra.mxu1 %vm118_vm0, %v1764_v37 }
 0xa4b   :  { %v1753_v20 = vpop.f32.mrf.mxu0 }
 0xa4d   :  { %2236 = vmatpush.bf16.xpose.msra.mxu2 %v1969_v6 }
 0xa53   :  { %v1755_v44 = vpop.f32.mrf.mxu0 }
 0xa54   :  { %v1765_v53 = vpack.c.bf16 %v1755_v44, %v1753_v20 }
 0xa56   :  { %3792 = vmatmul.msk.bf16.gmra.mxu1 %vm118_vm0, %v1765_v53 }
 0xa87   :  { %v2011_v5 = vpop.f32.mrf.mxu3 }
 0xa88   :  { %v2055_v8 = vpack.c.bf16 %v2011_v5, %v2011_v5 }
 0xa8a   :  { %v2205_v12 = vunpack.c.l.b16 %v2055_v8 }
 0xa8f   :  { %v2013_v58 = vpop.f32.mrf.mxu3 }
 0xa90   :  { %v2056_v47 = vpack.c.bf16 %v2013_v58, %v2013_v58 }
 0xa92   :  { %v2206_v11 = vunpack.c.l.b16 %v2056_v47 }
 0xa94   :  { %v2213_v14 = vpack.c.b16 %v2206_v11, %v2205_v12 }
 0xa96   :  { %3819 = vmatmul.msk.bf16.vlgmr.msra.gmra.mxu2 %vm118_vm0, %v2213_v14 }
 0xa97   :  { %v2016_v40 = vpop.f32.mrf.mxu3 }
 0xa98   :  { %v2057_v34 = vpack.c.bf16 %v2016_v40, %v2016_v40 }
 0xa9a   :  { %v2207_v42 = vunpack.c.l.b16 %v2057_v34 }
 0xa9f   :  { %v2018_v1 = vpop.f32.mrf.mxu3 }
 0xaa0   :  { %v2058_v33 = vpack.c.bf16 %v2018_v1, %v2018_v1 }
 0xaa2   :  { %v2208_v3 = vunpack.c.l.b16 %v2058_v33 }
 0xaa3   :  { %v1831_v21 = vpop.f32.mrf.mxu1 }
 0xaa4   :  { %v2214_v30 = vpack.c.b16 %v2208_v3, %v2207_v42  ;;  %v5231_v63 = vadd.f32 %v1831_v21, %v4864_v55 }
 0xaa6   :  { %3820 = vmatmul.msk.bf16.gmra.mxu2 %vm118_vm0, %v2214_v30  ;;  %v1892_v39 = vpack.c.bf16 %v5231_v63, %v5231_v63 }
 0xaa7   :  { %v2021_v7 = vpop.f32.mrf.mxu3 }
 0xaa8   :  { %v2059_v48 = vpack.c.bf16 %v2021_v7, %v2021_v7  ;;  %v1932_v45 = vunpack.c.l.b16 %v1892_v39 }
 0xaaa   :  { %v2209_v15 = vunpack.c.l.b16 %v2059_v48 }
 0xaab   :  { %v1833_v56 = vpop.f32.mrf.mxu1 }
 0xaac   :  { %v5236_v28 = vadd.f32 %v1833_v56, %v4857_v54 }
 0xaae   :  { %v1893_v51 = vpack.c.bf16 %v5236_v28, %v5236_v28 }
 0xaaf   :  { %v2023_v62 = vpop.f32.mrf.mxu3 }
 0xab0   :  { %v1933_v57 = vunpack.c.l.b16 %v1893_v51  ;;  %v2060_v4 = vpack.c.bf16 %v2023_v62, %v2023_v62 }
 0xab2   :  { %v5240_v35 = vpack.c.b16 %v1933_v57, %v1932_v45  ;;  %v2210_v55 = vunpack.c.l.b16 %v2060_v4 }
 0xab3   :  { %v1836_v43 = vpop.f32.mrf.mxu1 }
 0xab4   :  { %v2215_v9 = vpack.c.b16 %v2210_v55, %v2209_v15  ;;  %3811 = vmatmul.msk.bf16.gmra.mxu3 %vm118_vm0, %v5240_v35  ;;  %v5246_v37 = vadd.f32 %v1836_v43, %v4850_v27  ;;  %v1981_v4 = vsel %vm118_vm0, %v5240_v35, 0  ;;  %v2095_v15 = vpop.xlane.xlu2 %2094 }
 0xab5   :  { %v2099_v55 = vsub.f32 %v5156_v41, %v2095_v15 }
 0xab6   :  { %3821 = vmatmul.msk.bf16.gmra.mxu2 %vm118_vm0, %v2215_v9  ;;  %v1894_v20 = vpack.c.bf16 %v5246_v37, %v5246_v37 }
 0xab7   :  { %v2026_v54 = vpop.f32.mrf.mxu3 }
 0xab8   :  { %v2061_v44 = vpack.c.bf16 %v2026_v54, %v2026_v54  ;;  %v1934_v8 = vunpack.c.l.b16 %v1894_v20  ;;  %v2101_v54 = vmul.f32 1.442695, %v2099_v55 }
 0xaba   :  { %v2211_v12 = vunpack.c.l.b16 %v2061_v44  ;;  %4106 = vpow2.f32 %v2101_v54 }
 0xabb   :  { %v1838_v50 = vpop.f32.mrf.mxu1 }
 0xabc   :  { %v5251_v6 = vadd.f32 %v1838_v50, %v4841_v46  ;;  %v2098_v50 = vpop.xlane.xlu0 %2097 }
 0xabd   :  { %v2100_v20 = vsub.f32 %v5165_v61, %v2098_v50 }
 0xabe   :  { %v1895_v53 = vpack.c.bf16 %v5251_v6, %v5251_v6 }
 0xabf   :  { %v2028_v5 = vpop.f32.mrf.mxu3 }
 0xac0   :  { %v1935_v58 = vunpack.c.l.b16 %v1895_v53  ;;  %v2062_v47 = vpack.c.bf16 %v2028_v5, %v2028_v5  ;;  %v2103_v5 = vmul.f32 1.442695, %v2100_v20  ;;  %v5306_v41 = vpop.eup %4106 }
 0xac1   :  { %v2105_v61 = vsel %vm522_vm2, %v5306_v41, 0.0 }
 0xac2   :  { %v5255_v11 = vpack.c.b16 %v1935_v58, %v1934_v8  ;;  %v2212_v27 = vunpack.c.l.b16 %v2062_v47  ;;  %v2158_v8 = vpop.xlane.xlu1 %2157  ;;  %4108 = vpow2.f32 %v2103_v5 }
 0xac3   :  { %v1841_v14 = vpop.f32.mrf.mxu1  ;;  %v2162_v58 = vsub.f32 %v5178_v17, %v2158_v8 }
 0xac4   :  { %v2216_v40 = vpack.c.b16 %v2212_v27, %v2211_v12  ;;  %3812 = vmatmul.msk.bf16.gmra.mxu3 %vm118_vm0, %v5255_v11  ;;  %v5261_v46 = vadd.f32 %v1841_v14, %v4829_v32  ;;  %v2161_v14 = vpop.xlane.xlu2 %2160 }
 0xac5   :  { %v2164_v27 = vmul.f32 1.442695, %v2162_v58 }
 0xac6   :  { %3822 = vmatmul.msk.bf16.gmra.mxu2 %vm118_vm0, %v2216_v40  ;;  %v1896_v1 = vpack.c.bf16 %v5261_v46, %v5261_v46 }
 0xac7   :  { %4110 = vpow2.f32 %v2164_v27 }
 0xac8   :  { %v1936_v3 = vunpack.c.l.b16 %v1896_v1  ;;  %v5315_v40 = vpop.eup %4108 }
 0xac9   :  { %v2108_v17 = vsel %vm522_vm2, %v5315_v40, 0.0 }
 0xacb   :  { %v1843_v34 = vpop.f32.mrf.mxu1 }
 0xacc   :  { %v5266_v33 = vadd.f32 %v1843_v34, %v4824_v29  ;;  %v2163_v34 = vsub.f32 %v5192_v16, %v2161_v14 }
 0xace   :  { %v1897_v42 = vpack.c.bf16 %v5266_v33, %v5266_v33 }
 0xad0   :  { %v1937_v21 = vunpack.c.l.b16 %v1897_v42 }
 0xad2   :  { %v5270_v30 = vpack.c.b16 %v1937_v21, %v1936_v3  ;;  %v2166_v3 = vmul.f32 1.442695, %v2163_v34  ;;  %v5324_v21 = vpop.eup %4110 }
 0xad3   :  { %v1846_v7 = vpop.f32.mrf.mxu1 }
 0xad4   :  { %3813 = vmatmul.msk.bf16.gmra.mxu3 %vm118_vm0, %v5270_v30  ;;  %v5275_v32 = vadd.f32 %v1846_v7, %v4819_v0  ;;  %v1987_v57 = vsel %vm118_vm0, %v5270_v30, 0  ;;  %4112 = vpow2.f32 %v2166_v3 }
 0xad6   :  { %v1898_v39 = vpack.c.bf16 %v5275_v32, %v5275_v32 }
 0xad8   :  { %v1938_v51 = vunpack.c.l.b16 %v1898_v39  ;;  %v2168_v39 = vsel %vm522_vm2, %v5324_v21, 0.0 }
 0xadb   :  { %v1848_v56 = vpop.f32.mrf.mxu1 }
 0xadc   :  { %v5280_v29 = vadd.f32 %v1848_v56, %v4836_v19  ;;  %v1984_v19 = vsel %vm118_vm0, %v5255_v11, 0 }
 0xade   :  { %v1899_v48 = vpack.c.bf16 %v5280_v29, %v5280_v29 }
 0xae0   :  { %v1939_v62 = vunpack.c.l.b16 %v1899_v48 }
 0xae2   :  { %v5284_v45 = vpack.c.b16 %v1939_v62, %v1938_v51  ;;  %v5332_v51 = vpop.eup %4112 }
 0xae3   :  { %v2171_v55 = vsel %vm522_vm2, %v5332_v51, 0.0 }
 0xae4   :  { %3814 = vmatmul.msk.bf16.gmra.mxu3 %vm118_vm0, %v5284_v45  ;;  %v1990_v0 = vsel %vm118_vm0, %v5284_v45, 0 }
 0xae5   :  { %2431 = vmatpush.bf16.xpose.msrb.mxu1 %v1990_v0 }
 0xaed   :  { %2432 = vmatpush.bf16.xpose.msrb.mxu1 %v1987_v57 }
 0xaf5   :  { %2433 = vmatpush.bf16.xpose.msrb.mxu1 %v1984_v19 }
 0xafd   :  { %2434 = vmatpush.bf16.xpose.msrb.mxu1 %v1981_v4 }
 0xb19   :  { %v5297_v43 = vpop.f32.mrf.mxu2 }
 0xb1a   :  { %v2258_v9 = vsel %vm202_vm1, %v5297_v43, -inf }
 0xb1b   :  { %2259 = vmax.xlane.f32.xlu0 %v2258_v9 }
 0xb21   :  { %v5302_v44 = vpop.f32.mrf.mxu2 }
 0xb22   :  { %v2261_v53 = vsel %vm202_vm1, %v5302_v44, -inf }
 0xb23   :  { %2262 = vmax.xlane.f32.xlu1 %v2261_v53 }
 0xb29   :  { %v5309_v47 = vpop.f32.mrf.mxu2 }
 0xb2a   :  { %v2264_v12 = vsel %vm202_vm1, %v5309_v47, -inf }
 0xb2b   :  { %2265 = vmax.xlane.f32.xlu2 %v2264_v12  ;;  %2106 = vadd.xlane.f32.xlu1 %v2105_v61 }
 0xb31   :  { %v5318_v1 = vpop.f32.mrf.mxu2 }
 0xb32   :  { %v2267_v42 = vsel %vm202_vm1, %v5318_v1, -inf }
 0xb33   :  { %2109 = vadd.xlane.f32.xlu2 %v2108_v17  ;;  %2268 = vmax.xlane.f32.xlu0 %v2267_v42 }
 0xb37   :  { %v2031_v7 = vpop.f32.mrf.mxu3 }
 0xb38   :  { %v2063_v48 = vpack.c.bf16 %v2031_v7, %v2031_v7 }
 0xb39   :  { %v5326_v56 = vpop.f32.mrf.mxu2 }
 0xb3a   :  { %v2270_v16 = vsel %vm202_vm1, %v5326_v56, -inf  ;;  %v2403_v19 = vunpack.c.l.b16 %v2063_v48 }
 0xb3b   :  { %2271 = vmax.xlane.f32.xlu0 %v2270_v16  ;;  %2169 = vadd.xlane.f32.xlu2 %v2168_v39 }
 0xb3f   :  { %v2033_v62 = vpop.f32.mrf.mxu3 }
 0xb40   :  { %v2064_v0 = vpack.c.bf16 %v2033_v62, %v2033_v62 }
 0xb41   :  { %v5334_v57 = vpop.f32.mrf.mxu2 }
 0xb42   :  { %v2404_v4 = vunpack.c.l.b16 %v2064_v0  ;;  %v2273_v15 = vsel %vm202_vm1, %v5334_v57, -inf }
 0xb43   :  { %2274 = vmax.xlane.f32.xlu1 %v2273_v15  ;;  %2172 = vadd.xlane.f32.xlu0 %v2171_v55 }
 0xb44   :  { %v2411_v9 = vpack.c.b16 %v2404_v4, %v2403_v19 }
 0xb46   :  { %3827 = vmatmul.msk.bf16.vlgmr.msrb.gmra.mxu1 %vm118_vm0, %v2411_v9 }
 0xb47   :  { %v2036_v54 = vpop.f32.mrf.mxu3 }
 0xb48   :  { %v2065_v53 = vpack.c.bf16 %v2036_v54, %v2036_v54 }
 0xb49   :  { %v5341_v50 = vpop.f32.mrf.mxu2 }
 0xb4a   :  { %v2276_v20 = vsel %vm202_vm1, %v5341_v50, -inf  ;;  %v2405_v12 = vunpack.c.l.b16 %v2065_v53 }
 0xb4b   :  { %2277 = vmax.xlane.f32.xlu1 %v2276_v20 }
 0xb4f   :  { %v2038_v5 = vpop.f32.mrf.mxu3 }
 0xb50   :  { %v2066_v8 = vpack.c.bf16 %v2038_v5, %v2038_v5 }
 0xb51   :  { %v5345_v58 = vpop.f32.mrf.mxu2 }
 0xb52   :  { %v2406_v61 = vunpack.c.l.b16 %v2066_v8  ;;  %v2279_v27 = vsel %vm202_vm1, %v5345_v58, -inf }
 0xb53   :  { %2280 = vmax.xlane.f32.xlu2 %v2279_v27 }
 0xb54   :  { %v2412_v14 = vpack.c.b16 %v2406_v61, %v2405_v12 }
 0xb56   :  { %3828 = vmatmul.msk.bf16.gmra.mxu1 %vm118_vm0, %v2412_v14 }
 0xb57   :  { %v2041_v34 = vpop.f32.mrf.mxu3 }
 0xb58   :  { %v2067_v17 = vpack.c.bf16 %v2041_v34, %v2041_v34 }
 0xb5a   :  { %v2407_v7 = vunpack.c.l.b16 %v2067_v17 }
 0xb5f   :  { %v2043_v42 = vpop.f32.mrf.mxu3 }
 0xb60   :  { %v2068_v3 = vpack.c.bf16 %v2043_v42, %v2043_v42 }
 0xb62   :  { %v2408_v16 = vunpack.c.l.b16 %v2068_v3 }
 0xb64   :  { %v2413_v39 = vpack.c.b16 %v2408_v16, %v2407_v7 }
 0xb66   :  { %3829 = vmatmul.msk.bf16.gmra.mxu1 %vm118_vm0, %v2413_v39 }
 0xb67   :  { %v2046_v48 = vpop.f32.mrf.mxu3 }
 0xb68   :  { %v2069_v62 = vpack.c.bf16 %v2046_v48, %v2046_v48 }
 0xb6a   :  { %v2409_v4 = vunpack.c.l.b16 %v2069_v62 }
 0xb6f   :  { %v2048_v0 = vpop.f32.mrf.mxu3 }
 0xb70   :  { %v2070_v19 = vpack.c.bf16 %v2048_v0, %v2048_v0 }
 0xb72   :  { %v2410_v15 = vunpack.c.l.b16 %v2070_v19 }
 0xb74   :  { %v2414_v55 = vpack.c.b16 %v2410_v15, %v2409_v4 }
 0xb76   :  { %3830 = vmatmul.msk.bf16.gmra.mxu1 %vm118_vm0, %v2414_v55 }
 0xb8e   :  { %v2260_v9 = vpop.xlane.xlu0 %2259 }
 0xb8f   :  { %v2282_v54 = vsub.f32 %v5297_v43, %v2260_v9 }
 0xb91   :  { %v2290_v20 = vmul.f32 1.442695, %v2282_v54 }
 0xb93   :  { %4114 = vpow2.f32 %v2290_v20 }
 0xb96   :  { %v2263_v53 = vpop.xlane.xlu1 %2262 }
 0xb97   :  { %v2283_v5 = vsub.f32 %v5302_v44, %v2263_v53 }
 0xb99   :  { %v5354_v8 = vpop.eup %4114  ;;  %v2292_v12 = vmul.f32 1.442695, %v2283_v5 }
 0xb9a   :  { %v2306_v61 = vsel %vm202_vm1, %v5354_v8, 0.0 }
 0xb9b   :  { %4116 = vpow2.f32 %v2292_v12  ;;  %2307 = vadd.xlane.f32.xlu0 %v2306_v61 }
 0xb9e   :  { %v2266_v27 = vpop.xlane.xlu2 %2265  ;;  %v2107_v43 = vpop.xlane.xlu1 %2106 }
 0xb9f   :  { %v2284_v14 = vsub.f32 %v5309_v47, %v2266_v27 }
 0xba1   :  { %v5359_v34 = vpop.eup %4116  ;;  %v2294_v17 = vmul.f32 1.442695, %v2284_v14 }
 0xba2   :  { %v2309_v42 = vsel %vm202_vm1, %v5359_v34, 0.0 }
 0xba3   :  { %4118 = vpow2.f32 %v2294_v17  ;;  %2310 = vadd.xlane.f32.xlu1 %v2309_v42 }
 0xba4   :  { %4120 = vrcp.f32 %v2107_v43 }
 0xba6   :  { %v2269_v44 = vpop.xlane.xlu0 %2268  ;;  %v2110_v3 = vpop.xlane.xlu2 %2109 }
 0xba7   :  { %v2285_v7 = vsub.f32 %v5318_v1, %v2269_v44  ;;  %4122 = vrcp.f32 %v2110_v3 }
 0xba9   :  { %v5364_v16 = vpop.eup %4118  ;;  %v2296_v39 = vmul.f32 1.442695, %v2285_v7 }
 0xbaa   :  { %v2312_v47 = vsel %vm202_vm1, %v5364_v16, 0.0  ;;  %v4121_v48 = vpop.eup %4120 }
 0xbab   :  { %4124 = vpow2.f32 %v2296_v39  ;;  %2313 = vadd.xlane.f32.xlu2 %v2312_v47  ;;  %v2113_v0 = vmul.f32 %v4121_v48, %v5306_v41 }
 0xbad   :  { %v4123_v62 = vpop.eup %4122 }
 0xbae   :  { %v2114_v19 = vmul.f32 %v4123_v62, %v5315_v40  ;;  %v2272_v4 = vpop.xlane.xlu0 %2271  ;;  %v2170_v54 = vpop.xlane.xlu2 %2169 }
 0xbaf   :  { %v2286_v15 = vsub.f32 %v5326_v56, %v2272_v4 }
 0xbb0   :  { %v2115_v55 = vpack.c.bf16 %v2114_v19, %v2113_v0 }
 0xbb1   :  { %v5371_v1 = vpop.eup %4124  ;;  %v2298_v9 = vmul.f32 1.442695, %v2286_v15 }
 0xbb2   :  { %3816 = vmatmul.msk.bf16.vlgmr.msrb.gmra.mxu0 %vm522_vm2, %v2115_v55  ;;  %v2315_v20 = vsel %vm202_vm1, %v5371_v1, 0.0 }
 0xbb3   :  { %4126 = vpow2.f32 %v2298_v9  ;;  %2370 = vmatpush.bf16.msrb.mxu0 %v5213_v52  ;;  %2316 = vadd.xlane.f32.xlu0 %v2315_v20  ;;  %v3936_v20 = vld [vmem:[%s5933_s3 + $0x18] sm:$0xff] }
 0xbb4   :  { %4128 = vrcp.f32 %v2170_v54  ;;  %2651 = vmatpush.bf16.msrb.mxu2 %v3936_v20 }
 0xbb6   :  { %v2275_v41 = vpop.xlane.xlu1 %2274  ;;  %v2173_v40 = vpop.xlane.xlu0 %2172 }
 0xbb7   :  { %v2287_v53 = vsub.f32 %v5334_v57, %v2275_v41  ;;  %4130 = vrcp.f32 %v2173_v40  ;;  %2371 = vmatpush.bf16.msrb.mxu0 %v5198_v10 }
 0xbb9   :  { %v5379_v56 = vpop.eup %4126  ;;  %v2300_v5 = vmul.f32 1.442695, %v2287_v53  ;;  %v3935_v53 = vld [vmem:[%s5933_s3 + $0x10] sm:$0xff] }
 0xbba   :  { %v2318_v12 = vsel %vm202_vm1, %v5379_v56, 0.0  ;;  %v4129_v61 = vpop.eup %4128  ;;  %2652 = vmatpush.bf16.msrb.mxu2 %v3935_v53 }
 0xbbb   :  { %4132 = vpow2.f32 %v2300_v5  ;;  %2372 = vmatpush.bf16.msrb.mxu0 %v5176_v23  ;;  %2319 = vadd.xlane.f32.xlu1 %v2318_v12  ;;  %v2176_v27 = vmul.f32 %v4129_v61, %v5324_v21 }
 0xbbd   :  { %v4131_v52 = vpop.eup %4130 }
 0xbbe   :  { %v2177_v14 = vmul.f32 %v4131_v52, %v5332_v51  ;;  %v2278_v57 = vpop.xlane.xlu1 %2277 }
 0xbbf   :  { %v2288_v17 = vsub.f32 %v5341_v50, %v2278_v57  ;;  %2373 = vmatpush.bf16.msrb.mxu0 %v5154_v13 }
 0xbc0   :  { %v2178_v10 = vpack.c.bf16 %v2177_v14, %v2176_v27 }
 0xbc1   :  { %v5388_v43 = vpop.eup %4132  ;;  %v2302_v42 = vmul.f32 1.442695, %v2288_v17 }
 0xbc2   :  { %3818 = vmatmul.msk.bf16.vlgmr.msra.gmra.mxu0 %vm522_vm2, %v2178_v10  ;;  %v2321_v23 = vsel %vm202_vm1, %v5388_v43, 0.0 }
 0xbc3   :  { %4134 = vpow2.f32 %v2302_v42  ;;  %2568 = vmatpush.bf16.msra.mxu0 %v5284_v45  ;;  %v5394_v21 = vpop.f32.mrf.mxu1  ;;  %2322 = vadd.xlane.f32.xlu2 %v2321_v23 }
 0xbc4   :  { %v2456_v45 = vsel %vm202_vm1, %v5394_v21, -inf }
 0xbc6   :  { %v2281_v51 = vpop.xlane.xlu2 %2280 }
 0xbc7   :  { %2569 = vmatpush.bf16.msra.mxu0 %v5270_v30  ;;  %v2289_v13 = vsub.f32 %v5345_v58, %v2281_v51 }
 0xbc9   :  { %v5398_v50 = vpop.eup %4134  ;;  %v2304_v44 = vmul.f32 1.442695, %v2289_v13 }
 0xbca   :  { %v2324_v3 = vsel %vm202_vm1, %v5398_v50, 0.0 }
 0xbcb   :  { %4136 = vpow2.f32 %v2304_v44  ;;  %2570 = vmatpush.bf16.msra.mxu0 %v5255_v11  ;;  %v5403_v7 = vpop.f32.mrf.mxu1  ;;  %2325 = vadd.xlane.f32.xlu0 %v2324_v3 }
 0xbcc   :  { %2457 = vmax.xlane.f32.xlu2 %v2456_v45  ;;  %v2459_v58 = vsel %vm202_vm1, %v5403_v7, -inf }
 0xbcf   :  { %2571 = vmatpush.bf16.msra.mxu0 %v5240_v35 }
 0xbd1   :  { %v5408_v30 = vpop.eup %4136 }
 0xbd2   :  { %v2327_v39 = vsel %vm202_vm1, %v5408_v30, 0.0 }
 0xbd3   :  { %v5414_v47 = vpop.f32.mrf.mxu1  ;;  %2460 = vmax.xlane.f32.xlu0 %v2459_v58  ;;  %2328 = vadd.xlane.f32.xlu1 %v2327_v39 }
 0xbd4   :  { %v2462_v11 = vsel %vm202_vm1, %v5414_v47, -inf }
 0xbdb   :  { %v5418_v48 = vpop.f32.mrf.mxu1  ;;  %2463 = vmax.xlane.f32.xlu1 %v2462_v11 }
 0xbdc   :  { %v2465_v35 = vsel %vm202_vm1, %v5418_v48, -inf }
 0xbdd   :  { %2466 = vmax.xlane.f32.xlu2 %v2465_v35 }
 0xbe3   :  { %v5422_v62 = vpop.f32.mrf.mxu1 }
 0xbe4   :  { %v2468_v0 = vsel %vm202_vm1, %v5422_v62, -inf }
 0xbe5   :  { %2469 = vmax.xlane.f32.xlu0 %v2468_v0 }
 0xbeb   :  { %v5426_v19 = vpop.f32.mrf.mxu1 }
 0xbec   :  { %v2471_v4 = vsel %vm202_vm1, %v5426_v19, -inf }
 0xbed   :  { %2472 = vmax.xlane.f32.xlu1 %v2471_v4 }
 0xbf3   :  { %v5430_v15 = vpop.f32.mrf.mxu1 }
 0xbf4   :  { %v2474_v55 = vsel %vm202_vm1, %v5430_v15, -inf }
 0xbf5   :  { %2475 = vmax.xlane.f32.xlu2 %v2474_v55 }
 0xbfb   :  { %v5434_v9 = vpop.f32.mrf.mxu1 }
 0xbfc   :  { %v2477_v54 = vsel %vm202_vm1, %v5434_v9, -inf }
 0xbfd   :  { %2478 = vmax.xlane.f32.xlu0 %v2477_v54 }
 0xc0e   :  { %v2308_v41 = vpop.xlane.xlu0 %2307 }
 0xc0f   :  { %4138 = vrcp.f32 %v2308_v41 }
 0xc15   :  { %v4139_v5 = vpop.eup %4138 }
 0xc16   :  { %v2311_v40 = vpop.xlane.xlu1 %2310  ;;  %v2338_v61 = vmul.f32 %v4139_v5, %v5354_v8 }
 0xc17   :  { %4140 = vrcp.f32 %v2311_v40 }
 0xc1d   :  { %v4141_v12 = vpop.eup %4140 }
 0xc1e   :  { %v2339_v52 = vmul.f32 %v4141_v12, %v5359_v34  ;;  %v2314_v14 = vpop.xlane.xlu2 %2313 }
 0xc1f   :  { %4142 = vrcp.f32 %v2314_v14 }
 0xc20   :  { %v2346_v27 = vpack.c.bf16 %v2339_v52, %v2338_v61 }
 0xc22   :  { %3823 = vmatmul.msk.bf16.vlgmr.msrb.gmra.mxu0 %vm202_vm1, %v2346_v27 }
 0xc25   :  { %v4143_v17 = vpop.eup %4142 }
 0xc26   :  { %v2317_v57 = vpop.xlane.xlu0 %2316  ;;  %v2340_v42 = vmul.f32 %v4143_v17, %v5364_v16  ;;  %v3938_v16 = vld [vmem:[%s5933_s3 + $0x28] sm:$0xff] }
 0xc27   :  { %4144 = vrcp.f32 %v2317_v57  ;;  %2852 = vmatpush.bf16.msra.mxu3 %v3938_v16 }
 0xc2d   :  { %v4145_v10 = vpop.eup %4144 }
 0xc2e   :  { %v2341_v23 = vmul.f32 %v4145_v10, %v5371_v1  ;;  %v2320_v44 = vpop.xlane.xlu1 %2319 }
 0xc2f   :  { %v2129_v51 = vpop.f32.mrf.mxu0  ;;  %4146 = vrcp.f32 %v2320_v44 }
 0xc30   :  { %v2347_v13 = vpack.c.bf16 %v2341_v23, %v2340_v42 }
 0xc32   :  { %3824 = vmatmul.msk.bf16.gmra.mxu0 %vm202_vm1, %v2347_v13 }
 0xc35   :  { %v4147_v45 = vpop.eup %4146 }
 0xc36   :  { %v2323_v8 = vpop.xlane.xlu2 %2322  ;;  %v2342_v1 = vmul.f32 %v4147_v45, %v5379_v56 }
 0xc37   :  { %4148 = vrcp.f32 %v2323_v8  ;;  %v2131_v34 = vpop.f32.mrf.mxu0 }
 0xc38   :  { %v2593_v3 = vpack.c.bf16 %v2131_v34, %v2129_v51 }
 0xc3a   :  { %3843 = vmatmul.msk.bf16.vlgmr.msrb.gmra.mxu2 %vm118_vm0, %v2593_v3 }
 0xc3d   :  { %v4149_v58 = vpop.eup %4148 }
 0xc3e   :  { %v2343_v39 = vmul.f32 %v4149_v58, %v5388_v43  ;;  %v2326_v11 = vpop.xlane.xlu0 %2325 }
 0xc3f   :  { %v2458_v35 = vpop.xlane.xlu2 %2457  ;;  %v2192_v0 = vpop.f32.mrf.mxu0 }
 0xc40   :  { %v2480_v4 = vsub.f32 %v5394_v21, %v2458_v35  ;;  %v2348_v55 = vpack.c.bf16 %v2343_v39, %v2342_v1 }
 0xc42   :  { %v2488_v54 = vmul.f32 1.442695, %v2480_v4  ;;  %3825 = vmatmul.msk.bf16.gmra.mxu0 %vm202_vm1, %v2348_v55 }
 0xc44   :  { %4150 = vpow2.f32 %v2488_v54 }
 0xc45   :  { %4152 = vrcp.f32 %v2326_v11 }
 0xc46   :  { %v2461_v20 = vpop.xlane.xlu0 %2460  ;;  %v2329_v41 = vpop.xlane.xlu1 %2328 }
 0xc47   :  { %v2481_v40 = vsub.f32 %v5403_v7, %v2461_v20  ;;  %4154 = vrcp.f32 %v2329_v41  ;;  %v2194_v56 = vpop.f32.mrf.mxu0 }
 0xc48   :  { %v2594_v53 = vpack.c.bf16 %v2194_v56, %v2192_v0 }
 0xc49   :  { %v2490_v43 = vmul.f32 1.442695, %v2481_v40  ;;  %v3937_v40 = vld [vmem:[%s5933_s3 + $0x20] sm:$0xff] }
 0xc4a   :  { %v5459_v5 = vpop.eup %4150  ;;  %3844 = vmatmul.msk.bf16.gmra.mxu2 %vm118_vm0, %v2594_v53  ;;  %2853 = vmatpush.bf16.msra.mxu3 %v3937_v40 }
 0xc4b   :  { %v4153_v12 = vpop.eup %4152  ;;  %4156 = vpow2.f32 %v2490_v43  ;;  %v2504_v21 = vsel %vm202_vm1, %v5459_v5, 0.0 }
 0xc4c   :  { %2505 = vadd.xlane.f32.xlu1 %v2504_v21  ;;  %v2344_v52 = vmul.f32 %v4153_v12, %v5398_v50 }
 0xc4d   :  { %v4155_v61 = vpop.eup %4154 }
 0xc4e   :  { %v2345_v27 = vmul.f32 %v4155_v61, %v5408_v30  ;;  %v2464_v7 = vpop.xlane.xlu1 %2463 }
 0xc4f   :  { %v2482_v14 = vsub.f32 %v5414_v47, %v2464_v7 }
 0xc50   :  { %v2467_v57 = vpop.xlane.xlu2 %2466  ;;  %v2349_v17 = vpack.c.bf16 %v2345_v27, %v2344_v52 }
 0xc51   :  { %v5467_v10 = vpop.eup %4156  ;;  %v2492_v42 = vmul.f32 1.442695, %v2482_v14  ;;  %v2483_v23 = vsub.f32 %v5418_v48, %v2467_v57 }
 0xc52   :  { %3826 = vmatmul.msk.bf16.gmra.mxu0 %vm202_vm1, %v2349_v17  ;;  %v2507_v51 = vsel %vm202_vm1, %v5467_v10, 0.0 }
 0xc53   :  { %4158 = vpow2.f32 %v2492_v42  ;;  %v2494_v13 = vmul.f32 1.442695, %v2483_v23  ;;  %2508 = vadd.xlane.f32.xlu2 %v2507_v51 }
 0xc55   :  { %4160 = vpow2.f32 %v2494_v13 }
 0xc58   :  { %v2470_v50 = vpop.xlane.xlu0 %2469 }
 0xc59   :  { %v5473_v30 = vpop.eup %4158  ;;  %v2484_v47 = vsub.f32 %v5422_v62, %v2470_v50 }
 0xc5a   :  { %v2510_v44 = vsel %vm202_vm1, %v5473_v30, 0.0 }
 0xc5b   :  { %v5478_v8 = vpop.eup %4160  ;;  %v2496_v48 = vmul.f32 1.442695, %v2484_v47  ;;  %2511 = vadd.xlane.f32.xlu0 %v2510_v44 }
 0xc5c   :  { %v2513_v34 = vsel %vm202_vm1, %v5478_v8, 0.0 }
 0xc5d   :  { %4162 = vpow2.f32 %v2496_v48  ;;  %2514 = vadd.xlane.f32.xlu1 %v2513_v34 }
 0xc60   :  { %v2473_v3 = vpop.xlane.xlu1 %2472 }
 0xc61   :  { %v2485_v45 = vsub.f32 %v5426_v19, %v2473_v3 }
 0xc63   :  { %v5483_v58 = vpop.eup %4162  ;;  %v2498_v16 = vmul.f32 1.442695, %v2485_v45 }
 0xc64   :  { %v2516_v62 = vsel %vm202_vm1, %v5483_v58, 0.0 }
 0xc65   :  { %4164 = vpow2.f32 %v2498_v16  ;;  %2517 = vadd.xlane.f32.xlu2 %v2516_v62 }
 0xc68   :  { %v2476_v1 = vpop.xlane.xlu2 %2475 }
 0xc69   :  { %v2486_v39 = vsub.f32 %v5430_v15, %v2476_v1 }
 0xc6b   :  { %v5488_v11 = vpop.eup %4164  ;;  %v2500_v35 = vmul.f32 1.442695, %v2486_v39 }
 0xc6c   :  { %v2519_v0 = vsel %vm202_vm1, %v5488_v11, 0.0 }
 0xc6d   :  { %4166 = vpow2.f32 %v2500_v35  ;;  %2520 = vadd.xlane.f32.xlu0 %v2519_v0 }
 0xc70   :  { %v2479_v19 = vpop.xlane.xlu0 %2478 }
 0xc71   :  { %v2487_v4 = vsub.f32 %v5434_v9, %v2479_v19 }
 0xc73   :  { %v5493_v55 = vpop.eup %4166  ;;  %v2502_v54 = vmul.f32 1.442695, %v2487_v4 }
 0xc74   :  { %v2522_v20 = vsel %vm202_vm1, %v5493_v55, 0.0 }
 0xc75   :  { %4168 = vpow2.f32 %v2502_v54  ;;  %2523 = vadd.xlane.f32.xlu1 %v2522_v20 }
 0xc7b   :  { %v5497_v15 = vpop.eup %4168 }
 0xc7c   :  { %v2525_v41 = vsel %vm202_vm1, %v5497_v15, 0.0 }
 0xc7d   :  { %2526 = vadd.xlane.f32.xlu2 %v2525_v41 }
 0xc9f   :  { %v2375_v9 = vpop.f32.mrf.mxu0 }
 0xca7   :  { %v2377_v56 = vpop.f32.mrf.mxu0 }
 0xca8   :  { %v2595_v53 = vpack.c.bf16 %v2377_v56, %v2375_v9 }
 0xcaa   :  { %3845 = vmatmul.msk.bf16.gmra.mxu2 %vm118_vm0, %v2595_v53 }
 0xcaf   :  { %v2380_v43 = vpop.f32.mrf.mxu0 }
 0xcb7   :  { %v2382_v12 = vpop.f32.mrf.mxu0 }
 0xcb8   :  { %v2596_v21 = vpack.c.bf16 %v2382_v12, %v2380_v43 }
 0xcba   :  { %3846 = vmatmul.msk.bf16.gmra.mxu2 %vm118_vm0, %v2596_v21 }
 0xcbd   :  { %v2654_v61 = vpop.f32.mrf.mxu2 }
 0xcbe   :  { %v5507_v27 = vadd.f32 %v2654_v61, %v5040_v59 }
 0xcbf   :  { %v2385_v52 = vpop.f32.mrf.mxu0  ;;  %v2506_v7 = vpop.xlane.xlu1 %2505 }
 0xcc0   :  { %4170 = vrcp.f32 %v2506_v7  ;;  %v2734_v57 = vpack.c.bf16 %v5507_v27, %v5507_v27 }
 0xcc2   :  { %v2774_v50 = vunpack.c.l.b16 %v2734_v57 }
 0xcc5   :  { %v2656_v14 = vpop.f32.mrf.mxu2 }
 0xcc6   :  { %v5512_v17 = vadd.f32 %v2656_v14, %v5045_v2  ;;  %v2509_v42 = vpop.xlane.xlu2 %2508  ;;  %v4171_v59 = vpop.eup %4170 }
 0xcc7   :  { %4172 = vrcp.f32 %v2509_v42  ;;  %v2387_v23 = vpop.f32.mrf.mxu0  ;;  %v2536_v3 = vmul.f32 %v4171_v59, %v5459_v5 }
 0xcc8   :  { %v2735_v51 = vpack.c.bf16 %v5512_v17, %v5512_v17  ;;  %v2597_v13 = vpack.c.bf16 %v2387_v23, %v2385_v52 }
 0xcca   :  { %v2775_v47 = vunpack.c.l.b16 %v2735_v51  ;;  %3847 = vmatmul.msk.bf16.gmra.mxu2 %vm118_vm0, %v2597_v13 }
 0xccc   :  { %v2794_v44 = vpack.c.b16 %v2775_v47, %v2774_v50 }
 0xccd   :  { %v4173_v48 = vpop.eup %4172  ;;  %v2659_v34 = vpop.f32.mrf.mxu2 }
 0xcce   :  { %v2537_v2 = vmul.f32 %v4173_v48, %v5467_v10  ;;  %3869 = vmatmul.msk.bf16.vlgmr.msra.gmra.mxu3 %vm118_vm0, %v2794_v44  ;;  %2981 = vmatpush.bf16.msrb.mxu0 %v2794_v44  ;;  %v2817_v45 = vsel %vm118_vm0, %v2794_v44, 0  ;;  %v5522_v39 = vadd.f32 %v2659_v34, %v5055_v22  ;;  %v2512_v35 = vpop.xlane.xlu0 %2511 }
 0xccf   :  { %v2390_v16 = vpop.f32.mrf.mxu0  ;;  %2940 = vmatpush.bf16.xpose.msra.mxu1 %v2817_v45 }
 0xcd0   :  { %v2544_v62 = vpack.c.bf16 %v2537_v2, %v2536_v3  ;;  %v2515_v1 = vpop.xlane.xlu1 %2514  ;;  %v2736_v10 = vpack.c.bf16 %v5522_v39, %v5522_v39 }
 0xcd1   :  { %4174 = vrcp.f32 %v2515_v1 }
 0xcd2   :  { %3831 = vmatmul.msk.bf16.vlgmr.msra.gmra.mxu0 %vm202_vm1, %v2544_v62  ;;  %4176 = vrcp.f32 %v2512_v35  ;;  %v2776_v22 = vunpack.c.l.b16 %v2736_v10 }
 0xcd5   :  { %v2661_v5 = vpop.f32.mrf.mxu2 }
 0xcd6   :  { %v5528_v0 = vadd.f32 %v2661_v5, %v5060_v38 }
 0xcd7   :  { %v2392_v19 = vpop.f32.mrf.mxu0  ;;  %v4175_v20 = vpop.eup %4174 }
 0xcd8   :  { %v2737_v4 = vpack.c.bf16 %v5528_v0, %v5528_v0  ;;  %v2598_v54 = vpack.c.bf16 %v2392_v19, %v2390_v16  ;;  %v4177_v40 = vpop.eup %4176  ;;  %v2539_v9 = vmul.f32 %v4175_v20, %v5478_v8  ;;  %v2518_v21 = vpop.xlane.xlu2 %2517 }
 0xcd9   :  { %v2538_v53 = vmul.f32 %v4177_v40, %v5473_v30 }
 0xcda   :  { %v2777_v41 = vunpack.c.l.b16 %v2737_v4  ;;  %3848 = vmatmul.msk.bf16.gmra.mxu2 %vm118_vm0, %v2598_v54 }
 0xcdb   :  { %v2545_v12 = vpack.c.bf16 %v2539_v9, %v2538_v53 }
 0xcdc   :  { %v2795_v56 = vpack.c.b16 %v2777_v41, %v2776_v22 }
 0xcde   :  { %3870 = vmatmul.msk.bf16.gmra.mxu3 %vm118_vm0, %v2795_v56  ;;  %3044 = vmatpush.bf16.msra.mxu0 %v2795_v56  ;;  %v2820_v38 = vsel %vm118_vm0, %v2795_v56, 0 }
 0xcdf   :  { %3003 = vmatpush.bf16.xpose.msrb.mxu1 %v2820_v38 }
 0xce0   :  { %v2521_v43 = vpop.xlane.xlu0 %2520 }
 0xce1   :  { %4178 = vrcp.f32 %v2521_v43 }
 0xce2   :  { %3832 = vmatmul.msk.bf16.gmra.mxu0 %vm202_vm1, %v2545_v12  ;;  %4180 = vrcp.f32 %v2518_v21 }
 0xce7   :  { %v4179_v61 = vpop.eup %4178 }
 0xce8   :  { %v4181_v52 = vpop.eup %4180  ;;  %v2541_v8 = vmul.f32 %v4179_v61, %v5488_v11  ;;  %v2524_v57 = vpop.xlane.xlu1 %2523 }
 0xce9   :  { %v2540_v7 = vmul.f32 %v4181_v52, %v5483_v58 }
 0xceb   :  { %v2546_v14 = vpack.c.bf16 %v2541_v8, %v2540_v7 }
 0xcf0   :  { %v2527_v30 = vpop.xlane.xlu2 %2526 }
 0xcf1   :  { %4182 = vrcp.f32 %v2527_v30 }
 0xcf2   :  { %3833 = vmatmul.msk.bf16.gmra.mxu0 %vm202_vm1, %v2546_v14  ;;  %4184 = vrcp.f32 %v2524_v57 }
 0xcf7   :  { %v4183_v42 = vpop.eup %4182 }
 0xcf8   :  { %v4185_v23 = vpop.eup %4184  ;;  %v2543_v51 = vmul.f32 %v4183_v42, %v5497_v15 }
 0xcf9   :  { %v2542_v13 = vmul.f32 %v4185_v23, %v5493_v55 }
 0xcfb   :  { %v2547_v50 = vpack.c.bf16 %v2543_v51, %v2542_v13 }
 0xd02   :  { %3834 = vmatmul.msk.bf16.gmra.mxu0 %vm202_vm1, %v2547_v50 }
 0xd2d   :  { %v2664_v47 = vpop.f32.mrf.mxu2 }
 0xd2e   :  { %v5545_v11 = vadd.f32 %v2664_v47, %v5145_v31 }
 0xd30   :  { %v2738_v59 = vpack.c.bf16 %v5545_v11, %v5545_v11 }
 0xd32   :  { %v2778_v15 = vunpack.c.l.b16 %v2738_v59 }
 0xd35   :  { %v2666_v58 = vpop.f32.mrf.mxu2 }
 0xd36   :  { %v5550_v44 = vadd.f32 %v2666_v58, %v5150_v60 }
 0xd38   :  { %v2739_v48 = vpack.c.bf16 %v5550_v44, %v5550_v44 }
 0xd3a   :  { %v2779_v34 = vunpack.c.l.b16 %v2739_v48 }
 0xd3c   :  { %v5554_v55 = vpack.c.b16 %v2779_v34, %v2778_v15 }
 0xd3d   :  { %v2669_v3 = vpop.f32.mrf.mxu2 }
 0xd3e   :  { %3871 = vmatmul.msk.bf16.gmra.mxu3 %vm118_vm0, %v5554_v55  ;;  %v5559_v31 = vadd.f32 %v2669_v3, %v5163_v24 }
 0xd40   :  { %v2740_v45 = vpack.c.bf16 %v5559_v31, %v5559_v31 }
 0xd42   :  { %v2780_v62 = vunpack.c.l.b16 %v2740_v45 }
 0xd45   :  { %v2671_v2 = vpop.f32.mrf.mxu2 }
 0xd46   :  { %v5564_v60 = vadd.f32 %v2671_v2, %v5170_v18 }
 0xd48   :  { %v2741_v16 = vpack.c.bf16 %v5564_v60, %v5564_v60 }
 0xd4a   :  { %v2781_v1 = vunpack.c.l.b16 %v2741_v16 }
 0xd4c   :  { %v5568_v35 = vpack.c.b16 %v2781_v1, %v2780_v62  ;;  %v2823_v1 = vsel %vm118_vm0, %v5554_v55, 0 }
 0xd4d   :  { %v2674_v5 = vpop.f32.mrf.mxu2 }
 0xd4e   :  { %3872 = vmatmul.msk.bf16.gmra.mxu3 %vm118_vm0, %v5568_v35  ;;  %v5573_v19 = vadd.f32 %v2674_v5, %v5185_v49  ;;  %v2826_v16 = vsel %vm118_vm0, %v5568_v35, 0 }
 0xd4f   :  { %v2573_v24 = vpop.f32.mrf.mxu0 }
 0xd50   :  { %v2742_v18 = vpack.c.bf16 %v5573_v19, %v5573_v19 }
 0xd51   :  { %v2855_v10 = vpop.f32.mrf.mxu3 }
 0xd52   :  { %v2905_v22 = vpack.c.bf16 %v2855_v10, %v2855_v10  ;;  %v2782_v56 = vunpack.c.l.b16 %v2742_v18 }
 0xd54   :  { %v2927_v49 = vunpack.c.l.b16 %v2905_v22 }
 0xd55   :  { %v2676_v4 = vpop.f32.mrf.mxu2 }
 0xd56   :  { %v5578_v54 = vadd.f32 %v2676_v4, %v5190_v36 }
 0xd57   :  { %v2575_v20 = vpop.f32.mrf.mxu0 }
 0xd58   :  { %v2743_v41 = vpack.c.bf16 %v5578_v54, %v5578_v54  ;;  %v2599_v40 = vpack.c.bf16 %v2575_v20, %v2573_v24 }
 0xd59   :  { %v2857_v9 = vpop.f32.mrf.mxu3 }
 0xd5a   :  { %v2783_v53 = vunpack.c.l.b16 %v2743_v41  ;;  %v2906_v38 = vpack.c.bf16 %v2857_v9, %v2857_v9  ;;  %3849 = vmatmul.msk.bf16.gmra.mxu2 %vm118_vm0, %v2599_v40 }
 0xd5c   :  { %v5583_v43 = vpack.c.b16 %v2783_v53, %v2782_v56  ;;  %v2928_v12 = vunpack.c.l.b16 %v2906_v38 }
 0xd5d   :  { %v2679_v21 = vpop.f32.mrf.mxu2 }
 0xd5e   :  { %v2929_v61 = vpack.c.b16 %v2928_v12, %v2927_v49  ;;  %3873 = vmatmul.msk.bf16.gmra.mxu3 %vm118_vm0, %v5583_v43  ;;  %v5589_v8 = vadd.f32 %v2679_v21, %v5204_v26  ;;  %v2829_v3 = vsel %vm118_vm0, %v5583_v43, 0 }
 0xd5f   :  { %v2578_v36 = vpop.f32.mrf.mxu0 }
 0xd60   :  { %3879 = vmatmul.msk.bf16.vlgmr.msra.gmra.mxu1 %vm118_vm0, %v2929_v61  ;;  %v2744_v30 = vpack.c.bf16 %v5589_v8, %v5589_v8 }
 0xd61   :  { %v2860_v52 = vpop.f32.mrf.mxu3 }
 0xd62   :  { %v2907_v42 = vpack.c.bf16 %v2860_v52, %v2860_v52  ;;  %v2784_v50 = vunpack.c.l.b16 %v2744_v30 }
 0xd64   :  { %v2990_v26 = vunpack.c.l.b16 %v2907_v42 }
 0xd65   :  { %v2681_v7 = vpop.f32.mrf.mxu2 }
 0xd66   :  { %v5594_v14 = vadd.f32 %v2681_v7, %v5209_v25 }
 0xd67   :  { %v2580_v57 = vpop.f32.mrf.mxu0 }
 0xd68   :  { %v2745_v23 = vpack.c.bf16 %v5594_v14, %v5594_v14  ;;  %v2600_v51 = vpack.c.bf16 %v2580_v57, %v2578_v36 }
 0xd69   :  { %v2862_v13 = vpop.f32.mrf.mxu3 }
 0xd6a   :  { %v2785_v47 = vunpack.c.l.b16 %v2745_v23  ;;  %v2908_v58 = vpack.c.bf16 %v2862_v13, %v2862_v13  ;;  %3850 = vmatmul.msk.bf16.gmra.mxu2 %vm118_vm0, %v2600_v51 }
 0xd6c   :  { %v5599_v59 = vpack.c.b16 %v2785_v47, %v2784_v50  ;;  %v2991_v48 = vunpack.c.l.b16 %v2908_v58 }
 0xd6e   :  { %v2992_v15 = vpack.c.b16 %v2991_v48, %v2990_v26  ;;  %3874 = vmatmul.msk.bf16.gmra.mxu3 %vm118_vm0, %v5599_v59  ;;  %v2832_v25 = vsel %vm118_vm0, %v5599_v59, 0 }
 0xd6f   :  { %v2583_v34 = vpop.f32.mrf.mxu0  ;;  %3087 = vmatpush.bf16.xpose.msra.mxu1 %v2832_v25 }
 0xd70   :  { %3881 = vmatmul.msk.bf16.vlgmr.msrb.gmra.mxu1 %vm118_vm0, %v2992_v15 }
 0xd77   :  { %v2585_v2 = vpop.f32.mrf.mxu0  ;;  %3088 = vmatpush.bf16.xpose.msra.mxu1 %v2829_v3 }
 0xd78   :  { %v2601_v45 = vpack.c.bf16 %v2585_v2, %v2583_v34 }
 0xd7a   :  { %3851 = vmatmul.msk.bf16.gmra.mxu2 %vm118_vm0, %v2601_v45 }
 0xd7f   :  { %v2588_v62 = vpop.f32.mrf.mxu0  ;;  %3089 = vmatpush.bf16.xpose.msra.mxu1 %v2826_v16 }
 0xd87   :  { %v2590_v5 = vpop.f32.mrf.mxu0  ;;  %3090 = vmatpush.bf16.xpose.msra.mxu1 %v2823_v1 }
 0xd88   :  { %v2602_v24 = vpack.c.bf16 %v2590_v5, %v2588_v62 }
 0xd8a   :  { %3852 = vmatmul.msk.bf16.gmra.mxu2 %vm118_vm0, %v2602_v24 }
 0xdc1   :  { %v2865_v10 = vpop.f32.mrf.mxu3 }
 0xdc2   :  { %v2909_v4 = vpack.c.bf16 %v2865_v10, %v2865_v10 }
 0xdc4   :  { %v3059_v22 = vunpack.c.l.b16 %v2909_v4 }
 0xdc9   :  { %v2867_v18 = vpop.f32.mrf.mxu3 }
 0xdca   :  { %v2910_v20 = vpack.c.bf16 %v2867_v18, %v2867_v18 }
 0xdcc   :  { %v3060_v41 = vunpack.c.l.b16 %v2910_v20 }
 0xdce   :  { %v3067_v40 = vpack.c.b16 %v3060_v41, %v3059_v22 }
 0xdd0   :  { %3883 = vmatmul.msk.bf16.vlgmr.msra.gmra.mxu1 %vm118_vm0, %v3067_v40 }
 0xdd1   :  { %v2870_v9 = vpop.f32.mrf.mxu3 }
 0xdd2   :  { %v2911_v56 = vpack.c.bf16 %v2870_v9, %v2870_v9 }
 0xdd4   :  { %v3061_v49 = vunpack.c.l.b16 %v2911_v56 }
 0xdd9   :  { %v2872_v53 = vpop.f32.mrf.mxu3 }
 0xdda   :  { %v2912_v38 = vpack.c.bf16 %v2872_v53, %v2872_v53 }
 0xddc   :  { %v3062_v12 = vunpack.c.l.b16 %v2912_v38 }
 0xddd   :  { %v2684_v21 = vpop.f32.mrf.mxu2  ;;  %v5615_v61 = vpop.f32.mrf.mxu1 }
 0xdde   :  { %v3068_v36 = vpack.c.b16 %v3062_v12, %v3061_v49  ;;  %v2947_v52 = vsel %vm522_vm2, %v5615_v61, -inf  ;;  %v5621_v30 = vadd.f32 %v2684_v21, %v5231_v63 }
 0xddf   :  { %2948 = vmax.xlane.f32.xlu0 %v2947_v52 }
 0xde0   :  { %3884 = vmatmul.msk.bf16.gmra.mxu1 %vm118_vm0, %v3068_v36  ;;  %v2746_v23 = vpack.c.bf16 %v5621_v30, %v5621_v30 }
 0xde1   :  { %v2875_v7 = vpop.f32.mrf.mxu3 }
 0xde2   :  { %v2913_v50 = vpack.c.bf16 %v2875_v7, %v2875_v7  ;;  %v2786_v63 = vunpack.c.l.b16 %v2746_v23 }
 0xde4   :  { %v3063_v15 = vunpack.c.l.b16 %v2913_v50 }
 0xde5   :  { %v2686_v57 = vpop.f32.mrf.mxu2  ;;  %v5623_v42 = vpop.f32.mrf.mxu1 }
 0xde6   :  { %v5628_v51 = vadd.f32 %v2686_v57, %v5236_v28  ;;  %v2950_v13 = vsel %vm522_vm2, %v5623_v42, -inf }
 0xde7   :  { %2951 = vmax.xlane.f32.xlu1 %v2950_v13 }
 0xde8   :  { %v2747_v47 = vpack.c.bf16 %v5628_v51, %v5628_v51 }
 0xde9   :  { %v2877_v58 = vpop.f32.mrf.mxu3 }
 0xdea   :  { %v2787_v26 = vunpack.c.l.b16 %v2747_v47  ;;  %v2914_v48 = vpack.c.bf16 %v2877_v58, %v2877_v58 }
 0xdec   :  { %v5634_v25 = vpack.c.b16 %v2787_v26, %v2786_v63  ;;  %v3064_v34 = vunpack.c.l.b16 %v2914_v48 }
 0xded   :  { %v2689_v3 = vpop.f32.mrf.mxu2  ;;  %v5636_v2 = vpop.f32.mrf.mxu1 }
 0xdee   :  { %v3069_v28 = vpack.c.b16 %v3064_v34, %v3063_v15  ;;  %3875 = vmatmul.msk.bf16.gmra.mxu3 %vm118_vm0, %v5634_v25  ;;  %v3010_v45 = vsel %vm522_vm2, %v5636_v2, -inf  ;;  %v5644_v62 = vadd.f32 %v2689_v3, %v5246_v37 }
 0xdef   :  { %3011 = vmax.xlane.f32.xlu2 %v3010_v45 }
 0xdf0   :  { %3885 = vmatmul.msk.bf16.gmra.mxu1 %vm118_vm0, %v3069_v28  ;;  %v2748_v24 = vpack.c.bf16 %v5644_v62, %v5644_v62 }
 0xdf1   :  { %v2880_v16 = vpop.f32.mrf.mxu3 }
 0xdf2   :  { %v2915_v18 = vpack.c.bf16 %v2880_v16, %v2880_v16  ;;  %v2788_v37 = vunpack.c.l.b16 %v2748_v24 }
 0xdf4   :  { %v3065_v9 = vunpack.c.l.b16 %v2915_v18 }
 0xdf5   :  { %v2691_v1 = vpop.f32.mrf.mxu2  ;;  %v5646_v5 = vpop.f32.mrf.mxu1 }
 0xdf6   :  { %v5651_v10 = vadd.f32 %v2691_v1, %v5251_v6  ;;  %v3013_v4 = vsel %vm522_vm2, %v5646_v5, -inf }
 0xdf7   :  { %3014 = vmax.xlane.f32.xlu0 %v3013_v4 }
 0xdf8   :  { %v2749_v20 = vpack.c.bf16 %v5651_v10, %v5651_v10 }
 0xdf9   :  { %v2882_v22 = vpop.f32.mrf.mxu3 }
 0xdfa   :  { %v2789_v41 = vunpack.c.l.b16 %v2749_v20  ;;  %v2916_v40 = vpack.c.bf16 %v2882_v22, %v2882_v22 }
 0xdfc   :  { %v5657_v56 = vpack.c.b16 %v2789_v41, %v2788_v37  ;;  %v3066_v53 = vunpack.c.l.b16 %v2916_v40 }
 0xdfd   :  { %v2694_v38 = vpop.f32.mrf.mxu2 }
 0xdfe   :  { %v3070_v49 = vpack.c.b16 %v3066_v53, %v3065_v9  ;;  %3876 = vmatmul.msk.bf16.gmra.mxu3 %vm118_vm0, %v5657_v56  ;;  %v5663_v6 = vadd.f32 %v2694_v38, %v5261_v46 }
 0xe00   :  { %3886 = vmatmul.msk.bf16.gmra.mxu1 %vm118_vm0, %v3070_v49  ;;  %v2750_v21 = vpack.c.bf16 %v5663_v6, %v5663_v6 }
 0xe02   :  { %v2790_v7 = vunpack.c.l.b16 %v2750_v21 }
 0xe05   :  { %v2696_v12 = vpop.f32.mrf.mxu2 }
 0xe06   :  { %v5668_v36 = vadd.f32 %v2696_v12, %v5266_v33 }
 0xe08   :  { %v2751_v52 = vpack.c.bf16 %v5668_v36, %v5668_v36 }
 0xe0a   :  { %v2791_v57 = vunpack.c.l.b16 %v2751_v52 }
 0xe0c   :  { %v5672_v23 = vpack.c.b16 %v2791_v57, %v2790_v7 }
 0xe0d   :  { %v2699_v13 = vpop.f32.mrf.mxu2 }
 0xe0e   :  { %3877 = vmatmul.msk.bf16.gmra.mxu3 %vm118_vm0, %v5672_v23  ;;  %v5677_v46 = vadd.f32 %v2699_v13, %v5275_v32 }
 0xe10   :  { %v2752_v47 = vpack.c.bf16 %v5677_v46, %v5677_v46 }
 0xe12   :  { %v2792_v63 = vunpack.c.l.b16 %v2752_v47 }
 0xe15   :  { %v2701_v50 = vpop.f32.mrf.mxu2 }
 0xe16   :  { %v5682_v33 = vadd.f32 %v2701_v50, %v5280_v29 }
 0xe18   :  { %v2753_v58 = vpack.c.bf16 %v5682_v33, %v5682_v33 }
 0xe1a   :  { %v2793_v26 = vunpack.c.l.b16 %v2753_v58 }
 0xe1c   :  { %v5686_v48 = vpack.c.b16 %v2793_v26, %v2792_v63 }
 0xe1e   :  { %3878 = vmatmul.msk.bf16.gmra.mxu3 %vm118_vm0, %v5686_v48  ;;  %3422 = vmatpush.bf16.msrb.mxu1 %v5686_v48 }
 0xe22   :  { %3423 = vmatpush.bf16.msrb.mxu1 %v5672_v23 }
 0xe26   :  { %3424 = vmatpush.bf16.msrb.mxu1 %v5657_v56 }
 0xe2a   :  { %3425 = vmatpush.bf16.msrb.mxu1 %v5634_v25 }
 0xe4d   :  { %v3092_v32 = vpop.f32.mrf.mxu1 }
 0xe4e   :  { %v3112_v29 = vsel %vm202_vm1, %v3092_v32, -inf }
 0xe4f   :  { %3113 = vmax.xlane.f32.xlu1 %v3112_v29 }
 0xe52   :  { %v2949_v15 = vpop.xlane.xlu0 %2948 }
 0xe53   :  { %v2953_v34 = vsub.f32 %v5615_v61, %v2949_v15 }
 0xe55   :  { %v2955_v3 = vmul.f32 1.442695, %v2953_v34  ;;  %v3094_v28 = vpop.f32.mrf.mxu1 }
 0xe56   :  { %v3115_v45 = vsel %vm202_vm1, %v3094_v28, -inf }
 0xe57   :  { %4186 = vpow2.f32 %v2955_v3  ;;  %3116 = vmax.xlane.f32.xlu2 %v3115_v45 }
 0xe5a   :  { %v2952_v16 = vpop.xlane.xlu1 %2951 }
 0xe5b   :  { %v2954_v1 = vsub.f32 %v5623_v42, %v2952_v16 }
 0xe5d   :  { %v5698_v24 = vpop.eup %4186  ;;  %v2957_v4 = vmul.f32 1.442695, %v2954_v1  ;;  %v3097_v18 = vpop.f32.mrf.mxu1 }
 0xe5e   :  { %v2959_v20 = vsel %vm522_vm2, %v5698_v24, 0.0  ;;  %v3118_v22 = vsel %vm202_vm1, %v3097_v18, -inf }
 0xe5f   :  { %4188 = vpow2.f32 %v2957_v4  ;;  %2960 = vadd.xlane.f32.xlu2 %v2959_v20  ;;  %3119 = vmax.xlane.f32.xlu0 %v3118_v22 }
 0xe62   :  { %v3012_v61 = vpop.xlane.xlu2 %3011 }
 0xe63   :  { %v3016_v37 = vsub.f32 %v5636_v2, %v3012_v61 }
 0xe65   :  { %v4189_v41 = vpop.eup %4188  ;;  %v3018_v40 = vmul.f32 1.442695, %v3016_v37  ;;  %v3099_v9 = vpop.f32.mrf.mxu1 }
 0xe66   :  { %v3121_v42 = vsel %vm202_vm1, %v3099_v9, -inf  ;;  %v2962_v53 = vsel %vm522_vm2, %v4189_v41, 0.0 }
 0xe67   :  { %4190 = vpow2.f32 %v3018_v40  ;;  %3122 = vmax.xlane.f32.xlu1 %v3121_v42  ;;  %2963 = vadd.xlane.f32.xlu0 %v2962_v53 }
 0xe6a   :  { %v3015_v38 = vpop.xlane.xlu0 %3014 }
 0xe6b   :  { %v3017_v49 = vsub.f32 %v5646_v5, %v3015_v38 }
 0xe6d   :  { %v5707_v12 = vpop.eup %4190  ;;  %v3020_v21 = vmul.f32 1.442695, %v3017_v49  ;;  %v3102_v52 = vpop.f32.mrf.mxu1 }
 0xe6e   :  { %v3124_v7 = vsel %vm202_vm1, %v3102_v52, -inf  ;;  %v3022_v2 = vsel %vm522_vm2, %v5707_v12, 0.0 }
 0xe6f   :  { %4192 = vpow2.f32 %v3020_v21  ;;  %3125 = vmax.xlane.f32.xlu1 %v3124_v7  ;;  %3023 = vadd.xlane.f32.xlu0 %v3022_v2 }
 0xe75   :  { %v5712_v57 = vpop.eup %4192  ;;  %v3104_v13 = vpop.f32.mrf.mxu1 }
 0xe76   :  { %v3127_v50 = vsel %vm202_vm1, %v3104_v13, -inf  ;;  %v3025_v5 = vsel %vm522_vm2, %v5712_v57, 0.0 }
 0xe77   :  { %3128 = vmax.xlane.f32.xlu2 %v3127_v50  ;;  %3026 = vadd.xlane.f32.xlu1 %v3025_v5 }
 0xe7d   :  { %v5717_v47 = vpop.f32.mrf.mxu1 }
 0xe7e   :  { %v3130_v58 = vsel %vm202_vm1, %v5717_v47, -inf }
 0xe7f   :  { %3131 = vmax.xlane.f32.xlu2 %v3130_v58 }
 0xe85   :  { %v5721_v63 = vpop.f32.mrf.mxu1 }
 0xe86   :  { %v3133_v26 = vsel %vm202_vm1, %v5721_v63, -inf }
 0xe87   :  { %3134 = vmax.xlane.f32.xlu0 %v3133_v26 }
 0xec2   :  { %v3114_v29 = vpop.xlane.xlu1 %3113 }
 0xec3   :  { %v3136_v15 = vsub.f32 %v3092_v32, %v3114_v29 }
 0xec5   :  { %v3144_v34 = vmul.f32 1.442695, %v3136_v15 }
 0xec7   :  { %4194 = vpow2.f32 %v3144_v34 }
 0xeca   :  { %v3117_v3 = vpop.xlane.xlu2 %3116 }
 0xecb   :  { %v3137_v45 = vsub.f32 %v3094_v28, %v3117_v3 }
 0xecd   :  { %v5725_v16 = vpop.eup %4194  ;;  %v3146_v1 = vmul.f32 1.442695, %v3137_v45 }
 0xece   :  { %v3160_v4 = vsel %vm202_vm1, %v5725_v16, 0.0 }
 0xecf   :  { %4196 = vpow2.f32 %v3146_v1  ;;  %3161 = vadd.xlane.f32.xlu1 %v3160_v4 }
 0xed2   :  { %v3120_v20 = vpop.xlane.xlu0 %3119  ;;  %v2961_v40 = vpop.xlane.xlu2 %2960 }
 0xed3   :  { %v3138_v22 = vsub.f32 %v3097_v18, %v3120_v20 }
 0xed5   :  { %v5729_v61 = vpop.eup %4196  ;;  %v3148_v37 = vmul.f32 1.442695, %v3138_v22 }
 0xed6   :  { %v3163_v32 = vsel %vm202_vm1, %v5729_v61, 0.0 }
 0xed7   :  { %4198 = vpow2.f32 %v3148_v37  ;;  %3164 = vadd.xlane.f32.xlu2 %v3163_v32 }
 0xed8   :  { %4200 = vrcp.f32 %v2961_v40 }
 0xeda   :  { %v2964_v28 = vpop.xlane.xlu0 %2963  ;;  %v3123_v42 = vpop.xlane.xlu1 %3122 }
 0xedb   :  { %4202 = vrcp.f32 %v2964_v28  ;;  %v3139_v53 = vsub.f32 %v3099_v9, %v3123_v42  ;;  %v2844_v28 = vsel %vm118_vm0, %v5686_v48, 0 }
 0xedd   :  { %v5733_v38 = vpop.eup %4198  ;;  %v3150_v49 = vmul.f32 1.442695, %v3139_v53 }
 0xede   :  { %v3166_v18 = vsel %vm202_vm1, %v5733_v38, 0.0  ;;  %v4201_v21 = vpop.eup %4200 }
 0xedf   :  { %4204 = vpow2.f32 %v3150_v49  ;;  %3167 = vadd.xlane.f32.xlu0 %v3166_v18  ;;  %v2967_v2 = vmul.f32 %v4201_v21, %v5698_v24  ;;  %v2838_v49 = vsel %vm118_vm0, %v5657_v56, 0  ;;  %v3939_v56 = vld [vmem:[%s5933_s3 + $0x30] sm:$0xff] }
 0xee1   :  { %v4203_v7 = vpop.eup %4202 }
 0xee2   :  { %v2968_v50 = vmul.f32 %v4203_v7, %v4189_v41  ;;  %v3126_v5 = vpop.xlane.xlu1 %3125  ;;  %v3024_v9 = vpop.xlane.xlu0 %3023 }
 0xee3   :  { %v3140_v58 = vsub.f32 %v3102_v52, %v3126_v5 }
 0xee4   :  { %v2969_v26 = vpack.c.bf16 %v2968_v50, %v2967_v2 }
 0xee5   :  { %v5738_v29 = vpop.eup %4204  ;;  %v3152_v15 = vmul.f32 1.442695, %v3140_v58 }
 0xee6   :  { %3880 = vmatmul.msk.bf16.vlgmr.msrb.gmra.mxu0 %vm522_vm2, %v2969_v26  ;;  %v3169_v34 = vsel %vm202_vm1, %v5738_v29, 0.0 }
 0xee7   :  { %4206 = vpow2.f32 %v3152_v15  ;;  %3224 = vmatpush.bf16.msrb.mxu0 %v5599_v59  ;;  %3170 = vadd.xlane.f32.xlu1 %v3169_v34 }
 0xee8   :  { %4208 = vrcp.f32 %v3024_v9 }
 0xeea   :  { %v3027_v3 = vpop.xlane.xlu1 %3026  ;;  %v3129_v24 = vpop.xlane.xlu2 %3128 }
 0xeeb   :  { %4210 = vrcp.f32 %v3027_v3  ;;  %3225 = vmatpush.bf16.msrb.mxu0 %v5583_v43  ;;  %v3141_v41 = vsub.f32 %v3104_v13, %v3129_v24 }
 0xeed   :  { %v5745_v52 = vpop.eup %4206  ;;  %v3154_v45 = vmul.f32 1.442695, %v3141_v41 }
 0xeee   :  { %v3172_v1 = vsel %vm202_vm1, %v5745_v52, 0.0  ;;  %v4209_v4 = vpop.eup %4208 }
 0xeef   :  { %4212 = vpow2.f32 %v3154_v45  ;;  %3226 = vmatpush.bf16.msrb.mxu0 %v5568_v35  ;;  %3173 = vadd.xlane.f32.xlu2 %v3172_v1  ;;  %v3030_v20 = vmul.f32 %v4209_v4, %v5707_v12 }
 0xef1   :  { %v4211_v59 = vpop.eup %4210 }
 0xef2   :  { %v3031_v22 = vmul.f32 %v4211_v59, %v5712_v57  ;;  %v3132_v37 = vpop.xlane.xlu2 %3131 }
 0xef3   :  { %3227 = vmatpush.bf16.msrb.mxu0 %v5554_v55  ;;  %v3142_v43 = vsub.f32 %v5717_v47, %v3132_v37  ;;  %v2841_v47 = vsel %vm118_vm0, %v5672_v23, 0  ;;  %v3940_v23 = vld [vmem:[%s5933_s3 + $0x38] sm:$0xff] }
 0xef4   :  { %v3032_v13 = vpack.c.bf16 %v3031_v22, %v3030_v20  ;;  %3505 = vmatpush.bf16.msra.mxu2 %v3940_v23 }
 0xef5   :  { %v4213_v40 = vpop.eup %4212  ;;  %v3156_v32 = vmul.f32 1.442695, %v3142_v43 }
 0xef6   :  { %3882 = vmatmul.msk.bf16.vlgmr.msra.gmra.mxu0 %vm522_vm2, %v3032_v13  ;;  %v3175_v35 = vsel %vm202_vm1, %v4213_v40, 0.0 }
 0xef7   :  { %4214 = vpow2.f32 %v3156_v32  ;;  %3285 = vmatpush.bf16.xpose.msra.mxu0 %v2844_v28  ;;  %3176 = vadd.xlane.f32.xlu0 %v3175_v35 }
 0xef8   :  { %3506 = vmatpush.bf16.msra.mxu2 %v3939_v56 }
 0xefa   :  { %v3135_v12 = vpop.xlane.xlu0 %3134 }
 0xefb   :  { %v3143_v57 = vsub.f32 %v5721_v63, %v3135_v12  ;;  %v2835_v63 = vsel %vm118_vm0, %v5634_v25, 0 }
 0xefd   :  { %v5759_v42 = vpop.eup %4214  ;;  %v3158_v55 = vmul.f32 1.442695, %v3143_v57 }
 0xefe   :  { %v3178_v53 = vsel %vm202_vm1, %v5759_v42, 0.0 }
 0xeff   :  { %4216 = vpow2.f32 %v3158_v55  ;;  %3286 = vmatpush.bf16.xpose.msra.mxu0 %v2841_v47  ;;  %3179 = vadd.xlane.f32.xlu1 %v3178_v53 }
 0xf05   :  { %v4217_v48 = vpop.eup %4216 }
 0xf06   :  { %v3181_v18 = vsel %vm202_vm1, %v4217_v48, 0.0 }
 0xf07   :  { %3287 = vmatpush.bf16.xpose.msra.mxu0 %v2838_v49  ;;  %3182 = vadd.xlane.f32.xlu2 %v3181_v18 }
 0xf0f   :  { %3288 = vmatpush.bf16.xpose.msra.mxu0 %v2835_v63 }
 0xf42   :  { %v3162_v21 = vpop.xlane.xlu1 %3161 }
 0xf43   :  { %4218 = vrcp.f32 %v3162_v21 }
 0xf49   :  { %v4219_v2 = vpop.eup %4218 }
 0xf4a   :  { %v3165_v7 = vpop.xlane.xlu2 %3164  ;;  %v3192_v5 = vmul.f32 %v4219_v2, %v5725_v16 }
 0xf4b   :  { %4220 = vrcp.f32 %v3165_v7 }
 0xf51   :  { %v4221_v50 = vpop.eup %4220 }
 0xf52   :  { %v3193_v25 = vmul.f32 %v4221_v50, %v5729_v61  ;;  %v3168_v26 = vpop.xlane.xlu0 %3167 }
 0xf53   :  { %4222 = vrcp.f32 %v3168_v26 }
 0xf54   :  { %v3200_v58 = vpack.c.bf16 %v3193_v25, %v3192_v5 }
 0xf56   :  { %3887 = vmatmul.msk.bf16.vlgmr.msrb.gmra.mxu0 %vm202_vm1, %v3200_v58 }
 0xf59   :  { %v4223_v9 = vpop.eup %4222 }
 0xf5a   :  { %v3171_v15 = vpop.xlane.xlu1 %3170  ;;  %v3194_v3 = vmul.f32 %v4223_v9, %v5733_v38  ;;  %v2885_v38 = vpop.f32.mrf.mxu3 }
 0xf5b   :  { %4224 = vrcp.f32 %v3171_v15  ;;  %v2917_v18 = vpack.c.bf16 %v2885_v38, %v2885_v38 }
 0xf5d   :  { %v3257_v23 = vunpack.c.l.b16 %v2917_v18 }
 0xf61   :  { %v4225_v34 = vpop.eup %4224 }
 0xf62   :  { %v3195_v24 = vmul.f32 %v4225_v34, %v5738_v29  ;;  %v3174_v1 = vpop.xlane.xlu2 %3173  ;;  %v2887_v12 = vpop.f32.mrf.mxu3 }
 0xf63   :  { %v2983_v41 = vpop.f32.mrf.mxu0  ;;  %4226 = vrcp.f32 %v3174_v1  ;;  %v2918_v49 = vpack.c.bf16 %v2887_v12, %v2887_v12 }
 0xf64   :  { %v3201_v45 = vpack.c.bf16 %v3195_v24, %v3194_v3 }
 0xf65   :  { %v3258_v63 = vunpack.c.l.b16 %v2918_v49 }
 0xf66   :  { %3888 = vmatmul.msk.bf16.gmra.mxu0 %vm202_vm1, %v3201_v45 }
 0xf67   :  { %v3265_v7 = vpack.c.b16 %v3258_v63, %v3257_v23 }
 0xf69   :  { %v4227_v59 = vpop.eup %4226 }
 0xf6a   :  { %v3177_v16 = vpop.xlane.xlu0 %3176  ;;  %v3196_v22 = vmul.f32 %v4227_v59, %v5745_v52  ;;  %v2890_v53 = vpop.f32.mrf.mxu3 }
 0xf6b   :  { %4228 = vrcp.f32 %v3177_v16  ;;  %v2985_v61 = vpop.f32.mrf.mxu0  ;;  %v2919_v50 = vpack.c.bf16 %v2890_v53, %v2890_v53 }
 0xf6c   :  { %v3447_v4 = vpack.c.bf16 %v2985_v61, %v2983_v41 }
 0xf6d   :  { %v3259_v25 = vunpack.c.l.b16 %v2919_v50 }
 0xf6e   :  { %3907 = vmatmul.msk.bf16.vlgmr.msra.gmra.mxu2 %vm118_vm0, %v3447_v4 }
 0xf71   :  { %v4229_v20 = vpop.eup %4228 }
 0xf72   :  { %v3197_v37 = vmul.f32 %v4229_v20, %v4213_v40  ;;  %v3180_v13 = vpop.xlane.xlu1 %3179  ;;  %v2892_v21 = vpop.f32.mrf.mxu3 }
 0xf73   :  { %v3046_v43 = vpop.f32.mrf.mxu0  ;;  %4230 = vrcp.f32 %v3180_v13  ;;  %v2920_v2 = vpack.c.bf16 %v2892_v21, %v2892_v21 }
 0xf74   :  { %v3202_v29 = vpack.c.bf16 %v3197_v37, %v3196_v22 }
 0xf75   :  { %v3260_v5 = vunpack.c.l.b16 %v2920_v2 }
 0xf76   :  { %3889 = vmatmul.msk.bf16.gmra.mxu0 %vm202_vm1, %v3202_v29 }
 0xf77   :  { %v3266_v58 = vpack.c.b16 %v3260_v5, %v3259_v25 }
 0xf79   :  { %v4231_v57 = vpop.eup %4230 }
 0xf7a   :  { %v3183_v32 = vpop.xlane.xlu2 %3182  ;;  %v3198_v47 = vmul.f32 %v4231_v57, %v5759_v42  ;;  %v2895_v56 = vpop.f32.mrf.mxu3 }
 0xf7b   :  { %4232 = vrcp.f32 %v3183_v32  ;;  %v3048_v28 = vpop.f32.mrf.mxu0  ;;  %v2921_v26 = vpack.c.bf16 %v2895_v56, %v2895_v56 }
 0xf7c   :  { %v3448_v35 = vpack.c.bf16 %v3048_v28, %v3046_v43 }
 0xf7d   :  { %v3261_v34 = vunpack.c.l.b16 %v2921_v26 }
 0xf7e   :  { %3908 = vmatmul.msk.bf16.gmra.mxu2 %vm118_vm0, %v3448_v35 }
 0xf81   :  { %v4233_v55 = vpop.eup %4232 }
 0xf82   :  { %v3199_v52 = vmul.f32 %v4233_v55, %v4217_v48  ;;  %v2897_v42 = vpop.f32.mrf.mxu3 }
 0xf83   :  { %v2922_v48 = vpack.c.bf16 %v2897_v42, %v2897_v42 }
 0xf84   :  { %v3203_v40 = vpack.c.bf16 %v3199_v52, %v3198_v47 }
 0xf85   :  { %v3262_v9 = vunpack.c.l.b16 %v2922_v48 }
 0xf86   :  { %3890 = vmatmul.msk.bf16.gmra.mxu0 %vm202_vm1, %v3203_v40 }
 0xf87   :  { %v3267_v3 = vpack.c.b16 %v3262_v9, %v3261_v34 }
 0xf8a   :  { %v2900_v15 = vpop.f32.mrf.mxu3 }
 0xf8b   :  { %v2923_v45 = vpack.c.bf16 %v2900_v15, %v2900_v15 }
 0xf8d   :  { %v3263_v16 = vunpack.c.l.b16 %v2923_v45 }
 0xf92   :  { %v2902_v24 = vpop.f32.mrf.mxu3 }
 0xf93   :  { %v2924_v41 = vpack.c.bf16 %v2902_v24, %v2902_v24 }
 0xf95   :  { %v3264_v1 = vunpack.c.l.b16 %v2924_v41 }
 0xf96   :  { %3891 = vmatmul.msk.bf16.vlgmr.msra.gmra.mxu0 %vm118_vm0, %v3265_v7 }
 0xf97   :  { %v3268_v61 = vpack.c.b16 %v3264_v1, %v3263_v16 }
 0xfa6   :  { %3892 = vmatmul.msk.bf16.gmra.mxu0 %vm118_vm0, %v3266_v58 }
 0xfb6   :  { %3893 = vmatmul.msk.bf16.gmra.mxu0 %vm118_vm0, %v3267_v3 }
 0xfc6   :  { %3894 = vmatmul.msk.bf16.gmra.mxu0 %vm118_vm0, %v3268_v61 }
 0xfd3   :  { %v3229_v4 = vpop.f32.mrf.mxu0 }
 0xfdb   :  { %v3231_v59 = vpop.f32.mrf.mxu0 }
 0xfdc   :  { %v3449_v20 = vpack.c.bf16 %v3231_v59, %v3229_v4 }
 0xfde   :  { %3909 = vmatmul.msk.bf16.gmra.mxu2 %vm118_vm0, %v3449_v20 }
 0xfe3   :  { %v3234_v22 = vpop.f32.mrf.mxu0 }
 0xfeb   :  { %v3236_v37 = vpop.f32.mrf.mxu0 }
 0xfec   :  { %v3450_v38 = vpack.c.bf16 %v3236_v37, %v3234_v22 }
 0xfee   :  { %3910 = vmatmul.msk.bf16.gmra.mxu2 %vm118_vm0, %v3450_v38 }
 0xff1   :  { %v3508_v43 = vpop.f32.mrf.mxu2 }
 0xff2   :  { %v3558_v29 = vadd.f32 %v3508_v43, %v5507_v27 }
 0xff3   :  { %v3239_v13 = vpop.f32.mrf.mxu0 }
 0xff4   :  { %3578 = vst.msk [vmem:[#allocation5] sm:$0xff] %vm118_vm0, %v3558_v29 }
 0xff9   :  { %v3510_v32 = vpop.f32.mrf.mxu2 }
 0xffa   :  { %v3559_v28 = vadd.f32 %v3510_v32, %v5512_v17 }
 0xffb   :  { %v3241_v35 = vpop.f32.mrf.mxu0 }
 0xffc   :  { %3579 = vst.msk [vmem:[#allocation5 + $0x8] sm:$0xff] %vm118_vm0, %v3559_v28  ;;  %v3451_v12 = vpack.c.bf16 %v3241_v35, %v3239_v13 }
 0xffe   :  { %3911 = vmatmul.msk.bf16.gmra.mxu2 %vm118_vm0, %v3451_v12 }
0x1001   :  { %v3513_v57 = vpop.f32.mrf.mxu2 }
0x1002   :  { %v3560_v55 = vadd.f32 %v3513_v57, %v5522_v39 }
0x1003   :  { %v3244_v47 = vpop.f32.mrf.mxu0 }
0x1004   :  { %3580 = vst.msk [vmem:[#allocation5 + $0x10] sm:$0xff] %vm118_vm0, %v3560_v55 }
0x1009   :  { %v3515_v52 = vpop.f32.mrf.mxu2 }
0x100a   :  { %v3561_v27 = vadd.f32 %v3515_v52, %v5528_v0 }
0x100b   :  { %v3246_v40 = vpop.f32.mrf.mxu0 }
0x100c   :  { %3581 = vst.msk [vmem:[#allocation5 + $0x18] sm:$0xff] %vm118_vm0, %v3561_v27  ;;  %v3452_v53 = vpack.c.bf16 %v3246_v40, %v3244_v47 }
0x100d   :  { %3610 = dma.vmem_to_hbm [thread:$0]  %s3603_s28, 512, %s3605_s6, [#allocation4], %s4335_s23, %s4335_s23, %s4336_s24  }
0x100e   :  { %3912 = vmatmul.msk.bf16.gmra.mxu2 %vm118_vm0, %v3452_v53 }
0x1013   :  { %v3290_v17 = vpop.f32.mrf.mxu0 }
0x1014   :  { %v3310_v49 = vsel %vm202_vm1, %v3290_v17, -inf }
0x1015   :  { %3311 = vmax.xlane.f32.xlu0 %v3310_v49 }
0x101b   :  { %v3292_v18 = vpop.f32.mrf.mxu0 }
0x101c   :  { %v3313_v63 = vsel %vm202_vm1, %v3292_v18, -inf }
0x101d   :  { %3314 = vmax.xlane.f32.xlu1 %v3313_v63 }
0x1023   :  { %v3295_v39 = vpop.f32.mrf.mxu0 }
0x1024   :  { %v3316_v21 = vsel %vm202_vm1, %v3295_v39, -inf }
0x1025   :  { %3317 = vmax.xlane.f32.xlu2 %v3316_v21 }
0x102b   :  { %v3297_v23 = vpop.f32.mrf.mxu0 }
0x102c   :  { %v3319_v0 = vsel %vm202_vm1, %v3297_v23, -inf }
0x102d   :  { %3320 = vmax.xlane.f32.xlu0 %v3319_v0 }
0x1033   :  { %v5808_v7 = vpop.f32.mrf.mxu0 }
0x1034   :  { %v3322_v56 = vsel %vm202_vm1, %v5808_v7, -inf }
0x1035   :  { %3323 = vmax.xlane.f32.xlu1 %v3322_v56 }
0x103b   :  { %v5812_v2 = vpop.f32.mrf.mxu0 }
0x103c   :  { %v3325_v50 = vsel %vm202_vm1, %v5812_v2, -inf }
0x103d   :  { %3326 = vmax.xlane.f32.xlu2 %v3325_v50 }
0x1043   :  { %v5816_v5 = vpop.f32.mrf.mxu0 }
0x1044   :  { %v3328_v25 = vsel %vm202_vm1, %v5816_v5, -inf }
0x1045   :  { %3329 = vmax.xlane.f32.xlu0 %v3328_v25 }
0x104b   :  { %v5820_v58 = vpop.f32.mrf.mxu0 }
0x104c   :  { %v3331_v42 = vsel %vm202_vm1, %v5820_v58, -inf }
0x104d   :  { %3332 = vmax.xlane.f32.xlu1 %v3331_v42 }
0x1061   :  { %v3518_v48 = vpop.f32.mrf.mxu2 }
0x1062   :  { %v3562_v26 = vadd.f32 %v3518_v48, %v5545_v11 }
0x1064   :  { %3582 = vst.msk [vmem:[%s5935_s5] sm:$0xff] %vm118_vm0, %v3562_v26 }
0x1069   :  { %v3520_v15 = vpop.f32.mrf.mxu2 }
0x106a   :  { %v3563_v9 = vadd.f32 %v3520_v15, %v5550_v44 }
0x106c   :  { %3583 = vst.msk [vmem:[%s5935_s5 + $0x8] sm:$0xff] %vm118_vm0, %v3563_v9 }
0x1071   :  { %v3523_v34 = vpop.f32.mrf.mxu2 }
0x1072   :  { %v3564_v3 = vadd.f32 %v3523_v34, %v5559_v31 }
0x1074   :  { %3584 = vst.msk [vmem:[%s5935_s5 + $0x10] sm:$0xff] %vm118_vm0, %v3564_v3 }
0x1079   :  { %v3525_v11 = vpop.f32.mrf.mxu2 }
0x107a   :  { %v3565_v24 = vadd.f32 %v3525_v11, %v5564_v60 }
0x107c   :  { %3585 = vst.msk [vmem:[%s5935_s5 + $0x18] sm:$0xff] %vm118_vm0, %v3565_v24 }
0x1081   :  { %v3528_v44 = vpop.f32.mrf.mxu2 }
0x1082   :  { %v3566_v41 = vadd.f32 %v3528_v44, %v5573_v19 }
0x1084   :  { %3586 = vst.msk [vmem:[%s5935_s5 + $0x20] sm:$0xff] %vm118_vm0, %v3566_v41 }
0x1088   :  { %v3312_v31 = vpop.xlane.xlu0 %3311 }
0x1089   :  { %v3334_v45 = vsub.f32 %v3290_v17, %v3312_v31  ;;  %v3530_v1 = vpop.f32.mrf.mxu2 }
0x108a   :  { %v3567_v16 = vadd.f32 %v3530_v1, %v5578_v54 }
0x108b   :  { %v3342_v61 = vmul.f32 1.442695, %v3334_v45 }
0x108c   :  { %3587 = vst.msk [vmem:[%s5935_s5 + $0x28] sm:$0xff] %vm118_vm0, %v3567_v16 }
0x108d   :  { %4234 = vpow2.f32 %v3342_v61 }
0x1090   :  { %v3315_v60 = vpop.xlane.xlu1 %3314 }
0x1091   :  { %v3335_v4 = vsub.f32 %v3292_v18, %v3315_v60  ;;  %v3533_v19 = vpop.f32.mrf.mxu2 }
0x1092   :  { %v3568_v59 = vadd.f32 %v3533_v19, %v5589_v8 }
0x1093   :  { %v4235_v20 = vpop.eup %4234  ;;  %v3344_v22 = vmul.f32 1.442695, %v3335_v4 }
0x1094   :  { %3588 = vst.msk [vmem:[%s5935_s5 + $0x30] sm:$0xff] %vm118_vm0, %v3568_v59  ;;  %v3358_v54 = vsel %vm202_vm1, %v4235_v20, 0.0 }
0x1095   :  { %4236 = vpow2.f32 %v3344_v22  ;;  %3359 = vadd.xlane.f32.xlu2 %v3358_v54 }
0x1098   :  { %v3318_v37 = vpop.xlane.xlu2 %3317 }
0x1099   :  { %v3336_v38 = vsub.f32 %v3295_v39, %v3318_v37  ;;  %v3535_v43 = vpop.f32.mrf.mxu2 }
0x109a   :  { %v3569_v29 = vadd.f32 %v3535_v43, %v5594_v14 }
0x109b   :  { %v4237_v13 = vpop.eup %4236  ;;  %v3346_v32 = vmul.f32 1.442695, %v3336_v38 }
0x109c   :  { %3589 = vst.msk [vmem:[%s5935_s5 + $0x38] sm:$0xff] %vm118_vm0, %v3569_v29  ;;  %v3361_v8 = vsel %vm202_vm1, %v4237_v13, 0.0 }
0x109d   :  { %4238 = vpow2.f32 %v3346_v32  ;;  %3362 = vadd.xlane.f32.xlu0 %v3361_v8 }
0x10a0   :  { %v3321_v28 = vpop.xlane.xlu0 %3320 }
0x10a1   :  { %v3337_v35 = vsub.f32 %v3297_v23, %v3321_v28 }
0x10a3   :  { %v4239_v12 = vpop.eup %4238  ;;  %v3348_v57 = vmul.f32 1.442695, %v3337_v35 }
0x10a4   :  { %v3364_v55 = vsel %vm202_vm1, %v4239_v12, 0.0 }
0x10a5   :  { %4240 = vpow2.f32 %v3348_v57  ;;  %3365 = vadd.xlane.f32.xlu1 %v3364_v55 }
0x10a8   :  { %v3324_v14 = vpop.xlane.xlu1 %3323 }
0x10a9   :  { %v3338_v47 = vsub.f32 %v5808_v7, %v3324_v14 }
0x10ab   :  { %v4241_v52 = vpop.eup %4240  ;;  %v3350_v27 = vmul.f32 1.442695, %v3338_v47 }
0x10ac   :  { %v3367_v40 = vsel %vm202_vm1, %v4241_v52, 0.0 }
0x10ad   :  { %4242 = vpow2.f32 %v3350_v27  ;;  %3368 = vadd.xlane.f32.xlu2 %v3367_v40 }
0x10b0   :  { %v3327_v53 = vpop.xlane.xlu2 %3326 }
0x10b1   :  { %v3339_v17 = vsub.f32 %v5812_v2, %v3327_v53 }
0x10b3   :  { %v4243_v49 = vpop.eup %4242  ;;  %v3352_v18 = vmul.f32 1.442695, %v3339_v17 }
0x10b4   :  { %v3370_v63 = vsel %vm202_vm1, %v4243_v49, 0.0 }
0x10b5   :  { %4244 = vpow2.f32 %v3352_v18  ;;  %3371 = vadd.xlane.f32.xlu0 %v3370_v63 }
0x10b8   :  { %v3330_v39 = vpop.xlane.xlu0 %3329 }
0x10b9   :  { %v3340_v21 = vsub.f32 %v5816_v5, %v3330_v39 }
0x10bb   :  { %v4245_v23 = vpop.eup %4244  ;;  %v3354_v0 = vmul.f32 1.442695, %v3340_v21 }
0x10bc   :  { %v3373_v7 = vsel %vm202_vm1, %v4245_v23, 0.0 }
0x10bd   :  { %4246 = vpow2.f32 %v3354_v0  ;;  %3374 = vadd.xlane.f32.xlu1 %v3373_v7 }
0x10c0   :  { %v3333_v56 = vpop.xlane.xlu1 %3332 }
0x10c1   :  { %v3341_v50 = vsub.f32 %v5820_v58, %v3333_v56 }
0x10c3   :  { %v4247_v25 = vpop.eup %4246  ;;  %v3356_v2 = vmul.f32 1.442695, %v3341_v50 }
0x10c4   :  { %v3376_v42 = vsel %vm202_vm1, %v4247_v25, 0.0 }
0x10c5   :  { %4248 = vpow2.f32 %v3356_v2  ;;  %3377 = vadd.xlane.f32.xlu2 %v3376_v42 }
0x10cb   :  { %v4249_v48 = vpop.eup %4248 }
0x10cc   :  { %v3379_v26 = vsel %vm202_vm1, %v4249_v48, 0.0 }
0x10cd   :  { %3380 = vadd.xlane.f32.xlu0 %v3379_v26 }
0x1108   :  { %v3360_v5 = vpop.xlane.xlu2 %3359 }
0x1109   :  { %4250 = vrcp.f32 %v3360_v5 }
0x110f   :  { %v4251_v9 = vpop.eup %4250 }
0x1110   :  { %v3363_v15 = vpop.xlane.xlu0 %3362  ;;  %v3390_v3 = vmul.f32 %v4251_v9, %v4235_v20 }
0x1111   :  { %4252 = vrcp.f32 %v3363_v15 }
0x1117   :  { %v4253_v34 = vpop.eup %4252 }
0x1118   :  { %v3391_v11 = vmul.f32 %v4253_v34, %v4237_v13  ;;  %v3366_v58 = vpop.xlane.xlu1 %3365 }
0x1119   :  { %4254 = vrcp.f32 %v3366_v58 }
0x111a   :  { %v3398_v24 = vpack.c.bf16 %v3391_v11, %v3390_v3 }
0x111c   :  { %3895 = vmatmul.msk.bf16.vlgmr.msrb.gmra.mxu1 %vm202_vm1, %v3398_v24 }
0x111f   :  { %v4255_v41 = vpop.eup %4254 }
0x1120   :  { %v3369_v44 = vpop.xlane.xlu2 %3368  ;;  %v3392_v45 = vmul.f32 %v4255_v41, %v4239_v12 }
0x1121   :  { %4256 = vrcp.f32 %v3369_v44 }
0x1127   :  { %v4257_v31 = vpop.eup %4256 }
0x1128   :  { %v3393_v1 = vmul.f32 %v4257_v31, %v4241_v52  ;;  %v3372_v61 = vpop.xlane.xlu0 %3371 }
0x1129   :  { %4258 = vrcp.f32 %v3372_v61 }
0x112a   :  { %v3399_v16 = vpack.c.bf16 %v3393_v1, %v3392_v45 }
0x112c   :  { %3896 = vmatmul.msk.bf16.gmra.mxu1 %vm202_vm1, %v3399_v16 }
0x112f   :  { %v4259_v4 = vpop.eup %4258 }
0x1130   :  { %v3375_v60 = vpop.xlane.xlu1 %3374  ;;  %v3394_v59 = vmul.f32 %v4259_v4, %v4243_v49 }
0x1131   :  { %4260 = vrcp.f32 %v3375_v60 }
0x1137   :  { %v4261_v19 = vpop.eup %4260 }
0x1138   :  { %v3395_v20 = vmul.f32 %v4261_v19, %v4245_v23  ;;  %v3378_v54 = vpop.xlane.xlu2 %3377 }
0x1139   :  { %4262 = vrcp.f32 %v3378_v54 }
0x113a   :  { %v3400_v22 = vpack.c.bf16 %v3395_v20, %v3394_v59 }
0x113c   :  { %3897 = vmatmul.msk.bf16.gmra.mxu1 %vm202_vm1, %v3400_v22 }
0x113f   :  { %v4263_v38 = vpop.eup %4262 }
0x1140   :  { %v3381_v37 = vpop.xlane.xlu0 %3380  ;;  %v3396_v29 = vmul.f32 %v4263_v38, %v4247_v25 }
0x1141   :  { %4264 = vrcp.f32 %v3381_v37 }
0x1147   :  { %v4265_v43 = vpop.eup %4264 }
0x1148   :  { %v3397_v13 = vmul.f32 %v4265_v43, %v4249_v48 }
0x114a   :  { %v3401_v32 = vpack.c.bf16 %v3397_v13, %v3396_v29 }
0x114c   :  { %3898 = vmatmul.msk.bf16.gmra.mxu1 %vm202_vm1, %v3401_v32 }
0x1199   :  { %v3427_v8 = vpop.f32.mrf.mxu1 }
0x11a1   :  { %v3429_v28 = vpop.f32.mrf.mxu1 }
0x11a2   :  { %v3453_v35 = vpack.c.bf16 %v3429_v28, %v3427_v8 }
0x11a4   :  { %3913 = vmatmul.msk.bf16.gmra.mxu2 %vm118_vm0, %v3453_v35 }
0x11a9   :  { %v3432_v12 = vpop.f32.mrf.mxu1 }
0x11b1   :  { %v3434_v57 = vpop.f32.mrf.mxu1 }
0x11b2   :  { %v3454_v55 = vpack.c.bf16 %v3434_v57, %v3432_v12 }
0x11b4   :  { %3914 = vmatmul.msk.bf16.gmra.mxu2 %vm118_vm0, %v3454_v55 }
0x11b9   :  { %v3437_v14 = vpop.f32.mrf.mxu1 }
0x11c1   :  { %v3439_v47 = vpop.f32.mrf.mxu1 }
0x11c2   :  { %v3455_v52 = vpack.c.bf16 %v3439_v47, %v3437_v14 }
0x11c4   :  { %3915 = vmatmul.msk.bf16.gmra.mxu2 %vm118_vm0, %v3455_v52 }
0x11c9   :  { %v3442_v27 = vpop.f32.mrf.mxu1 }
0x11d1   :  { %v3444_v40 = vpop.f32.mrf.mxu1 }
0x11d2   :  { %v3456_v53 = vpack.c.bf16 %v3444_v40, %v3442_v27 }
0x11d4   :  { %3916 = vmatmul.msk.bf16.gmra.mxu2 %vm118_vm0, %v3456_v53 }
0x1227   :  { %v3538_v17 = vpop.f32.mrf.mxu2 }
0x1228   :  { %v3570_v49 = vadd.f32 %v3538_v17, %v5621_v30 }
0x122a   :  { %3590 = vst.msk [vmem:[%s5935_s5 + $0x40] sm:$0xff] %vm118_vm0, %v3570_v49 }
0x122f   :  { %v3540_v18 = vpop.f32.mrf.mxu2 }
0x1230   :  { %v3571_v63 = vadd.f32 %v3540_v18, %v5628_v51 }
0x1232   :  { %3591 = vst.msk [vmem:[%s5935_s5 + $0x48] sm:$0xff] %vm118_vm0, %v3571_v63 }
0x1237   :  { %v3543_v39 = vpop.f32.mrf.mxu2 }
0x1238   :  { %v3572_v21 = vadd.f32 %v3543_v39, %v5644_v62 }
0x123a   :  { %3592 = vst.msk [vmem:[%s5935_s5 + $0x50] sm:$0xff] %vm118_vm0, %v3572_v21 }
0x123f   :  { %v3545_v30 = vpop.f32.mrf.mxu2 }
0x1240   :  { %v3573_v23 = vadd.f32 %v3545_v30, %v5651_v10 }
0x1242   :  { %3593 = vst.msk [vmem:[%s5935_s5 + $0x58] sm:$0xff] %vm118_vm0, %v3573_v23 }
0x1247   :  { %v3548_v51 = vpop.f32.mrf.mxu2 }
0x1248   :  { %v3574_v0 = vadd.f32 %v3548_v51, %v5663_v6 }
0x124a   :  { %3594 = vst.msk [vmem:[%s5935_s5 + $0x60] sm:$0xff] %vm118_vm0, %v3574_v0 }
0x124f   :  { %v3550_v62 = vpop.f32.mrf.mxu2 }
0x1250   :  { %v3575_v7 = vadd.f32 %v3550_v62, %v5668_v36 }
0x1252   :  { %3595 = vst.msk [vmem:[%s5935_s5 + $0x68] sm:$0xff] %vm118_vm0, %v3575_v7 }
0x1257   :  { %v3553_v10 = vpop.f32.mrf.mxu2 }
0x1258   :  { %v3576_v56 = vadd.f32 %v3553_v10, %v5677_v46 }
0x125a   :  { %3596 = vst.msk [vmem:[%s5935_s5 + $0x70] sm:$0xff] %vm118_vm0, %v3576_v56 }
0x125f   :  { %v3555_v6 = vpop.f32.mrf.mxu2 }
0x1260   :  { %v3577_v50 = vadd.f32 %v3555_v6, %v5682_v33 }
0x1262   :  { %3597 = vst.msk [vmem:[%s5935_s5 + $0x78] sm:$0xff] %vm118_vm0, %v3577_v50 }
0x1263   :  { %4332 = dma.done.wait [#allocation4], 512  }
0x1264   :  { %4333 = vsyncadd [#allocation4], 4294966784 }
0x1265   :  { %3619 = vsyncpa [#allocation3], 1 }
0x1266   :  { %3620 = vsyncpa [#allocation4], 1 }

</bundles_post_ra>
